<compile_context>
chip_gen: v5e
topology: v5e:2x2
jax: 0.10.0
libtpu: 0.0.40
codegen_flags: <defaults>
</compile_context>

<pallas_src>
import jax
import jax.numpy as jnp
from jax.experimental import pallas as pl
from jax.experimental.pallas import tpu as pltpu

F_IN = 54       # aux input features
F_PAD = 64      # zero-padded contraction dim for the folded input matmul
D_AUX = 128     # aux output / LSTM input size
H = 128         # LSTM hidden size (bidirectional -> 2H = 256)
EPS = 1e-5
F32 = jnp.float32
BF16 = jnp.bfloat16


# ---------------------------------------------------------------------------
# Forward math.  Arguments only need to support `a[...]`, so the same function
# serves as the Pallas kernel body (Refs -> point-of-use VMEM loads) and as
# the pure-XLA reference (plain arrays) for the self-test.
# ---------------------------------------------------------------------------
def _forward(x_ref, w_in_ref, b_in_ref, w_hh_ref, gln_ref, bln_ref,
             w1_ref, b1_ref, g1_ref, be1_ref,
             w2_ref, b2_ref, g2_ref, be2_ref,
             w3_ref, b3_ref, g3_ref, be3_ref):
    x = x_ref[...].astype(BF16)                        # (N, F_PAD)
    N = x.shape[0]

    def bn_train(v, g_ref, b_ref):                     # BatchNorm1d, train mode
        mu = jnp.mean(v, axis=0, keepdims=True)
        var = jnp.mean((v - mu) ** 2, axis=0, keepdims=True)   # biased variance
        return g_ref[...] * (v - mu) * jax.lax.rsqrt(var + EPS) + b_ref[...]

    # Folded aux Linear + LSTM input projection, both directions in one matmul.
    gx_all = jnp.dot(x, w_in_ref[...], preferred_element_type=F32) + b_in_ref[...]
    gx_f = gx_all[:, :4 * H]                           # (N, 4H) forward dir
    gx_b = gx_all[:, 4 * H:]                           # (N, 4H) backward dir

    # Fused bidirectional recurrence: one block-diagonal (2,2H)x(2H,4H) matmul
    # per step computes h_f @ W_hh_f and h_b @ W_hh_b simultaneously.
    zeros_h = jnp.zeros((1, H), F32)
    h_f = zeros_h
    h_b = zeros_h
    c = jnp.zeros((2, H), F32)                         # row 0: fwd cell, row 1: bwd cell
    hf_rows = [None] * N
    hb_rows = [None] * N
    for s in range(N):                                 # unrolled; N is small
        tb = N - 1 - s                                 # backward-direction time index
        lhs = jnp.concatenate(
            [jnp.concatenate([h_f, zeros_h], axis=1),
             jnp.concatenate([zeros_h, h_b], axis=1)], axis=0).astype(BF16)   # (2, 2H)
        gates = (jnp.concatenate([gx_f[s:s + 1, :], gx_b[tb:tb + 1, :]], axis=0)
                 + jnp.dot(lhs, w_hh_ref[...], preferred_element_type=F32))   # (2, 4H)
        i_g = jax.nn.sigmoid(gates[:, 0:H])            # PyTorch gate order: i, f, g, o
        f_g = jax.nn.sigmoid(gates[:, H:2 * H])
        c_g = jnp.tanh(gates[:, 2 * H:3 * H])
        o_g = jax.nn.sigmoid(gates[:, 3 * H:4 * H])
        c = f_g * c + i_g * c_g
        h = o_g * jnp.tanh(c)                          # (2, H)
        h_f = h[0:1, :]
        h_b = h[1:2, :]
        hf_rows[s] = h_f
        hb_rows[tb] = h_b

    z = jnp.concatenate([jnp.concatenate(hf_rows, axis=0),
                         jnp.concatenate(hb_rows, axis=0)], axis=1)   # (N, 2H)
    z = bn_train(z, gln_ref, bln_ref)                  # lstm_block BN (no ReLU)

    def dense(v, w_ref, b_ref, g_ref, be_ref):         # dense_block
        v = jnp.dot(v.astype(BF16), w_ref[...], preferred_element_type=F32) + b_ref[...]
        return jnp.maximum(bn_train(v, g_ref, be_ref), 0.0)

    z = dense(z, w1_ref, b1_ref, g1_ref, be1_ref)      # (N, 128)
    z = dense(z, w2_ref, b2_ref, g2_ref, be2_ref)      # (N, 64)
    z = dense(z, w3_ref, b3_ref, g3_ref, be3_ref)      # (N, 2)

    m = jnp.max(z, axis=1, keepdims=True)              # Softmax(dim=1)
    e = jnp.exp(z - m)
    return e / jnp.sum(e, axis=1, keepdims=True)


# ---------------------------------------------------------------------------
# Pallas kernel: everything resident in VMEM, single invocation (no grid)
# ---------------------------------------------------------------------------
def _kernel(*refs):
    out_ref = refs[-1]
    out_ref[...] = _forward(*refs[:-1]).astype(out_ref.dtype)


def _pad_features(x):
    return jnp.pad(x, ((0, 0), (0, F_PAD - x.shape[1])))


def blstm_classifier(x, params):
    x_pad = _pad_features(x)
    N = x_pad.shape[0]
    args = (x_pad,) + tuple(params)
    return pl.pallas_call(
        _kernel,
        out_shape=jax.ShapeDtypeStruct((N, 2), jnp.float32),
        in_specs=[pl.BlockSpec(memory_space=pltpu.MemorySpace.VMEM)] * len(args),
        out_specs=pl.BlockSpec(memory_space=pltpu.MemorySpace.VMEM),
    )(*args)


# ---------------------------------------------------------------------------
# Deterministic parameter init (PyTorch-like uniform ranges) + weight folding
# ---------------------------------------------------------------------------
def init_raw_params(key):
    ks = iter(jax.random.split(key, 32))

    def uni(shape, bound):
        return jax.random.uniform(next(ks), shape, F32, -bound, bound)

    inv = lambda n: 1.0 / jnp.sqrt(jnp.float32(n))

    aux_w = uni((F_IN, D_AUX), inv(F_IN))              # Linear(54, 128), (in, out)
    aux_b = uni((1, D_AUX), inv(F_IN))

    def lstm_dir():
        w_ih = uni((D_AUX, 4 * H), inv(H))             # gates [i, f, g, o]
        w_hh = uni((H, 4 * H), inv(H))
        bias = uni((1, 4 * H), inv(H)) + uni((1, 4 * H), inv(H))   # b_ih + b_hh
        return w_ih, w_hh, bias

    wih_f, whh_f, bias_f = lstm_dir()
    wih_b, whh_b, bias_b = lstm_dir()

    gln = jnp.ones((1, 2 * H), F32)
    bln = jnp.zeros((1, 2 * H), F32)

    def dense_params(din, dout):
        return (uni((din, dout), inv(din)), uni((1, dout), inv(din)),
                jnp.ones((1, dout), F32), jnp.zeros((1, dout), F32))

    w1, b1, g1, be1 = dense_params(2 * H, 128)
    w2, b2, g2, be2 = dense_params(128, 64)
    w3, b3, g3, be3 = dense_params(64, 2)

    return (aux_w, aux_b, wih_f, whh_f, bias_f, wih_b, whh_b, bias_b,
            gln, bln, w1, b1, g1, be1, w2, b2, g2, be2, w3, b3, g3, be3)


def fold_params(raw):
    """Fold aux Linear into the LSTM input weights, concatenate both directions,
    zero-pad the contraction dim to F_PAD, cast matmul weights to bf16."""
    (aux_w, aux_b, wih_f, whh_f, bias_f, wih_b, whh_b, bias_b,
     gln, bln, w1, b1, g1, be1, w2, b2, g2, be2, w3, b3, g3, be3) = raw

    w_in = jnp.concatenate([aux_w @ wih_f, aux_w @ wih_b], axis=1)    # (54, 8H)
    w_in = jnp.pad(w_in, ((0, F_PAD - F_IN), (0, 0))).astype(BF16)    # (64, 8H)
    b_in = jnp.concatenate([aux_b @ wih_f + bias_f,
                            aux_b @ wih_b + bias_b], axis=1)          # (1, 8H) f32
    w_hh = jnp.concatenate([whh_f, whh_b], axis=0).astype(BF16)       # (2H, 4H)

    return (w_in, b_in, w_hh, gln, bln,
            w1.astype(BF16), b1, g1, be1,
            w2.astype(BF16), b2, g2, be2,
            w3.astype(BF16), b3, g3, be3)


if __name__ == "__main__":
    key = jax.random.PRNGKey(0)
    kx, kp = jax.random.split(key)

    N = 8                                    # batch (= unbatched LSTM sequence length)
    x = jax.random.normal(kx, (N, F_IN), jnp.float32)
    params = fold_params(init_raw_params(kp))

    out = blstm_classifier(x, params)
    out = jax.block_until_ready(out)

    # sanity check: identical math (same bf16 folded weights) lowered through XLA
    ref = jax.jit(lambda xp, p: _forward(xp, *p))(_pad_features(x), params)
    assert out.shape == (N, 2)
    assert bool(jnp.allclose(out, ref, atol=1e-5, rtol=1e-4))
    assert bool(jnp.allclose(jnp.sum(out, axis=1), 1.0, atol=1e-5))

    print("KERNEL_OK")
</pallas_src>

<mosaic_0001>
module attributes {stable_mosaic.version = 11 : i64} {
  func.func @_kernel(%arg0: memref<8x64xf32, #tpu.memory_space<vmem>>, %arg1: memref<64x1024xbf16, #tpu.memory_space<vmem>>, %arg2: memref<1x1024xf32, #tpu.memory_space<vmem>>, %arg3: memref<256x512xbf16, #tpu.memory_space<vmem>>, %arg4: memref<1x256xf32, #tpu.memory_space<vmem>>, %arg5: memref<1x256xf32, #tpu.memory_space<vmem>>, %arg6: memref<256x128xbf16, #tpu.memory_space<vmem>>, %arg7: memref<1x128xf32, #tpu.memory_space<vmem>>, %arg8: memref<1x128xf32, #tpu.memory_space<vmem>>, %arg9: memref<1x128xf32, #tpu.memory_space<vmem>>, %arg10: memref<128x64xbf16, #tpu.memory_space<vmem>>, %arg11: memref<1x64xf32, #tpu.memory_space<vmem>>, %arg12: memref<1x64xf32, #tpu.memory_space<vmem>>, %arg13: memref<1x64xf32, #tpu.memory_space<vmem>>, %arg14: memref<64x2xbf16, #tpu.memory_space<vmem>>, %arg15: memref<1x2xf32, #tpu.memory_space<vmem>>, %arg16: memref<1x2xf32, #tpu.memory_space<vmem>>, %arg17: memref<1x2xf32, #tpu.memory_space<vmem>>, %arg18: memref<8x2xf32, #tpu.memory_space<vmem>>) attributes {dimension_semantics = [], scalar_prefetch = 0 : i64, scratch_operands = 0 : i64, tpu.core_type = #tpu.core_type<tc>} {
    %c0 = arith.constant 0 : index
    %c0_0 = arith.constant 0 : index
    %0 = vector.load %arg0[%c0, %c0_0] : memref<8x64xf32, #tpu.memory_space<vmem>>, vector<8x64xf32>
    %1 = arith.truncf %0 : vector<8x64xf32> to vector<8x64xbf16>
    %c0_1 = arith.constant 0 : index
    %c0_2 = arith.constant 0 : index
    %2 = vector.load %arg1[%c0_1, %c0_2] : memref<64x1024xbf16, #tpu.memory_space<vmem>>, vector<64x1024xbf16>
    %cst = arith.constant dense<0.000000e+00> : vector<8x1024xf32>
    %3 = tpu.matmul %1, %2, %cst {dimension_numbers = #tpu.dot_dimension_numbers<[1], [0], [0], [1], [0, 0, 1, 1], [], []>} : vector<8x64xbf16>, vector<64x1024xbf16>, vector<8x1024xf32> -> vector<8x1024xf32>
    %c0_3 = arith.constant 0 : index
    %c0_4 = arith.constant 0 : index
    %4 = vector.load %arg2[%c0_3, %c0_4] : memref<1x1024xf32, #tpu.memory_space<vmem>>, vector<1x1024xf32>
    %5 = vector.broadcast %4 : vector<1x1024xf32> to vector<8x1024xf32>
    %6 = arith.addf %3, %5 : vector<8x1024xf32>
    %7 = vector.extract_strided_slice %6 {offsets = [0, 0], sizes = [8, 512], strides = [1, 1]} : vector<8x1024xf32> to vector<8x512xf32>
    %8 = vector.extract_strided_slice %6 {offsets = [0, 512], sizes = [8, 512], strides = [1, 1]} : vector<8x1024xf32> to vector<8x512xf32>
    %cst_5 = arith.constant 0.000000e+00 : f32
    %9 = vector.broadcast %cst_5 : f32 to vector<1x128xf32>
    %cst_6 = arith.constant 0.000000e+00 : f32
    %10 = vector.broadcast %cst_6 : f32 to vector<2x128xf32>
    %11 = tpu.concatenate %9, %9 in 1 : vector<1x128xf32>, vector<1x128xf32> -> vector<1x256xf32>
    %12 = tpu.concatenate %9, %9 in 1 : vector<1x128xf32>, vector<1x128xf32> -> vector<1x256xf32>
    %13 = tpu.concatenate %11, %12 in 0 : vector<1x256xf32>, vector<1x256xf32> -> vector<2x256xf32>
    %14 = arith.truncf %13 : vector<2x256xf32> to vector<2x256xbf16>
    %15 = vector.extract_strided_slice %7 {offsets = [0, 0], sizes = [1, 512], strides = [1, 1]} : vector<8x512xf32> to vector<1x512xf32>
    %16 = vector.extract_strided_slice %8 {offsets = [7, 0], sizes = [1, 512], strides = [1, 1]} : vector<8x512xf32> to vector<1x512xf32>
    %17 = tpu.concatenate %15, %16 in 0 : vector<1x512xf32>, vector<1x512xf32> -> vector<2x512xf32>
    %c0_7 = arith.constant 0 : index
    %c0_8 = arith.constant 0 : index
    %18 = vector.load %arg3[%c0_7, %c0_8] : memref<256x512xbf16, #tpu.memory_space<vmem>>, vector<256x512xbf16>
    %cst_9 = arith.constant dense<0.000000e+00> : vector<2x512xf32>
    %19 = tpu.matmul %14, %18, %cst_9 {dimension_numbers = #tpu.dot_dimension_numbers<[1], [0], [0], [1], [0, 0, 1, 1], [], []>} : vector<2x256xbf16>, vector<256x512xbf16>, vector<2x512xf32> -> vector<2x512xf32>
    %20 = arith.addf %17, %19 : vector<2x512xf32>
    %21 = vector.extract_strided_slice %20 {offsets = [0, 0], sizes = [2, 128], strides = [1, 1]} : vector<2x512xf32> to vector<2x128xf32>
    %22 = arith.negf %21 : vector<2x128xf32>
    %23 = math.exp %22 : vector<2x128xf32>
    %cst_10 = arith.constant 1.000000e+00 : f32
    %24 = vector.broadcast %cst_10 : f32 to vector<2x128xf32>
    %25 = arith.addf %24, %23 : vector<2x128xf32>
    %26 = arith.divf %24, %25 : vector<2x128xf32>
    %27 = vector.extract_strided_slice %20 {offsets = [0, 128], sizes = [2, 128], strides = [1, 1]} : vector<2x512xf32> to vector<2x128xf32>
    %28 = arith.negf %27 : vector<2x128xf32>
    %29 = math.exp %28 : vector<2x128xf32>
    %cst_11 = arith.constant 1.000000e+00 : f32
    %30 = vector.broadcast %cst_11 : f32 to vector<2x128xf32>
    %31 = arith.addf %30, %29 : vector<2x128xf32>
    %32 = arith.divf %30, %31 : vector<2x128xf32>
    %33 = vector.extract_strided_slice %20 {offsets = [0, 256], sizes = [2, 128], strides = [1, 1]} : vector<2x512xf32> to vector<2x128xf32>
    %34 = math.tanh %33 : vector<2x128xf32>
    %35 = vector.extract_strided_slice %20 {offsets = [0, 384], sizes = [2, 128], strides = [1, 1]} : vector<2x512xf32> to vector<2x128xf32>
    %36 = arith.negf %35 : vector<2x128xf32>
    %37 = math.exp %36 : vector<2x128xf32>
    %cst_12 = arith.constant 1.000000e+00 : f32
    %38 = vector.broadcast %cst_12 : f32 to vector<2x128xf32>
    %39 = arith.addf %38, %37 : vector<2x128xf32>
    %40 = arith.divf %38, %39 : vector<2x128xf32>
    %41 = arith.mulf %32, %10 : vector<2x128xf32>
    %42 = arith.mulf %26, %34 : vector<2x128xf32>
    %43 = arith.addf %41, %42 : vector<2x128xf32>
    %44 = math.tanh %43 : vector<2x128xf32>
    %45 = arith.mulf %40, %44 : vector<2x128xf32>
    %46 = vector.extract_strided_slice %45 {offsets = [0, 0], sizes = [1, 128], strides = [1, 1]} : vector<2x128xf32> to vector<1x128xf32>
    %47 = vector.extract_strided_slice %45 {offsets = [1, 0], sizes = [1, 128], strides = [1, 1]} : vector<2x128xf32> to vector<1x128xf32>
    %48 = tpu.concatenate %46, %9 in 1 : vector<1x128xf32>, vector<1x128xf32> -> vector<1x256xf32>
    %49 = tpu.concatenate %9, %47 in 1 : vector<1x128xf32>, vector<1x128xf32> -> vector<1x256xf32>
    %50 = tpu.concatenate %48, %49 in 0 : vector<1x256xf32>, vector<1x256xf32> -> vector<2x256xf32>
    %51 = arith.truncf %50 : vector<2x256xf32> to vector<2x256xbf16>
    %52 = vector.extract_strided_slice %7 {offsets = [1, 0], sizes = [1, 512], strides = [1, 1]} : vector<8x512xf32> to vector<1x512xf32>
    %53 = vector.extract_strided_slice %8 {offsets = [6, 0], sizes = [1, 512], strides = [1, 1]} : vector<8x512xf32> to vector<1x512xf32>
    %54 = tpu.concatenate %52, %53 in 0 : vector<1x512xf32>, vector<1x512xf32> -> vector<2x512xf32>
    %c0_13 = arith.constant 0 : index
    %c0_14 = arith.constant 0 : index
    %55 = vector.load %arg3[%c0_13, %c0_14] : memref<256x512xbf16, #tpu.memory_space<vmem>>, vector<256x512xbf16>
    %cst_15 = arith.constant dense<0.000000e+00> : vector<2x512xf32>
    %56 = tpu.matmul %51, %55, %cst_15 {dimension_numbers = #tpu.dot_dimension_numbers<[1], [0], [0], [1], [0, 0, 1, 1], [], []>} : vector<2x256xbf16>, vector<256x512xbf16>, vector<2x512xf32> -> vector<2x512xf32>
    %57 = arith.addf %54, %56 : vector<2x512xf32>
    %58 = vector.extract_strided_slice %57 {offsets = [0, 0], sizes = [2, 128], strides = [1, 1]} : vector<2x512xf32> to vector<2x128xf32>
    %59 = arith.negf %58 : vector<2x128xf32>
    %60 = math.exp %59 : vector<2x128xf32>
    %cst_16 = arith.constant 1.000000e+00 : f32
    %61 = vector.broadcast %cst_16 : f32 to vector<2x128xf32>
    %62 = arith.addf %61, %60 : vector<2x128xf32>
    %63 = arith.divf %61, %62 : vector<2x128xf32>
    %64 = vector.extract_strided_slice %57 {offsets = [0, 128], sizes = [2, 128], strides = [1, 1]} : vector<2x512xf32> to vector<2x128xf32>
    %65 = arith.negf %64 : vector<2x128xf32>
    %66 = math.exp %65 : vector<2x128xf32>
    %cst_17 = arith.constant 1.000000e+00 : f32
    %67 = vector.broadcast %cst_17 : f32 to vector<2x128xf32>
    %68 = arith.addf %67, %66 : vector<2x128xf32>
    %69 = arith.divf %67, %68 : vector<2x128xf32>
    %70 = vector.extract_strided_slice %57 {offsets = [0, 256], sizes = [2, 128], strides = [1, 1]} : vector<2x512xf32> to vector<2x128xf32>
    %71 = math.tanh %70 : vector<2x128xf32>
    %72 = vector.extract_strided_slice %57 {offsets = [0, 384], sizes = [2, 128], strides = [1, 1]} : vector<2x512xf32> to vector<2x128xf32>
    %73 = arith.negf %72 : vector<2x128xf32>
    %74 = math.exp %73 : vector<2x128xf32>
    %cst_18 = arith.constant 1.000000e+00 : f32
    %75 = vector.broadcast %cst_18 : f32 to vector<2x128xf32>
    %76 = arith.addf %75, %74 : vector<2x128xf32>
    %77 = arith.divf %75, %76 : vector<2x128xf32>
    %78 = arith.mulf %69, %43 : vector<2x128xf32>
    %79 = arith.mulf %63, %71 : vector<2x128xf32>
    %80 = arith.addf %78, %79 : vector<2x128xf32>
    %81 = math.tanh %80 : vector<2x128xf32>
    %82 = arith.mulf %77, %81 : vector<2x128xf32>
    %83 = vector.extract_strided_slice %82 {offsets = [0, 0], sizes = [1, 128], strides = [1, 1]} : vector<2x128xf32> to vector<1x128xf32>
    %84 = vector.extract_strided_slice %82 {offsets = [1, 0], sizes = [1, 128], strides = [1, 1]} : vector<2x128xf32> to vector<1x128xf32>
    %85 = tpu.concatenate %83, %9 in 1 : vector<1x128xf32>, vector<1x128xf32> -> vector<1x256xf32>
    %86 = tpu.concatenate %9, %84 in 1 : vector<1x128xf32>, vector<1x128xf32> -> vector<1x256xf32>
    %87 = tpu.concatenate %85, %86 in 0 : vector<1x256xf32>, vector<1x256xf32> -> vector<2x256xf32>
    %88 = arith.truncf %87 : vector<2x256xf32> to vector<2x256xbf16>
    %89 = vector.extract_strided_slice %7 {offsets = [2, 0], sizes = [1, 512], strides = [1, 1]} : vector<8x512xf32> to vector<1x512xf32>
    %90 = vector.extract_strided_slice %8 {offsets = [5, 0], sizes = [1, 512], strides = [1, 1]} : vector<8x512xf32> to vector<1x512xf32>
    %91 = tpu.concatenate %89, %90 in 0 : vector<1x512xf32>, vector<1x512xf32> -> vector<2x512xf32>
    %c0_19 = arith.constant 0 : index
    %c0_20 = arith.constant 0 : index
    %92 = vector.load %arg3[%c0_19, %c0_20] : memref<256x512xbf16, #tpu.memory_space<vmem>>, vector<256x512xbf16>
    %cst_21 = arith.constant dense<0.000000e+00> : vector<2x512xf32>
    %93 = tpu.matmul %88, %92, %cst_21 {dimension_numbers = #tpu.dot_dimension_numbers<[1], [0], [0], [1], [0, 0, 1, 1], [], []>} : vector<2x256xbf16>, vector<256x512xbf16>, vector<2x512xf32> -> vector<2x512xf32>
    %94 = arith.addf %91, %93 : vector<2x512xf32>
    %95 = vector.extract_strided_slice %94 {offsets = [0, 0], sizes = [2, 128], strides = [1, 1]} : vector<2x512xf32> to vector<2x128xf32>
    %96 = arith.negf %95 : vector<2x128xf32>
    %97 = math.exp %96 : vector<2x128xf32>
    %cst_22 = arith.constant 1.000000e+00 : f32
    %98 = vector.broadcast %cst_22 : f32 to vector<2x128xf32>
    %99 = arith.addf %98, %97 : vector<2x128xf32>
    %100 = arith.divf %98, %99 : vector<2x128xf32>
    %101 = vector.extract_strided_slice %94 {offsets = [0, 128], sizes = [2, 128], strides = [1, 1]} : vector<2x512xf32> to vector<2x128xf32>
    %102 = arith.negf %101 : vector<2x128xf32>
    %103 = math.exp %102 : vector<2x128xf32>
    %cst_23 = arith.constant 1.000000e+00 : f32
    %104 = vector.broadcast %cst_23 : f32 to vector<2x128xf32>
    %105 = arith.addf %104, %103 : vector<2x128xf32>
    %106 = arith.divf %104, %105 : vector<2x128xf32>
    %107 = vector.extract_strided_slice %94 {offsets = [0, 256], sizes = [2, 128], strides = [1, 1]} : vector<2x512xf32> to vector<2x128xf32>
    %108 = math.tanh %107 : vector<2x128xf32>
    %109 = vector.extract_strided_slice %94 {offsets = [0, 384], sizes = [2, 128], strides = [1, 1]} : vector<2x512xf32> to vector<2x128xf32>
    %110 = arith.negf %109 : vector<2x128xf32>
    %111 = math.exp %110 : vector<2x128xf32>
    %cst_24 = arith.constant 1.000000e+00 : f32
    %112 = vector.broadcast %cst_24 : f32 to vector<2x128xf32>
    %113 = arith.addf %112, %111 : vector<2x128xf32>
    %114 = arith.divf %112, %113 : vector<2x128xf32>
    %115 = arith.mulf %106, %80 : vector<2x128xf32>
    %116 = arith.mulf %100, %108 : vector<2x128xf32>
    %117 = arith.addf %115, %116 : vector<2x128xf32>
    %118 = math.tanh %117 : vector<2x128xf32>
    %119 = arith.mulf %114, %118 : vector<2x128xf32>
    %120 = vector.extract_strided_slice %119 {offsets = [0, 0], sizes = [1, 128], strides = [1, 1]} : vector<2x128xf32> to vector<1x128xf32>
    %121 = vector.extract_strided_slice %119 {offsets = [1, 0], sizes = [1, 128], strides = [1, 1]} : vector<2x128xf32> to vector<1x128xf32>
    %122 = tpu.concatenate %120, %9 in 1 : vector<1x128xf32>, vector<1x128xf32> -> vector<1x256xf32>
    %123 = tpu.concatenate %9, %121 in 1 : vector<1x128xf32>, vector<1x128xf32> -> vector<1x256xf32>
    %124 = tpu.concatenate %122, %123 in 0 : vector<1x256xf32>, vector<1x256xf32> -> vector<2x256xf32>
    %125 = arith.truncf %124 : vector<2x256xf32> to vector<2x256xbf16>
    %126 = vector.extract_strided_slice %7 {offsets = [3, 0], sizes = [1, 512], strides = [1, 1]} : vector<8x512xf32> to vector<1x512xf32>
    %127 = vector.extract_strided_slice %8 {offsets = [4, 0], sizes = [1, 512], strides = [1, 1]} : vector<8x512xf32> to vector<1x512xf32>
    %128 = tpu.concatenate %126, %127 in 0 : vector<1x512xf32>, vector<1x512xf32> -> vector<2x512xf32>
    %c0_25 = arith.constant 0 : index
    %c0_26 = arith.constant 0 : index
    %129 = vector.load %arg3[%c0_25, %c0_26] : memref<256x512xbf16, #tpu.memory_space<vmem>>, vector<256x512xbf16>
    %cst_27 = arith.constant dense<0.000000e+00> : vector<2x512xf32>
    %130 = tpu.matmul %125, %129, %cst_27 {dimension_numbers = #tpu.dot_dimension_numbers<[1], [0], [0], [1], [0, 0, 1, 1], [], []>} : vector<2x256xbf16>, vector<256x512xbf16>, vector<2x512xf32> -> vector<2x512xf32>
    %131 = arith.addf %128, %130 : vector<2x512xf32>
    %132 = vector.extract_strided_slice %131 {offsets = [0, 0], sizes = [2, 128], strides = [1, 1]} : vector<2x512xf32> to vector<2x128xf32>
    %133 = arith.negf %132 : vector<2x128xf32>
    %134 = math.exp %133 : vector<2x128xf32>
    %cst_28 = arith.constant 1.000000e+00 : f32
    %135 = vector.broadcast %cst_28 : f32 to vector<2x128xf32>
    %136 = arith.addf %135, %134 : vector<2x128xf32>
    %137 = arith.divf %135, %136 : vector<2x128xf32>
    %138 = vector.extract_strided_slice %131 {offsets = [0, 128], sizes = [2, 128], strides = [1, 1]} : vector<2x512xf32> to vector<2x128xf32>
    %139 = arith.negf %138 : vector<2x128xf32>
    %140 = math.exp %139 : vector<2x128xf32>
    %cst_29 = arith.constant 1.000000e+00 : f32
    %141 = vector.broadcast %cst_29 : f32 to vector<2x128xf32>
    %142 = arith.addf %141, %140 : vector<2x128xf32>
    %143 = arith.divf %141, %142 : vector<2x128xf32>
    %144 = vector.extract_strided_slice %131 {offsets = [0, 256], sizes = [2, 128], strides = [1, 1]} : vector<2x512xf32> to vector<2x128xf32>
    %145 = math.tanh %144 : vector<2x128xf32>
    %146 = vector.extract_strided_slice %131 {offsets = [0, 384], sizes = [2, 128], strides = [1, 1]} : vector<2x512xf32> to vector<2x128xf32>
    %147 = arith.negf %146 : vector<2x128xf32>
    %148 = math.exp %147 : vector<2x128xf32>
    %cst_30 = arith.constant 1.000000e+00 : f32
    %149 = vector.broadcast %cst_30 : f32 to vector<2x128xf32>
    %150 = arith.addf %149, %148 : vector<2x128xf32>
    %151 = arith.divf %149, %150 : vector<2x128xf32>
    %152 = arith.mulf %143, %117 : vector<2x128xf32>
    %153 = arith.mulf %137, %145 : vector<2x128xf32>
    %154 = arith.addf %152, %153 : vector<2x128xf32>
    %155 = math.tanh %154 : vector<2x128xf32>
    %156 = arith.mulf %151, %155 : vector<2x128xf32>
    %157 = vector.extract_strided_slice %156 {offsets = [0, 0], sizes = [1, 128], strides = [1, 1]} : vector<2x128xf32> to vector<1x128xf32>
    %158 = vector.extract_strided_slice %156 {offsets = [1, 0], sizes = [1, 128], strides = [1, 1]} : vector<2x128xf32> to vector<1x128xf32>
    %159 = tpu.concatenate %157, %9 in 1 : vector<1x128xf32>, vector<1x128xf32> -> vector<1x256xf32>
    %160 = tpu.concatenate %9, %158 in 1 : vector<1x128xf32>, vector<1x128xf32> -> vector<1x256xf32>
    %161 = tpu.concatenate %159, %160 in 0 : vector<1x256xf32>, vector<1x256xf32> -> vector<2x256xf32>
    %162 = arith.truncf %161 : vector<2x256xf32> to vector<2x256xbf16>
    %163 = vector.extract_strided_slice %7 {offsets = [4, 0], sizes = [1, 512], strides = [1, 1]} : vector<8x512xf32> to vector<1x512xf32>
    %164 = vector.extract_strided_slice %8 {offsets = [3, 0], sizes = [1, 512], strides = [1, 1]} : vector<8x512xf32> to vector<1x512xf32>
    %165 = tpu.concatenate %163, %164 in 0 : vector<1x512xf32>, vector<1x512xf32> -> vector<2x512xf32>
    %c0_31 = arith.constant 0 : index
    %c0_32 = arith.constant 0 : index
    %166 = vector.load %arg3[%c0_31, %c0_32] : memref<256x512xbf16, #tpu.memory_space<vmem>>, vector<256x512xbf16>
    %cst_33 = arith.constant dense<0.000000e+00> : vector<2x512xf32>
    %167 = tpu.matmul %162, %166, %cst_33 {dimension_numbers = #tpu.dot_dimension_numbers<[1], [0], [0], [1], [0, 0, 1, 1], [], []>} : vector<2x256xbf16>, vector<256x512xbf16>, vector<2x512xf32> -> vector<2x512xf32>
    %168 = arith.addf %165, %167 : vector<2x512xf32>
    %169 = vector.extract_strided_slice %168 {offsets = [0, 0], sizes = [2, 128], strides = [1, 1]} : vector<2x512xf32> to vector<2x128xf32>
    %170 = arith.negf %169 : vector<2x128xf32>
    %171 = math.exp %170 : vector<2x128xf32>
    %cst_34 = arith.constant 1.000000e+00 : f32
    %172 = vector.broadcast %cst_34 : f32 to vector<2x128xf32>
    %173 = arith.addf %172, %171 : vector<2x128xf32>
    %174 = arith.divf %172, %173 : vector<2x128xf32>
    %175 = vector.extract_strided_slice %168 {offsets = [0, 128], sizes = [2, 128], strides = [1, 1]} : vector<2x512xf32> to vector<2x128xf32>
    %176 = arith.negf %175 : vector<2x128xf32>
    %177 = math.exp %176 : vector<2x128xf32>
    %cst_35 = arith.constant 1.000000e+00 : f32
    %178 = vector.broadcast %cst_35 : f32 to vector<2x128xf32>
    %179 = arith.addf %178, %177 : vector<2x128xf32>
    %180 = arith.divf %178, %179 : vector<2x128xf32>
    %181 = vector.extract_strided_slice %168 {offsets = [0, 256], sizes = [2, 128], strides = [1, 1]} : vector<2x512xf32> to vector<2x128xf32>
    %182 = math.tanh %181 : vector<2x128xf32>
    %183 = vector.extract_strided_slice %168 {offsets = [0, 384], sizes = [2, 128], strides = [1, 1]} : vector<2x512xf32> to vector<2x128xf32>
    %184 = arith.negf %183 : vector<2x128xf32>
    %185 = math.exp %184 : vector<2x128xf32>
    %cst_36 = arith.constant 1.000000e+00 : f32
    %186 = vector.broadcast %cst_36 : f32 to vector<2x128xf32>
    %187 = arith.addf %186, %185 : vector<2x128xf32>
    %188 = arith.divf %186, %187 : vector<2x128xf32>
    %189 = arith.mulf %180, %154 : vector<2x128xf32>
    %190 = arith.mulf %174, %182 : vector<2x128xf32>
    %191 = arith.addf %189, %190 : vector<2x128xf32>
    %192 = math.tanh %191 : vector<2x128xf32>
    %193 = arith.mulf %188, %192 : vector<2x128xf32>
    %194 = vector.extract_strided_slice %193 {offsets = [0, 0], sizes = [1, 128], strides = [1, 1]} : vector<2x128xf32> to vector<1x128xf32>
    %195 = vector.extract_strided_slice %193 {offsets = [1, 0], sizes = [1, 128], strides = [1, 1]} : vector<2x128xf32> to vector<1x128xf32>
    %196 = tpu.concatenate %194, %9 in 1 : vector<1x128xf32>, vector<1x128xf32> -> vector<1x256xf32>
    %197 = tpu.concatenate %9, %195 in 1 : vector<1x128xf32>, vector<1x128xf32> -> vector<1x256xf32>
    %198 = tpu.concatenate %196, %197 in 0 : vector<1x256xf32>, vector<1x256xf32> -> vector<2x256xf32>
    %199 = arith.truncf %198 : vector<2x256xf32> to vector<2x256xbf16>
    %200 = vector.extract_strided_slice %7 {offsets = [5, 0], sizes = [1, 512], strides = [1, 1]} : vector<8x512xf32> to vector<1x512xf32>
    %201 = vector.extract_strided_slice %8 {offsets = [2, 0], sizes = [1, 512], strides = [1, 1]} : vector<8x512xf32> to vector<1x512xf32>
    %202 = tpu.concatenate %200, %201 in 0 : vector<1x512xf32>, vector<1x512xf32> -> vector<2x512xf32>
    %c0_37 = arith.constant 0 : index
    %c0_38 = arith.constant 0 : index
    %203 = vector.load %arg3[%c0_37, %c0_38] : memref<256x512xbf16, #tpu.memory_space<vmem>>, vector<256x512xbf16>
    %cst_39 = arith.constant dense<0.000000e+00> : vector<2x512xf32>
    %204 = tpu.matmul %199, %203, %cst_39 {dimension_numbers = #tpu.dot_dimension_numbers<[1], [0], [0], [1], [0, 0, 1, 1], [], []>} : vector<2x256xbf16>, vector<256x512xbf16>, vector<2x512xf32> -> vector<2x512xf32>
    %205 = arith.addf %202, %204 : vector<2x512xf32>
    %206 = vector.extract_strided_slice %205 {offsets = [0, 0], sizes = [2, 128], strides = [1, 1]} : vector<2x512xf32> to vector<2x128xf32>
    %207 = arith.negf %206 : vector<2x128xf32>
    %208 = math.exp %207 : vector<2x128xf32>
    %cst_40 = arith.constant 1.000000e+00 : f32
    %209 = vector.broadcast %cst_40 : f32 to vector<2x128xf32>
    %210 = arith.addf %209, %208 : vector<2x128xf32>
    %211 = arith.divf %209, %210 : vector<2x128xf32>
    %212 = vector.extract_strided_slice %205 {offsets = [0, 128], sizes = [2, 128], strides = [1, 1]} : vector<2x512xf32> to vector<2x128xf32>
    %213 = arith.negf %212 : vector<2x128xf32>
    %214 = math.exp %213 : vector<2x128xf32>
    %cst_41 = arith.constant 1.000000e+00 : f32
    %215 = vector.broadcast %cst_41 : f32 to vector<2x128xf32>
    %216 = arith.addf %215, %214 : vector<2x128xf32>
    %217 = arith.divf %215, %216 : vector<2x128xf32>
    %218 = vector.extract_strided_slice %205 {offsets = [0, 256], sizes = [2, 128], strides = [1, 1]} : vector<2x512xf32> to vector<2x128xf32>
    %219 = math.tanh %218 : vector<2x128xf32>
    %220 = vector.extract_strided_slice %205 {offsets = [0, 384], sizes = [2, 128], strides = [1, 1]} : vector<2x512xf32> to vector<2x128xf32>
    %221 = arith.negf %220 : vector<2x128xf32>
    %222 = math.exp %221 : vector<2x128xf32>
    %cst_42 = arith.constant 1.000000e+00 : f32
    %223 = vector.broadcast %cst_42 : f32 to vector<2x128xf32>
    %224 = arith.addf %223, %222 : vector<2x128xf32>
    %225 = arith.divf %223, %224 : vector<2x128xf32>
    %226 = arith.mulf %217, %191 : vector<2x128xf32>
    %227 = arith.mulf %211, %219 : vector<2x128xf32>
    %228 = arith.addf %226, %227 : vector<2x128xf32>
    %229 = math.tanh %228 : vector<2x128xf32>
    %230 = arith.mulf %225, %229 : vector<2x128xf32>
    %231 = vector.extract_strided_slice %230 {offsets = [0, 0], sizes = [1, 128], strides = [1, 1]} : vector<2x128xf32> to vector<1x128xf32>
    %232 = vector.extract_strided_slice %230 {offsets = [1, 0], sizes = [1, 128], strides = [1, 1]} : vector<2x128xf32> to vector<1x128xf32>
    %233 = tpu.concatenate %231, %9 in 1 : vector<1x128xf32>, vector<1x128xf32> -> vector<1x256xf32>
    %234 = tpu.concatenate %9, %232 in 1 : vector<1x128xf32>, vector<1x128xf32> -> vector<1x256xf32>
    %235 = tpu.concatenate %233, %234 in 0 : vector<1x256xf32>, vector<1x256xf32> -> vector<2x256xf32>
    %236 = arith.truncf %235 : vector<2x256xf32> to vector<2x256xbf16>
    %237 = vector.extract_strided_slice %7 {offsets = [6, 0], sizes = [1, 512], strides = [1, 1]} : vector<8x512xf32> to vector<1x512xf32>
    %238 = vector.extract_strided_slice %8 {offsets = [1, 0], sizes = [1, 512], strides = [1, 1]} : vector<8x512xf32> to vector<1x512xf32>
    %239 = tpu.concatenate %237, %238 in 0 : vector<1x512xf32>, vector<1x512xf32> -> vector<2x512xf32>
    %c0_43 = arith.constant 0 : index
    %c0_44 = arith.constant 0 : index
    %240 = vector.load %arg3[%c0_43, %c0_44] : memref<256x512xbf16, #tpu.memory_space<vmem>>, vector<256x512xbf16>
    %cst_45 = arith.constant dense<0.000000e+00> : vector<2x512xf32>
    %241 = tpu.matmul %236, %240, %cst_45 {dimension_numbers = #tpu.dot_dimension_numbers<[1], [0], [0], [1], [0, 0, 1, 1], [], []>} : vector<2x256xbf16>, vector<256x512xbf16>, vector<2x512xf32> -> vector<2x512xf32>
    %242 = arith.addf %239, %241 : vector<2x512xf32>
    %243 = vector.extract_strided_slice %242 {offsets = [0, 0], sizes = [2, 128], strides = [1, 1]} : vector<2x512xf32> to vector<2x128xf32>
    %244 = arith.negf %243 : vector<2x128xf32>
    %245 = math.exp %244 : vector<2x128xf32>
    %cst_46 = arith.constant 1.000000e+00 : f32
    %246 = vector.broadcast %cst_46 : f32 to vector<2x128xf32>
    %247 = arith.addf %246, %245 : vector<2x128xf32>
    %248 = arith.divf %246, %247 : vector<2x128xf32>
    %249 = vector.extract_strided_slice %242 {offsets = [0, 128], sizes = [2, 128], strides = [1, 1]} : vector<2x512xf32> to vector<2x128xf32>
    %250 = arith.negf %249 : vector<2x128xf32>
    %251 = math.exp %250 : vector<2x128xf32>
    %cst_47 = arith.constant 1.000000e+00 : f32
    %252 = vector.broadcast %cst_47 : f32 to vector<2x128xf32>
    %253 = arith.addf %252, %251 : vector<2x128xf32>
    %254 = arith.divf %252, %253 : vector<2x128xf32>
    %255 = vector.extract_strided_slice %242 {offsets = [0, 256], sizes = [2, 128], strides = [1, 1]} : vector<2x512xf32> to vector<2x128xf32>
    %256 = math.tanh %255 : vector<2x128xf32>
    %257 = vector.extract_strided_slice %242 {offsets = [0, 384], sizes = [2, 128], strides = [1, 1]} : vector<2x512xf32> to vector<2x128xf32>
    %258 = arith.negf %257 : vector<2x128xf32>
    %259 = math.exp %258 : vector<2x128xf32>
    %cst_48 = arith.constant 1.000000e+00 : f32
    %260 = vector.broadcast %cst_48 : f32 to vector<2x128xf32>
    %261 = arith.addf %260, %259 : vector<2x128xf32>
    %262 = arith.divf %260, %261 : vector<2x128xf32>
    %263 = arith.mulf %254, %228 : vector<2x128xf32>
    %264 = arith.mulf %248, %256 : vector<2x128xf32>
    %265 = arith.addf %263, %264 : vector<2x128xf32>
    %266 = math.tanh %265 : vector<2x128xf32>
    %267 = arith.mulf %262, %266 : vector<2x128xf32>
    %268 = vector.extract_strided_slice %267 {offsets = [0, 0], sizes = [1, 128], strides = [1, 1]} : vector<2x128xf32> to vector<1x128xf32>
    %269 = vector.extract_strided_slice %267 {offsets = [1, 0], sizes = [1, 128], strides = [1, 1]} : vector<2x128xf32> to vector<1x128xf32>
    %270 = tpu.concatenate %268, %9 in 1 : vector<1x128xf32>, vector<1x128xf32> -> vector<1x256xf32>
    %271 = tpu.concatenate %9, %269 in 1 : vector<1x128xf32>, vector<1x128xf32> -> vector<1x256xf32>
    %272 = tpu.concatenate %270, %271 in 0 : vector<1x256xf32>, vector<1x256xf32> -> vector<2x256xf32>
    %273 = arith.truncf %272 : vector<2x256xf32> to vector<2x256xbf16>
    %274 = vector.extract_strided_slice %7 {offsets = [7, 0], sizes = [1, 512], strides = [1, 1]} : vector<8x512xf32> to vector<1x512xf32>
    %275 = vector.extract_strided_slice %8 {offsets = [0, 0], sizes = [1, 512], strides = [1, 1]} : vector<8x512xf32> to vector<1x512xf32>
    %276 = tpu.concatenate %274, %275 in 0 : vector<1x512xf32>, vector<1x512xf32> -> vector<2x512xf32>
    %c0_49 = arith.constant 0 : index
    %c0_50 = arith.constant 0 : index
    %277 = vector.load %arg3[%c0_49, %c0_50] : memref<256x512xbf16, #tpu.memory_space<vmem>>, vector<256x512xbf16>
    %cst_51 = arith.constant dense<0.000000e+00> : vector<2x512xf32>
    %278 = tpu.matmul %273, %277, %cst_51 {dimension_numbers = #tpu.dot_dimension_numbers<[1], [0], [0], [1], [0, 0, 1, 1], [], []>} : vector<2x256xbf16>, vector<256x512xbf16>, vector<2x512xf32> -> vector<2x512xf32>
    %279 = arith.addf %276, %278 : vector<2x512xf32>
    %280 = vector.extract_strided_slice %279 {offsets = [0, 0], sizes = [2, 128], strides = [1, 1]} : vector<2x512xf32> to vector<2x128xf32>
    %281 = arith.negf %280 : vector<2x128xf32>
    %282 = math.exp %281 : vector<2x128xf32>
    %cst_52 = arith.constant 1.000000e+00 : f32
    %283 = vector.broadcast %cst_52 : f32 to vector<2x128xf32>
    %284 = arith.addf %283, %282 : vector<2x128xf32>
    %285 = arith.divf %283, %284 : vector<2x128xf32>
    %286 = vector.extract_strided_slice %279 {offsets = [0, 128], sizes = [2, 128], strides = [1, 1]} : vector<2x512xf32> to vector<2x128xf32>
    %287 = arith.negf %286 : vector<2x128xf32>
    %288 = math.exp %287 : vector<2x128xf32>
    %cst_53 = arith.constant 1.000000e+00 : f32
    %289 = vector.broadcast %cst_53 : f32 to vector<2x128xf32>
    %290 = arith.addf %289, %288 : vector<2x128xf32>
    %291 = arith.divf %289, %290 : vector<2x128xf32>
    %292 = vector.extract_strided_slice %279 {offsets = [0, 256], sizes = [2, 128], strides = [1, 1]} : vector<2x512xf32> to vector<2x128xf32>
    %293 = math.tanh %292 : vector<2x128xf32>
    %294 = vector.extract_strided_slice %279 {offsets = [0, 384], sizes = [2, 128], strides = [1, 1]} : vector<2x512xf32> to vector<2x128xf32>
    %295 = arith.negf %294 : vector<2x128xf32>
    %296 = math.exp %295 : vector<2x128xf32>
    %cst_54 = arith.constant 1.000000e+00 : f32
    %297 = vector.broadcast %cst_54 : f32 to vector<2x128xf32>
    %298 = arith.addf %297, %296 : vector<2x128xf32>
    %299 = arith.divf %297, %298 : vector<2x128xf32>
    %300 = arith.mulf %291, %265 : vector<2x128xf32>
    %301 = arith.mulf %285, %293 : vector<2x128xf32>
    %302 = arith.addf %300, %301 : vector<2x128xf32>
    %303 = math.tanh %302 : vector<2x128xf32>
    %304 = arith.mulf %299, %303 : vector<2x128xf32>
    %305 = vector.extract_strided_slice %304 {offsets = [0, 0], sizes = [1, 128], strides = [1, 1]} : vector<2x128xf32> to vector<1x128xf32>
    %306 = vector.extract_strided_slice %304 {offsets = [1, 0], sizes = [1, 128], strides = [1, 1]} : vector<2x128xf32> to vector<1x128xf32>
    %307 = tpu.concatenate %46, %83, %120, %157, %194, %231, %268, %305 in 0 : vector<1x128xf32>, vector<1x128xf32>, vector<1x128xf32>, vector<1x128xf32>, vector<1x128xf32>, vector<1x128xf32>, vector<1x128xf32>, vector<1x128xf32> -> vector<8x128xf32>
    %308 = tpu.concatenate %306, %269, %232, %195, %158, %121, %84, %47 in 0 : vector<1x128xf32>, vector<1x128xf32>, vector<1x128xf32>, vector<1x128xf32>, vector<1x128xf32>, vector<1x128xf32>, vector<1x128xf32>, vector<1x128xf32> -> vector<8x128xf32>
    %309 = tpu.concatenate %307, %308 in 1 : vector<8x128xf32>, vector<8x128xf32> -> vector<8x256xf32>
    %cst_55 = arith.constant dense<0.000000e+00> : vector<256xf32>
    %310 = vector.multi_reduction <add>, %309, %cst_55 [0] : vector<8x256xf32> to vector<256xf32>
    %311 = vector.shape_cast %310 : vector<256xf32> to vector<1x256xf32>
    %cst_56 = arith.constant 8.000000e+00 : f32
    %312 = vector.broadcast %cst_56 : f32 to vector<1x256xf32>
    %313 = arith.divf %311, %312 : vector<1x256xf32>
    %314 = vector.broadcast %313 : vector<1x256xf32> to vector<8x256xf32>
    %315 = arith.subf %309, %314 : vector<8x256xf32>
    %316 = arith.mulf %315, %315 : vector<8x256xf32>
    %cst_57 = arith.constant dense<0.000000e+00> : vector<256xf32>
    %317 = vector.multi_reduction <add>, %316, %cst_57 [0] : vector<8x256xf32> to vector<256xf32>
    %318 = vector.shape_cast %317 : vector<256xf32> to vector<1x256xf32>
    %cst_58 = arith.constant 8.000000e+00 : f32
    %319 = vector.broadcast %cst_58 : f32 to vector<1x256xf32>
    %320 = arith.divf %318, %319 : vector<1x256xf32>
    %c0_59 = arith.constant 0 : index
    %c0_60 = arith.constant 0 : index
    %321 = vector.load %arg4[%c0_59, %c0_60] : memref<1x256xf32, #tpu.memory_space<vmem>>, vector<1x256xf32>
    %322 = vector.broadcast %313 : vector<1x256xf32> to vector<8x256xf32>
    %323 = arith.subf %309, %322 : vector<8x256xf32>
    %324 = vector.broadcast %321 : vector<1x256xf32> to vector<8x256xf32>
    %325 = arith.mulf %324, %323 : vector<8x256xf32>
    %cst_61 = arith.constant 9.99999974E-6 : f32
    %326 = vector.broadcast %cst_61 : f32 to vector<1x256xf32>
    %327 = arith.addf %320, %326 : vector<1x256xf32>
    %328 = math.rsqrt %327 : vector<1x256xf32>
    %329 = vector.broadcast %328 : vector<1x256xf32> to vector<8x256xf32>
    %330 = arith.mulf %325, %329 : vector<8x256xf32>
    %c0_62 = arith.constant 0 : index
    %c0_63 = arith.constant 0 : index
    %331 = vector.load %arg5[%c0_62, %c0_63] : memref<1x256xf32, #tpu.memory_space<vmem>>, vector<1x256xf32>
    %332 = vector.broadcast %331 : vector<1x256xf32> to vector<8x256xf32>
    %333 = arith.addf %330, %332 : vector<8x256xf32>
    %334 = arith.truncf %333 : vector<8x256xf32> to vector<8x256xbf16>
    %c0_64 = arith.constant 0 : index
    %c0_65 = arith.constant 0 : index
    %335 = vector.load %arg6[%c0_64, %c0_65] : memref<256x128xbf16, #tpu.memory_space<vmem>>, vector<256x128xbf16>
    %cst_66 = arith.constant dense<0.000000e+00> : vector<8x128xf32>
    %336 = tpu.matmul %334, %335, %cst_66 {dimension_numbers = #tpu.dot_dimension_numbers<[1], [0], [0], [1], [0, 0, 1, 1], [], []>} : vector<8x256xbf16>, vector<256x128xbf16>, vector<8x128xf32> -> vector<8x128xf32>
    %c0_67 = arith.constant 0 : index
    %c0_68 = arith.constant 0 : index
    %337 = vector.load %arg7[%c0_67, %c0_68] : memref<1x128xf32, #tpu.memory_space<vmem>>, vector<1x128xf32>
    %338 = vector.broadcast %337 : vector<1x128xf32> to vector<8x128xf32>
    %339 = arith.addf %336, %338 : vector<8x128xf32>
    %cst_69 = arith.constant dense<0.000000e+00> : vector<128xf32>
    %340 = vector.multi_reduction <add>, %339, %cst_69 [0] : vector<8x128xf32> to vector<128xf32>
    %341 = vector.shape_cast %340 : vector<128xf32> to vector<1x128xf32>
    %cst_70 = arith.constant 8.000000e+00 : f32
    %342 = vector.broadcast %cst_70 : f32 to vector<1x128xf32>
    %343 = arith.divf %341, %342 : vector<1x128xf32>
    %344 = vector.broadcast %343 : vector<1x128xf32> to vector<8x128xf32>
    %345 = arith.subf %339, %344 : vector<8x128xf32>
    %346 = arith.mulf %345, %345 : vector<8x128xf32>
    %cst_71 = arith.constant dense<0.000000e+00> : vector<128xf32>
    %347 = vector.multi_reduction <add>, %346, %cst_71 [0] : vector<8x128xf32> to vector<128xf32>
    %348 = vector.shape_cast %347 : vector<128xf32> to vector<1x128xf32>
    %cst_72 = arith.constant 8.000000e+00 : f32
    %349 = vector.broadcast %cst_72 : f32 to vector<1x128xf32>
    %350 = arith.divf %348, %349 : vector<1x128xf32>
    %c0_73 = arith.constant 0 : index
    %c0_74 = arith.constant 0 : index
    %351 = vector.load %arg8[%c0_73, %c0_74] : memref<1x128xf32, #tpu.memory_space<vmem>>, vector<1x128xf32>
    %352 = vector.broadcast %343 : vector<1x128xf32> to vector<8x128xf32>
    %353 = arith.subf %339, %352 : vector<8x128xf32>
    %354 = vector.broadcast %351 : vector<1x128xf32> to vector<8x128xf32>
    %355 = arith.mulf %354, %353 : vector<8x128xf32>
    %cst_75 = arith.constant 9.99999974E-6 : f32
    %356 = vector.broadcast %cst_75 : f32 to vector<1x128xf32>
    %357 = arith.addf %350, %356 : vector<1x128xf32>
    %358 = math.rsqrt %357 : vector<1x128xf32>
    %359 = vector.broadcast %358 : vector<1x128xf32> to vector<8x128xf32>
    %360 = arith.mulf %355, %359 : vector<8x128xf32>
    %c0_76 = arith.constant 0 : index
    %c0_77 = arith.constant 0 : index
    %361 = vector.load %arg9[%c0_76, %c0_77] : memref<1x128xf32, #tpu.memory_space<vmem>>, vector<1x128xf32>
    %362 = vector.broadcast %361 : vector<1x128xf32> to vector<8x128xf32>
    %363 = arith.addf %360, %362 : vector<8x128xf32>
    %cst_78 = arith.constant 0.000000e+00 : f32
    %364 = vector.broadcast %cst_78 : f32 to vector<8x128xf32>
    %365 = arith.maximumf %363, %364 : vector<8x128xf32>
    %366 = arith.truncf %365 : vector<8x128xf32> to vector<8x128xbf16>
    %c0_79 = arith.constant 0 : index
    %c0_80 = arith.constant 0 : index
    %367 = vector.load %arg10[%c0_79, %c0_80] : memref<128x64xbf16, #tpu.memory_space<vmem>>, vector<128x64xbf16>
    %cst_81 = arith.constant dense<0.000000e+00> : vector<8x64xf32>
    %368 = tpu.matmul %366, %367, %cst_81 {dimension_numbers = #tpu.dot_dimension_numbers<[1], [0], [0], [1], [0, 0, 1, 1], [], []>} : vector<8x128xbf16>, vector<128x64xbf16>, vector<8x64xf32> -> vector<8x64xf32>
    %c0_82 = arith.constant 0 : index
    %c0_83 = arith.constant 0 : index
    %369 = vector.load %arg11[%c0_82, %c0_83] : memref<1x64xf32, #tpu.memory_space<vmem>>, vector<1x64xf32>
    %370 = vector.broadcast %369 : vector<1x64xf32> to vector<8x64xf32>
    %371 = arith.addf %368, %370 : vector<8x64xf32>
    %cst_84 = arith.constant dense<0.000000e+00> : vector<64xf32>
    %372 = vector.multi_reduction <add>, %371, %cst_84 [0] : vector<8x64xf32> to vector<64xf32>
    %373 = vector.shape_cast %372 : vector<64xf32> to vector<1x64xf32>
    %cst_85 = arith.constant 8.000000e+00 : f32
    %374 = vector.broadcast %cst_85 : f32 to vector<1x64xf32>
    %375 = arith.divf %373, %374 : vector<1x64xf32>
    %376 = vector.broadcast %375 : vector<1x64xf32> to vector<8x64xf32>
    %377 = arith.subf %371, %376 : vector<8x64xf32>
    %378 = arith.mulf %377, %377 : vector<8x64xf32>
    %cst_86 = arith.constant dense<0.000000e+00> : vector<64xf32>
    %379 = vector.multi_reduction <add>, %378, %cst_86 [0] : vector<8x64xf32> to vector<64xf32>
    %380 = vector.shape_cast %379 : vector<64xf32> to vector<1x64xf32>
    %cst_87 = arith.constant 8.000000e+00 : f32
    %381 = vector.broadcast %cst_87 : f32 to vector<1x64xf32>
    %382 = arith.divf %380, %381 : vector<1x64xf32>
    %c0_88 = arith.constant 0 : index
    %c0_89 = arith.constant 0 : index
    %383 = vector.load %arg12[%c0_88, %c0_89] : memref<1x64xf32, #tpu.memory_space<vmem>>, vector<1x64xf32>
    %384 = vector.broadcast %375 : vector<1x64xf32> to vector<8x64xf32>
    %385 = arith.subf %371, %384 : vector<8x64xf32>
    %386 = vector.broadcast %383 : vector<1x64xf32> to vector<8x64xf32>
    %387 = arith.mulf %386, %385 : vector<8x64xf32>
    %cst_90 = arith.constant 9.99999974E-6 : f32
    %388 = vector.broadcast %cst_90 : f32 to vector<1x64xf32>
    %389 = arith.addf %382, %388 : vector<1x64xf32>
    %390 = math.rsqrt %389 : vector<1x64xf32>
    %391 = vector.broadcast %390 : vector<1x64xf32> to vector<8x64xf32>
    %392 = arith.mulf %387, %391 : vector<8x64xf32>
    %c0_91 = arith.constant 0 : index
    %c0_92 = arith.constant 0 : index
    %393 = vector.load %arg13[%c0_91, %c0_92] : memref<1x64xf32, #tpu.memory_space<vmem>>, vector<1x64xf32>
    %394 = vector.broadcast %393 : vector<1x64xf32> to vector<8x64xf32>
    %395 = arith.addf %392, %394 : vector<8x64xf32>
    %cst_93 = arith.constant 0.000000e+00 : f32
    %396 = vector.broadcast %cst_93 : f32 to vector<8x64xf32>
    %397 = arith.maximumf %395, %396 : vector<8x64xf32>
    %398 = arith.truncf %397 : vector<8x64xf32> to vector<8x64xbf16>
    %c0_94 = arith.constant 0 : index
    %c0_95 = arith.constant 0 : index
    %399 = vector.load %arg14[%c0_94, %c0_95] : memref<64x2xbf16, #tpu.memory_space<vmem>>, vector<64x2xbf16>
    %cst_96 = arith.constant dense<0.000000e+00> : vector<8x2xf32>
    %400 = tpu.matmul %398, %399, %cst_96 {dimension_numbers = #tpu.dot_dimension_numbers<[1], [0], [0], [1], [0, 0, 1, 1], [], []>} : vector<8x64xbf16>, vector<64x2xbf16>, vector<8x2xf32> -> vector<8x2xf32>
    %c0_97 = arith.constant 0 : index
    %c0_98 = arith.constant 0 : index
    %401 = vector.load %arg15[%c0_97, %c0_98] : memref<1x2xf32, #tpu.memory_space<vmem>>, vector<1x2xf32>
    %402 = vector.broadcast %401 : vector<1x2xf32> to vector<8x2xf32>
    %403 = arith.addf %400, %402 : vector<8x2xf32>
    %cst_99 = arith.constant dense<0.000000e+00> : vector<2xf32>
    %404 = vector.multi_reduction <add>, %403, %cst_99 [0] : vector<8x2xf32> to vector<2xf32>
    %405 = vector.shape_cast %404 : vector<2xf32> to vector<1x2xf32>
    %cst_100 = arith.constant 8.000000e+00 : f32
    %406 = vector.broadcast %cst_100 : f32 to vector<1x2xf32>
    %407 = arith.divf %405, %406 : vector<1x2xf32>
    %408 = vector.broadcast %407 : vector<1x2xf32> to vector<8x2xf32>
    %409 = arith.subf %403, %408 : vector<8x2xf32>
    %410 = arith.mulf %409, %409 : vector<8x2xf32>
    %cst_101 = arith.constant dense<0.000000e+00> : vector<2xf32>
    %411 = vector.multi_reduction <add>, %410, %cst_101 [0] : vector<8x2xf32> to vector<2xf32>
    %412 = vector.shape_cast %411 : vector<2xf32> to vector<1x2xf32>
    %cst_102 = arith.constant 8.000000e+00 : f32
    %413 = vector.broadcast %cst_102 : f32 to vector<1x2xf32>
    %414 = arith.divf %412, %413 : vector<1x2xf32>
    %c0_103 = arith.constant 0 : index
    %c0_104 = arith.constant 0 : index
    %415 = vector.load %arg16[%c0_103, %c0_104] : memref<1x2xf32, #tpu.memory_space<vmem>>, vector<1x2xf32>
    %416 = vector.broadcast %407 : vector<1x2xf32> to vector<8x2xf32>
    %417 = arith.subf %403, %416 : vector<8x2xf32>
    %418 = vector.broadcast %415 : vector<1x2xf32> to vector<8x2xf32>
    %419 = arith.mulf %418, %417 : vector<8x2xf32>
    %cst_105 = arith.constant 9.99999974E-6 : f32
    %420 = vector.broadcast %cst_105 : f32 to vector<1x2xf32>
    %421 = arith.addf %414, %420 : vector<1x2xf32>
    %422 = math.rsqrt %421 : vector<1x2xf32>
    %423 = vector.broadcast %422 : vector<1x2xf32> to vector<8x2xf32>
    %424 = arith.mulf %419, %423 : vector<8x2xf32>
    %c0_106 = arith.constant 0 : index
    %c0_107 = arith.constant 0 : index
    %425 = vector.load %arg17[%c0_106, %c0_107] : memref<1x2xf32, #tpu.memory_space<vmem>>, vector<1x2xf32>
    %426 = vector.broadcast %425 : vector<1x2xf32> to vector<8x2xf32>
    %427 = arith.addf %424, %426 : vector<8x2xf32>
    %cst_108 = arith.constant 0.000000e+00 : f32
    %428 = vector.broadcast %cst_108 : f32 to vector<8x2xf32>
    %429 = arith.maximumf %427, %428 : vector<8x2xf32>
    %cst_109 = arith.constant dense<0xFF800000> : vector<8xf32>
    %430 = vector.multi_reduction <maximumf>, %429, %cst_109 [1] : vector<8x2xf32> to vector<8xf32>
    %431 = vector.shape_cast %430 : vector<8xf32> to vector<8x1xf32>
    %432 = vector.broadcast %431 : vector<8x1xf32> to vector<8x2xf32>
    %433 = arith.subf %429, %432 : vector<8x2xf32>
    %434 = math.exp %433 : vector<8x2xf32>
    %cst_110 = arith.constant dense<0.000000e+00> : vector<8xf32>
    %435 = vector.multi_reduction <add>, %434, %cst_110 [1] : vector<8x2xf32> to vector<8xf32>
    %436 = vector.shape_cast %435 : vector<8xf32> to vector<8x1xf32>
    %437 = vector.broadcast %436 : vector<8x1xf32> to vector<8x2xf32>
    %438 = arith.divf %434, %437 : vector<8x2xf32>
    %c0_111 = arith.constant 0 : index
    %c0_112 = arith.constant 0 : index
    %439 = vector.load %arg18[%c0_111, %c0_112] : memref<8x2xf32, #tpu.memory_space<vmem>>, vector<8x2xf32>
    tpu.vector_store %arg18[%c0_111, %c0_112], %438 {strides = array<i32>} : memref<8x2xf32, #tpu.memory_space<vmem>>, vector<8x2xf32>,
    return
  }
}

</mosaic_0001>

<bundles_post_ra>
// kernel: tpu_custom_call.1
= control target key start
LH: loop header
LB: loop body
LE: loop exit
PB: predicated region body
PF: predicated region fallthrough
CT: control target
= control target key end

     0   :  { %s5344_s0 = inlined_call_operand.vmem [shape: f32[8,64], index: 0, kind: input, shape index: {}]   ;;  %s5345_s1 = inlined_call_operand.hbm [shape: bf16[64,1024], index: 1, kind: input, shape index: {}]   ;;  %s5346_s2 = inlined_call_operand.vmem [shape: f32[1,1024], index: 2, kind: input, shape index: {}]   ;;  %s5347_s3 = inlined_call_operand.hbm [shape: bf16[256,512], index: 3, kind: input, shape index: {}]   ;;  %s5348_s4 = inlined_call_operand.vmem [shape: f32[1,256], index: 4, kind: input, shape index: {}]   ;;  %s5349_s5 = inlined_call_operand.vmem [shape: f32[1,256], index: 5, kind: input, shape index: {}]   ;;  %s5350_s6 = inlined_call_operand.hbm [shape: bf16[256,128], index: 6, kind: input, shape index: {}]   ;;  %s5351_s7 = inlined_call_operand.vmem [shape: f32[1,128], index: 7, kind: input, shape index: {}]   ;;  %s5352_s8 = inlined_call_operand.vmem [shape: f32[1,128], index: 8, kind: input, shape index: {}]   ;;  %s5353_s9 = inlined_call_operand.vmem [shape: f32[1,128], index: 9, kind: input, shape index: {}]   ;;  %s5354_s10 = inlined_call_operand.vmem [shape: bf16[128,64], index: 10, kind: input, shape index: {}]   ;;  %s5355_s11 = inlined_call_operand.vmem [shape: f32[1,64], index: 11, kind: input, shape index: {}]   ;;  %s5356_s12 = inlined_call_operand.vmem [shape: f32[1,64], index: 12, kind: input, shape index: {}]   ;;  %s5357_s13 = inlined_call_operand.vmem [shape: f32[1,64], index: 13, kind: input, shape index: {}]   ;;  %s5358_s14 = inlined_call_operand.vmem [shape: bf16[64,2], index: 14, kind: input, shape index: {}]   ;;  %s5359_s15 = inlined_call_operand.vmem [shape: f32[1,2], index: 15, kind: input, shape index: {}]   ;;  %s5360_s16 = inlined_call_operand.vmem [shape: f32[1,2], index: 16, kind: input, shape index: {}]   ;;  %s5361_s17 = inlined_call_operand.vmem [shape: f32[1,2], index: 17, kind: input, shape index: {}]   ;;  %s5362_s18 = inlined_call_operand.vmem [shape: f32[8,2], index: 18, kind: output, shape index: {}]  }
   0x1   :  { %5453 = sst [smem:[#allocation75_spill]] %s5344_s0 }
   0x2   :  { %5454 = sst [smem:[#allocation76_spill]] %s5345_s1 }
   0x3   :  { %5455 = sst [smem:[#allocation77_spill]] %s5346_s2 }
   0x4   :  { %5456 = sst [smem:[#allocation78_spill]] %s5362_s18 }
   0x5   :  { %23 = vsyncpa [#allocation3], 0 }
   0x6   :  { %24 = vsyncpa [#allocation5], 0  ;;  %s46_s29 = sshll.u32 %s5347_s3, 4  ;;  %s4045_s30 = smov [#allocation4]   ;;  %s47_s29 = int_to_ptr.hbm [resolvable:$true] %s46_s29 }
   0x7   :  { %s48_s0 = sshll.u32 %s4045_s30, 4  ;;  %s5457_s20 = sld [smem:[#allocation76_spill]]  ;;  %s49_s0 = int_to_ptr.vmem [resolvable:$true] %s48_s0 }
   0x8   :  { %s4046_s22 = smov 256   ;;  %s4047_s2 = smov 16  }
   0x9   :  { %54 = dma.hbm_to_vmem [thread:$0]  %s47_s29, 8192, %s49_s0, [#allocation5], %s4046_s22, %s4046_s22, %s4047_s2  }
   0xa   :  { %s4048_s23 = smov [#allocation2]   ;;  %s4049_s25 = smov 512  }
   0xb   :  { %s33_s24 = sshll.u32 %s4048_s23, 4  ;;  %s4050_s26 = smov 32   ;;  %s34_s24 = int_to_ptr.vmem [resolvable:$true] %s33_s24 }
   0xc   :  { %s63_s28 = sshll.u32 %s5350_s6, 4  ;;  %s4051_s30 = smov [#allocation6]   ;;  %s64_s28 = int_to_ptr.hbm [resolvable:$true] %s63_s28 }
   0xd   :  { %s31_s21 = sshll.u32 %s5457_s20, 4  ;;  %s65_s18 = sshll.u32 %s4051_s30, 4  ;;  %s32_s21 = int_to_ptr.hbm [resolvable:$true] %s31_s21  ;;  %s66_s18 = int_to_ptr.vmem [resolvable:$true] %s65_s18 }
   0xe   :  { %39 = dma.hbm_to_vmem [thread:$0]  %s32_s21, 4096, %s34_s24, [#allocation3], %s4049_s25, %s4049_s25, %s4050_s26  }
   0xf   :  { %s4052_s19 = smov 64   ;;  %s4053_s1 = smov 4  }
  0x10   :  { %71 = dma.hbm_to_vmem [thread:$0]  %s64_s28, 2048, %s66_s18, [#allocation5], %s4052_s19, %s4052_s19, %s4053_s1  }
  0x11   :  { %4041 = dma.done.wait [#allocation3], 4096  }
  0x12   :  { %4042 = vsyncadd [#allocation3], 4294963200 }
  0x13   :  { %4043 = dma.done.wait [#allocation5], 10240  }
  0x14   :  { %4044 = vsyncadd [#allocation5], 4294957056  ;;  %v3063_v0 = vld [vmem:[#allocation2 + $0xc0] sm:$0xf]  ;;  %v3705_v2 = vld [vmem:[#allocation2 + $0xc4] sm:$0xf] }
  0x15   :  { %v3709_v1 = vld [vmem:[#allocation2 + $0xdc] sm:$0xf0]  ;;  %v3065_v4 = vld [vmem:[#allocation2 + $0xe0] sm:$0xf0]  ;;  %v3071_v5 = vld [vmem:[#allocation2 + $0xc8] sm:$0xf] }
  0x16   :  { %v3064_v3 = vor.u32 %v3709_v1, %v3063_v0  ;;  %v3710_v6 = vld [vmem:[#allocation2 + $0xe4] sm:$0xf0]  ;;  %v3068_v7 = vor.u32 %v3705_v2, %v3065_v4  ;;  %v3706_v9 = vld [vmem:[#allocation2 + $0xcc] sm:$0xf]  ;;  %v3031_v11 = vld [vmem:[#allocation2 + $0x80] sm:$0xf] }
  0x17   :  { %v3072_v8 = vor.u32 %v3710_v6, %v3071_v5  ;;  %v3073_v10 = vld [vmem:[#allocation2 + $0xe8] sm:$0xf0]  ;;  %v3701_v13 = vld [vmem:[#allocation2 + $0x9c] sm:$0xf0]  ;;  %v3697_v14 = vld [vmem:[#allocation2 + $0x84] sm:$0xf] }
  0x18   :  { %327 = vmatpush.bf16.msra.mxu0 %v3064_v3  ;;  %v3076_v12 = vor.u32 %v3706_v9, %v3073_v10  ;;  %v3033_v15 = vld [vmem:[#allocation2 + $0xa0] sm:$0xf0]  ;;  %340 = vmatpush.bf16.msra.mxu1 %v3068_v7  ;;  %v3032_v16 = vor.u32 %v3701_v13, %v3031_v11  ;;  %v3039_v18 = vld [vmem:[#allocation2 + $0x88] sm:$0xf]  ;;  %v3698_v20 = vld [vmem:[#allocation2 + $0x8c] sm:$0xf] }
  0x19   :  { %353 = vmatpush.bf16.msra.mxu2 %v3072_v8  ;;  %v3036_v17 = vor.u32 %v3697_v14, %v3033_v15  ;;  %v3702_v19 = vld [vmem:[#allocation2 + $0xa4] sm:$0xf0]  ;;  %v3041_v22 = vld [vmem:[#allocation2 + $0xa8] sm:$0xf0]  ;;  %v2999_v23 = vld [vmem:[#allocation2 + $0x40] sm:$0xf] }
  0x1a   :  { %366 = vmatpush.bf16.msra.mxu3 %v3076_v12  ;;  %v3040_v21 = vor.u32 %v3702_v19, %v3039_v18  ;;  %v3693_v24 = vld [vmem:[#allocation2 + $0x5c] sm:$0xf0]  ;;  %v3044_v25 = vor.u32 %v3698_v20, %v3041_v22  ;;  %v3689_v26 = vld [vmem:[#allocation2 + $0x44] sm:$0xf]  ;;  %v3007_v28 = vld [vmem:[#allocation2 + $0x48] sm:$0xf] }
  0x1b   :  { %v3001_v27 = vld [vmem:[#allocation2 + $0x60] sm:$0xf0]  ;;  %v3000_v29 = vor.u32 %v3693_v24, %v2999_v23  ;;  %v3694_v30 = vld [vmem:[#allocation2 + $0x64] sm:$0xf0]  ;;  %v3690_v31 = vld [vmem:[#allocation2 + $0x4c] sm:$0xf] }
  0x1c   :  { %328 = vmatpush.bf16.msra.mxu0 %v3032_v16  ;;  %v3009_v32 = vld [vmem:[#allocation2 + $0x68] sm:$0xf0]  ;;  %341 = vmatpush.bf16.msra.mxu1 %v3036_v17  ;;  %v3004_v33 = vor.u32 %v3689_v26, %v3001_v27  ;;  %v3008_v34 = vor.u32 %v3694_v30, %v3007_v28  ;;  %v2967_v35 = vld [vmem:[#allocation2] sm:$0xf]  ;;  %v3681_v37 = vld [vmem:[#allocation2 + $0x4] sm:$0xf] }
  0x1d   :  { %354 = vmatpush.bf16.msra.mxu2 %v3040_v21  ;;  %v3685_v36 = vld [vmem:[#allocation2 + $0x1c] sm:$0xf0]  ;;  %v3012_v38 = vor.u32 %v3690_v31, %v3009_v32  ;;  %v2969_v39 = vld [vmem:[#allocation2 + $0x20] sm:$0xf0]  ;;  %v2975_v40 = vld [vmem:[#allocation2 + $0x8] sm:$0xf] }
  0x1e   :  { %367 = vmatpush.bf16.msra.mxu3 %v3044_v25  ;;  %v3686_v41 = vld [vmem:[#allocation2 + $0x24] sm:$0xf0]  ;;  %v3682_v42 = vld [vmem:[#allocation2 + $0xc] sm:$0xf]  ;;  %v3079_v44 = vld [vmem:[#allocation2 + $0xd0] sm:$0xf]  ;;  %v2968_v45 = vor.u32 %v3685_v36, %v2967_v35  ;;  %v2972_v49 = vor.u32 %v3681_v37, %v2969_v39 }
  0x1f   :  { %v2977_v43 = vld [vmem:[#allocation2 + $0x28] sm:$0xf0]  ;;  %v3711_v46 = vld [vmem:[#allocation2 + $0xec] sm:$0xf0]  ;;  %v3707_v47 = vld [vmem:[#allocation2 + $0xd4] sm:$0xf]  ;;  %v2976_v50 = vor.u32 %v3686_v41, %v2975_v40 }
  0x20   :  { %329 = vmatpush.bf16.msra.mxu0 %v3000_v29  ;;  %v3081_v48 = vld [vmem:[#allocation2 + $0xf0] sm:$0xf0]  ;;  %342 = vmatpush.bf16.msra.mxu1 %v3004_v33  ;;  %v3087_v51 = vld [vmem:[#allocation2 + $0xd8] sm:$0xf]  ;;  %v3708_v53 = vld [vmem:[#allocation2 + $0xdc] sm:$0xf]  ;;  %v2980_v54 = vor.u32 %v3682_v42, %v2977_v43  ;;  %v3080_v55 = vor.u32 %v3711_v46, %v3079_v44 }
  0x21   :  { %355 = vmatpush.bf16.msra.mxu2 %v3008_v34  ;;  %v3712_v52 = vld [vmem:[#allocation2 + $0xf4] sm:$0xf0]  ;;  %v3089_v56 = vld [vmem:[#allocation2 + $0xf8] sm:$0xf0]  ;;  %s5458_s29 = sld [smem:[#allocation75_spill]]  ;;  %v3084_v58 = vor.u32 %v3707_v47, %v3081_v48  ;;  %vm319_vm0 = vcmask 523264  }
  0x22   :  { %368 = vmatpush.bf16.msra.mxu3 %v3012_v38  ;;  %v3088_v59 = vor.u32 %v3712_v52, %v3087_v51  ;;  %v3047_v60 = vld [vmem:[#allocation2 + $0x90] sm:$0xf]  ;;  %v3699_v62 = vld [vmem:[#allocation2 + $0x94] sm:$0xf]  ;;  %v3092_v63 = vor.u32 %v3708_v53, %v3089_v56  ;;  %v3055_v2 = vld [vmem:[#allocation2 + $0x98] sm:$0xf] }
  0x23   :  { %v3703_v61 = vld [vmem:[#allocation2 + $0xac] sm:$0xf0]  ;;  %v3049_v1 = vld [vmem:[#allocation2 + $0xb0] sm:$0xf0]  ;;  %v3704_v3 = vld [vmem:[#allocation2 + $0xb4] sm:$0xf0] }
  0x24   :  { %330 = vmatpush.bf16.msra.mxu0 %v2968_v45  ;;  %343 = vmatpush.bf16.msra.mxu1 %v2972_v49  ;;  %v3700_v4 = vld [vmem:[#allocation2 + $0x9c] sm:$0xf]  ;;  %v3048_v6 = vor.u32 %v3703_v61, %v3047_v60  ;;  %v3052_v7 = vor.u32 %v3699_v62, %v3049_v1  ;;  %v3056_v8 = vor.u32 %v3704_v3, %v3055_v2  ;;  %v3015_v9 = vld [vmem:[#allocation2 + $0x50] sm:$0xf]  ;;  %v3691_v11 = vld [vmem:[#allocation2 + $0x54] sm:$0xf] }
  0x25   :  { %356 = vmatpush.bf16.msra.mxu2 %v2976_v50  ;;  %v3057_v5 = vld [vmem:[#allocation2 + $0xb8] sm:$0xf0]  ;;  %v3695_v10 = vld [vmem:[#allocation2 + $0x6c] sm:$0xf0]  ;;  %v3017_v13 = vld [vmem:[#allocation2 + $0x70] sm:$0xf0] }
  0x26   :  { %369 = vmatpush.bf16.msra.mxu3 %v2980_v54  ;;  %v3060_v12 = vor.u32 %v3700_v4, %v3057_v5  ;;  %v3023_v14 = vld [vmem:[#allocation2 + $0x58] sm:$0xf]  ;;  %v3692_v16 = vld [vmem:[#allocation2 + $0x5c] sm:$0xf]  ;;  %v3016_v18 = vor.u32 %v3695_v10, %v3015_v9  ;;  %v2983_v19 = vld [vmem:[#allocation2 + $0x10] sm:$0xf]  ;;  %v3020_v21 = vor.u32 %v3691_v11, %v3017_v13 }
  0x27   :  { %v107_v57 = vld [vmem:[%s5458_s29] sm:$0xff]  ;;  %v3696_v15 = vld [vmem:[#allocation2 + $0x74] sm:$0xf0]  ;;  %v3025_v17 = vld [vmem:[#allocation2 + $0x78] sm:$0xf0]  ;;  %vm430_vm1 = vcmask 1040384  }
  0x28   :  { %v4163_v0 = vpack.c.bf16 %v107_v57, %v107_v57  ;;  %379 = vmatpush.bf16.msrb.mxu0 %v3080_v55  ;;  %392 = vmatpush.bf16.msrb.mxu1 %v3084_v58  ;;  %v3687_v20 = vld [vmem:[#allocation2 + $0x2c] sm:$0xf0]  ;;  %v3024_v22 = vor.u32 %v3696_v15, %v3023_v14  ;;  %v3683_v23 = vld [vmem:[#allocation2 + $0x14] sm:$0xf]  ;;  %v2991_v25 = vld [vmem:[#allocation2 + $0x18] sm:$0xf]  ;;  %v3028_v26 = vor.u32 %v3692_v16, %v3025_v17 }
  0x29   :  { %405 = vmatpush.bf16.msrb.mxu2 %v3088_v59  ;;  %v2985_v24 = vld [vmem:[#allocation2 + $0x30] sm:$0xf0]  ;;  %v3688_v27 = vld [vmem:[#allocation2 + $0x34] sm:$0xf0]  ;;  %v3684_v28 = vld [vmem:[#allocation2 + $0x1c] sm:$0xf]  ;;  %v2984_v33 = vor.u32 %v3687_v20, %v2983_v19 }
  0x2a   :  { %418 = vmatpush.bf16.msrb.mxu3 %v3092_v63  ;;  %3095 = vmatmul.msk.bf16.vlgmr.msra.gmra.mxu2 %vm319_vm0, %v4163_v0  ;;  %v2993_v29 = vld [vmem:[#allocation2 + $0x38] sm:$0xf0]  ;;  %v3215_v30 = vld [vmem:[#allocation4 + $0xe0] sm:$0xf]  ;;  %v3743_v31 = vld [vmem:[#allocation4 + $0xec] sm:$0xf0]  ;;  %v2988_v37 = vor.u32 %v3683_v23, %v2985_v24  ;;  %v2992_v38 = vor.u32 %v3688_v27, %v2991_v25 }
  0x2b   :  { %3096 = vmatmul.msk.bf16.vlgmr.msra.gmra.mxu3 %vm319_vm0, %v4163_v0  ;;  %3093 = vmatmul.msk.bf16.vlgmr.msra.gmra.mxu0 %vm319_vm0, %v4163_v0  ;;  %v3343_v32 = vld [vmem:[#allocation4 + $0x1e0] sm:$0xf]  ;;  %v3775_v34 = vld [vmem:[#allocation4 + $0x1ec] sm:$0xf0]  ;;  %v3741_v35 = vld [vmem:[#allocation4 + $0xe4] sm:$0xf]  ;;  %v2996_v41 = vor.u32 %v3684_v28, %v2993_v29  ;;  %v4173_v42 = vor.u32 %v3743_v31, %v3215_v30 }
  0x2c   :  { %380 = vmatpush.bf16.msrb.mxu0 %v3048_v6  ;;  %3094 = vmatmul.msk.bf16.vlgmr.msra.gmra.mxu1 %vm319_vm0, %v4163_v0  ;;  %v3217_v36 = vld [vmem:[#allocation4 + $0xf0] sm:$0xf0]  ;;  %v3773_v39 = vld [vmem:[#allocation4 + $0x1e4] sm:$0xf]  ;;  %v4175_v43 = vor.u32 %v3775_v34, %v3343_v32  ;;  %v3199_v45 = vld [vmem:[#allocation4 + $0xc0] sm:$0xf] }
  0x2d   :  { %393 = vmatpush.bf16.msrb.mxu1 %v3052_v7  ;;  %406 = vmatpush.bf16.msrb.mxu2 %v3056_v8  ;;  %v3345_v40 = vld [vmem:[#allocation4 + $0x1f0] sm:$0xf0]  ;;  %v4177_v44 = vor.u32 %v3741_v35, %v3217_v36  ;;  %v3739_v46 = vld [vmem:[#allocation4 + $0xcc] sm:$0xf0]  ;;  %v3327_v47 = vld [vmem:[#allocation4 + $0x1c0] sm:$0xf] }
  0x2e   :  { %419 = vmatpush.bf16.msrb.mxu3 %v3060_v12  ;;  %v4179_v48 = vor.u32 %v3773_v39, %v3345_v40  ;;  %v3771_v49 = vld [vmem:[#allocation4 + $0x1cc] sm:$0xf0]  ;;  %v3737_v50 = vld [vmem:[#allocation4 + $0xc4] sm:$0xf]  ;;  %v3201_v51 = vld [vmem:[#allocation4 + $0xd0] sm:$0xf0]  ;;  %v4182_v54 = vor.u32 %v3739_v46, %v3199_v45 }
  0x2f   :  { %v3769_v52 = vld [vmem:[#allocation4 + $0x1c4] sm:$0xf]  ;;  %v3329_v53 = vld [vmem:[#allocation4 + $0x1d0] sm:$0xf0]  ;;  %v4186_v55 = vor.u32 %v3771_v49, %v3327_v47  ;;  %v4188_v56 = vor.u32 %v3737_v50, %v3201_v51  ;;  %v3183_v57 = vld [vmem:[#allocation4 + $0xa0] sm:$0xf] }
  0x30   :  { %381 = vmatpush.bf16.msrb.mxu0 %v3016_v18  ;;  %v3735_v58 = vld [vmem:[#allocation4 + $0xac] sm:$0xf0]  ;;  %v3311_v59 = vld [vmem:[#allocation4 + $0x1a0] sm:$0xf]  ;;  %v4191_v60 = vor.u32 %v3769_v52, %v3329_v53  ;;  %v3733_v62 = vld [vmem:[#allocation4 + $0xa4] sm:$0xf] }
  0x31   :  { %394 = vmatpush.bf16.msrb.mxu1 %v3020_v21  ;;  %407 = vmatpush.bf16.msrb.mxu2 %v3024_v22  ;;  %v3767_v61 = vld [vmem:[#allocation4 + $0x1ac] sm:$0xf0]  ;;  %v3185_v63 = vld [vmem:[#allocation4 + $0xb0] sm:$0xf0]  ;;  %v3765_v1 = vld [vmem:[#allocation4 + $0x1a4] sm:$0xf]  ;;  %v4196_v3 = vor.u32 %v3735_v58, %v3183_v57 }
  0x32   :  { %420 = vmatpush.bf16.msrb.mxu3 %v3028_v26  ;;  %v3313_v2 = vld [vmem:[#allocation4 + $0x1b0] sm:$0xf0]  ;;  %v4200_v4 = vor.u32 %v3767_v61, %v3311_v59  ;;  %v4202_v5 = vor.u32 %v3733_v62, %v3185_v63  ;;  %v3167_v6 = vld [vmem:[#allocation4 + $0x80] sm:$0xf]  ;;  %v3731_v7 = vld [vmem:[#allocation4 + $0x8c] sm:$0xf0] }
  0x33   :  { %v3295_v8 = vld [vmem:[#allocation4 + $0x180] sm:$0xf]  ;;  %v4205_v9 = vor.u32 %v3765_v1, %v3313_v2  ;;  %v3763_v10 = vld [vmem:[#allocation4 + $0x18c] sm:$0xf0]  ;;  %v3729_v11 = vld [vmem:[#allocation4 + $0x84] sm:$0xf]  ;;  %v4214_v15 = vor.u32 %v3731_v7, %v3167_v6 }
  0x34   :  { %382 = vmatpush.bf16.msrb.mxu0 %v2984_v33  ;;  %v3169_v12 = vld [vmem:[#allocation4 + $0x90] sm:$0xf0]  ;;  %v3761_v13 = vld [vmem:[#allocation4 + $0x184] sm:$0xf]  ;;  %v4218_v16 = vor.u32 %v3763_v10, %v3295_v8  ;;  %v3151_v18 = vld [vmem:[#allocation4 + $0x60] sm:$0xf] }
  0x35   :  { %395 = vmatpush.bf16.msrb.mxu1 %v2988_v37  ;;  %408 = vmatpush.bf16.msrb.mxu2 %v2992_v38  ;;  %v3297_v14 = vld [vmem:[#allocation4 + $0x190] sm:$0xf0]  ;;  %v4220_v17 = vor.u32 %v3729_v11, %v3169_v12  ;;  %v3727_v19 = vld [vmem:[#allocation4 + $0x6c] sm:$0xf0]  ;;  %v3279_v20 = vld [vmem:[#allocation4 + $0x160] sm:$0xf] }
  0x36   :  { %421 = vmatpush.bf16.msrb.mxu3 %v2996_v41  ;;  %v4223_v21 = vor.u32 %v3761_v13, %v3297_v14  ;;  %v3725_v22 = vld [vmem:[#allocation4 + $0x64] sm:$0xf]  ;;  %v3153_v23 = vld [vmem:[#allocation4 + $0x70] sm:$0xf0]  ;;  %v4226_v26 = vor.u32 %v3727_v19, %v3151_v18  ;;  %v3135_v29 = vld [vmem:[#allocation4 + $0x40] sm:$0xf] }
  0x37   :  { %v3757_v24 = vld [vmem:[#allocation4 + $0x164] sm:$0xf]  ;;  %v3281_v25 = vld [vmem:[#allocation4 + $0x170] sm:$0xf0]  ;;  %v4232_v28 = vor.u32 %v3725_v22, %v3153_v23  ;;  %v3723_v30 = vld [vmem:[#allocation4 + $0x4c] sm:$0xf0] }
  0x38   :  { %833 = vmatpush.bf16.msra.mxu0 %v4173_v42  ;;  %v3263_v31 = vld [vmem:[#allocation4 + $0x140] sm:$0xf]  ;;  %v4235_v32 = vor.u32 %v3757_v24, %v3281_v25  ;;  %v3755_v33 = vld [vmem:[#allocation4 + $0x14c] sm:$0xf0]  ;;  %v3721_v34 = vld [vmem:[#allocation4 + $0x44] sm:$0xf]  ;;  %v4238_v38 = vor.u32 %v3723_v30, %v3135_v29 }
  0x39   :  { %846 = vmatpush.bf16.msra.mxu1 %v4175_v43  ;;  %859 = vmatpush.bf16.msra.mxu2 %v4177_v44  ;;  %v3137_v35 = vld [vmem:[#allocation4 + $0x50] sm:$0xf0]  ;;  %v3753_v36 = vld [vmem:[#allocation4 + $0x144] sm:$0xf]  ;;  %v3119_v39 = vld [vmem:[#allocation4 + $0x20] sm:$0xf]  ;;  %v4242_v40 = vor.u32 %v3755_v33, %v3263_v31 }
  0x3a   :  { %872 = vmatpush.bf16.msra.mxu3 %v4179_v48  ;;  %3099 = vmatmul.msk.bf16.vlgmr.msrb.gmra.mxu2 %vm319_vm0, %v4163_v0  ;;  %v3265_v37 = vld [vmem:[#allocation4 + $0x150] sm:$0xf0]  ;;  %v4244_v41 = vor.u32 %v3721_v34, %v3137_v35  ;;  %v3719_v45 = vld [vmem:[#allocation4 + $0x2c] sm:$0xf0]  ;;  %v3247_v46 = vld [vmem:[#allocation4 + $0x120] sm:$0xf] }
  0x3b   :  { %3097 = vmatmul.msk.bf16.vlgmr.msrb.gmra.mxu0 %vm319_vm0, %v4163_v0  ;;  %3100 = vmatmul.msk.bf16.vlgmr.msrb.gmra.mxu3 %vm319_vm0, %v4163_v0  ;;  %v3751_v47 = vld [vmem:[#allocation4 + $0x12c] sm:$0xf0]  ;;  %v4247_v49 = vor.u32 %v3753_v36, %v3265_v37  ;;  %v3717_v50 = vld [vmem:[#allocation4 + $0x24] sm:$0xf]  ;;  %v3121_v51 = vld [vmem:[#allocation4 + $0x30] sm:$0xf0]  ;;  %v4250_v59 = vor.u32 %v3719_v45, %v3119_v39 }
  0x3c   :  { %834 = vmatpush.bf16.msra.mxu0 %v4182_v54  ;;  %3098 = vmatmul.msk.bf16.vlgmr.msrb.gmra.mxu1 %vm319_vm0, %v4163_v0  ;;  %v3759_v0 = vld [vmem:[#allocation4 + $0x16c] sm:$0xf0]  ;;  %v3749_v52 = vld [vmem:[#allocation4 + $0x124] sm:$0xf]  ;;  %v3249_v53 = vld [vmem:[#allocation4 + $0x130] sm:$0xf0]  ;;  %v4254_v1 = vor.u32 %v3751_v47, %v3247_v46  ;;  %v4256_v2 = vor.u32 %v3717_v50, %v3121_v51 }
  0x3d   :  { %847 = vmatpush.bf16.msra.mxu1 %v4186_v55  ;;  %860 = vmatpush.bf16.msra.mxu2 %v4188_v56  ;;  %v4230_v27 = vor.u32 %v3759_v0, %v3279_v20  ;;  %v3103_v57 = vld [vmem:[#allocation4] sm:$0xf]  ;;  %v3715_v58 = vld [vmem:[#allocation4 + $0xc] sm:$0xf0]  ;;  %5459 = vst [vmem:[#allocation9_spill] sm:$0xff] %v4250_v59  ;;  %v4259_v8 = vor.u32 %v3749_v52, %v3249_v53  ;;  %v4054_v0 = vmov 0.0   ;;  %vm3357_vm2 = vmneg %vm430_vm1 }
  0x3e   :  { %873 = vmatpush.bf16.msra.mxu3 %v4191_v60  ;;  %v3231_v61 = vld [vmem:[#allocation4 + $0x100] sm:$0xf]  ;;  %v3747_v62 = vld [vmem:[#allocation4 + $0x10c] sm:$0xf0]  ;;  %v3713_v63 = vld [vmem:[#allocation4 + $0x4] sm:$0xf]  ;;  %v4262_v18 = vor.u32 %v3715_v58, %v3103_v57 }
  0x3f   :  { %5460 = vst [vmem:[#allocation10_spill] sm:$0xff] %v4254_v1  ;;  %v3105_v6 = vld [vmem:[#allocation4 + $0x10] sm:$0xf0]  ;;  %v3745_v7 = vld [vmem:[#allocation4 + $0x104] sm:$0xf]  ;;  %v4264_v22 = vrot.slane %v4054_v0, 7  ;;  %v4268_v23 = vor.u32 %v3747_v62, %v3231_v61  ;;  %vm4291_vm3 = vmpackc.low %vm3357_vm2, %vm3357_vm2 }
  0x40   :  { %835 = vmatpush.bf16.msra.mxu0 %v4196_v3  ;;  %5461 = vst [vmem:[#allocation11_spill] sm:$0xff] %v4256_v2  ;;  %v3233_v10 = vld [vmem:[#allocation4 + $0x110] sm:$0xf0]  ;;  %v3223_v11 = vld [vmem:[#allocation4 + $0xe8] sm:$0xf]  ;;  %v4270_v24 = vor.u32 %v3713_v63, %v3105_v6  ;;  %s5515_s21 = sld [smem:[#allocation77_spill]] }
  0x41   :  { %848 = vmatpush.bf16.msra.mxu1 %v4200_v4  ;;  %861 = vmatpush.bf16.msra.mxu2 %v4202_v5  ;;  %5462 = vst [vmem:[#allocation12_spill] sm:$0xff] %v4259_v8  ;;  %v3744_v12 = vld [vmem:[#allocation4 + $0xf4] sm:$0xf0]  ;;  %v3351_v13 = vld [vmem:[#allocation4 + $0x1e8] sm:$0xf]  ;;  %v4273_v30 = vor.u32 %v3745_v7, %v3233_v10  ;;  %v4287_v45 = vpack.c.bf16 %v4264_v22, %v4264_v22  ;;  %s5759_s29 = sld [smem:[#allocation78_spill]] }
  0x42   :  { %874 = vmatpush.bf16.msra.mxu3 %v4205_v9  ;;  %v3776_v14 = vld [vmem:[#allocation4 + $0x1f4] sm:$0xf0]  ;;  %5463 = vst [vmem:[#allocation13_spill] sm:$0xff] %v4262_v18  ;;  %v3742_v19 = vld [vmem:[#allocation4 + $0xec] sm:$0xf]  ;;  %v4275_v31 = vor.u32 %v3744_v12, %v3223_v11 }
  0x43   :  { %v3225_v20 = vld [vmem:[#allocation4 + $0xf8] sm:$0xf0]  ;;  %5464 = vst [vmem:[#allocation14_spill] sm:$0xff] %v4264_v22  ;;  %v3774_v25 = vld [vmem:[#allocation4 + $0x1ec] sm:$0xf]  ;;  %v4278_v33 = vor.u32 %v3776_v14, %v3351_v13 }
  0x44   :  { %836 = vmatpush.bf16.msra.mxu0 %v4214_v15  ;;  %5465 = vst [vmem:[#allocation15_spill] sm:$0xff] %v4268_v23  ;;  %v3353_v29 = vld [vmem:[#allocation4 + $0x1f8] sm:$0xf0]  ;;  %v4280_v34 = vor.u32 %v3742_v19, %v3225_v20  ;;  %v3207_v35 = vld [vmem:[#allocation4 + $0xc8] sm:$0xf] }
  0x45   :  { %849 = vmatpush.bf16.msra.mxu1 %v4218_v16  ;;  %862 = vmatpush.bf16.msra.mxu2 %v4220_v17  ;;  %5466 = vst [vmem:[#allocation16_spill] sm:$0xff] %v4270_v24  ;;  %v3740_v36 = vld [vmem:[#allocation4 + $0xd4] sm:$0xf0]  ;;  %v3335_v37 = vld [vmem:[#allocation4 + $0x1c8] sm:$0xf]  ;;  %v4283_v39 = vor.u32 %v3774_v25, %v3353_v29 }
  0x46   :  { %875 = vmatpush.bf16.msra.mxu3 %v4223_v21  ;;  %5467 = vst [vmem:[#allocation17_spill] sm:$0xff] %v4273_v30  ;;  %v3772_v46 = vld [vmem:[#allocation4 + $0x1d4] sm:$0xf0]  ;;  %v3738_v47 = vld [vmem:[#allocation4 + $0xcc] sm:$0xf]  ;;  %v4297_v57 = vor.u32 %v3740_v36, %v3207_v35 }
  0x47   :  { %5468 = vst [vmem:[#allocation18_spill] sm:$0xff] %v4275_v31  ;;  %v3209_v50 = vld [vmem:[#allocation4 + $0xd8] sm:$0xf0]  ;;  %v3770_v52 = vld [vmem:[#allocation4 + $0x1cc] sm:$0xf]  ;;  %v4301_v61 = vor.u32 %v3772_v46, %v3335_v37 }
  0x48   :  { %837 = vmatpush.bf16.msra.mxu0 %v4226_v26  ;;  %5469 = vst [vmem:[#allocation19_spill] sm:$0xff] %v4278_v33  ;;  %v3337_v53 = vld [vmem:[#allocation4 + $0x1d8] sm:$0xf0]  ;;  %v3191_v58 = vld [vmem:[#allocation4 + $0xa8] sm:$0xf]  ;;  %v4303_v62 = vor.u32 %v3738_v47, %v3209_v50 }
  0x49   :  { %850 = vmatpush.bf16.msra.mxu1 %v4230_v27  ;;  %863 = vmatpush.bf16.msra.mxu2 %v4232_v28  ;;  %5470 = vst [vmem:[#allocation20_spill] sm:$0xff] %v4280_v34  ;;  %v3736_v63 = vld [vmem:[#allocation4 + $0xb4] sm:$0xf0]  ;;  %v3319_v6 = vld [vmem:[#allocation4 + $0x1a8] sm:$0xf]  ;;  %v4309_v10 = vor.u32 %v3770_v52, %v3337_v53 }
  0x4a   :  { %876 = vmatpush.bf16.msra.mxu3 %v4235_v32  ;;  %5471 = vst [vmem:[#allocation21_spill] sm:$0xff] %v4283_v39  ;;  %v3768_v7 = vld [vmem:[#allocation4 + $0x1b4] sm:$0xf0]  ;;  %v3734_v11 = vld [vmem:[#allocation4 + $0xac] sm:$0xf]  ;;  %v4321_v0 = vor.u32 %v3736_v63, %v3191_v58 }
  0x4b   :  { %5474 = vst [vmem:[#allocation22_spill] sm:$0xff] %v4297_v57  ;;  %v3193_v12 = vld [vmem:[#allocation4 + $0xb8] sm:$0xf0]  ;;  %v3766_v13 = vld [vmem:[#allocation4 + $0x1ac] sm:$0xf]  ;;  %v4325_v37 = vor.u32 %v3768_v7, %v3319_v6 }
  0x4c   :  { %838 = vmatpush.bf16.msra.mxu0 %v4238_v38  ;;  %5475 = vst [vmem:[#allocation23_spill] sm:$0xff] %v4301_v61  ;;  %v3321_v14 = vld [vmem:[#allocation4 + $0x1b8] sm:$0xf0]  ;;  %v3175_v19 = vld [vmem:[#allocation4 + $0x88] sm:$0xf]  ;;  %v4327_v46 = vor.u32 %v3734_v11, %v3193_v12 }
  0x4d   :  { %851 = vmatpush.bf16.msra.mxu1 %v4242_v40  ;;  %864 = vmatpush.bf16.msra.mxu2 %v4244_v41  ;;  %5476 = vst [vmem:[#allocation24_spill] sm:$0xff] %v4303_v62  ;;  %v3732_v20 = vld [vmem:[#allocation4 + $0x94] sm:$0xf0]  ;;  %v3303_v25 = vld [vmem:[#allocation4 + $0x188] sm:$0xf]  ;;  %v4330_v52 = vor.u32 %v3766_v13, %v3321_v14 }
  0x4e   :  { %877 = vmatpush.bf16.msra.mxu3 %v4247_v49  ;;  %5477 = vst [vmem:[#allocation25_spill] sm:$0xff] %v4309_v10  ;;  %v3764_v29 = vld [vmem:[#allocation4 + $0x194] sm:$0xf0]  ;;  %v3730_v35 = vld [vmem:[#allocation4 + $0x8c] sm:$0xf]  ;;  %v4333_v53 = vor.u32 %v3732_v20, %v3175_v19 }
  0x4f   :  { %5478 = vst [vmem:[#allocation26_spill] sm:$0xff] %v4321_v0  ;;  %v3177_v36 = vld [vmem:[#allocation4 + $0x98] sm:$0xf0]  ;;  %v3762_v47 = vld [vmem:[#allocation4 + $0x18c] sm:$0xf]  ;;  %v4337_v58 = vor.u32 %v3764_v29, %v3303_v25 }
  0x50   :  { %839 = vmatpush.bf16.msra.mxu0 %v4250_v59  ;;  %5479 = vst [vmem:[#allocation27_spill] sm:$0xff] %v4325_v37  ;;  %v3305_v50 = vld [vmem:[#allocation4 + $0x198] sm:$0xf0]  ;;  %v4339_v63 = vor.u32 %v3730_v35, %v3177_v36  ;;  %v3159_v6 = vld [vmem:[#allocation4 + $0x68] sm:$0xf] }
  0x51   :  { %852 = vmatpush.bf16.msra.mxu1 %v4254_v1  ;;  %865 = vmatpush.bf16.msra.mxu2 %v4256_v2  ;;  %5480 = vst [vmem:[#allocation28_spill] sm:$0xff] %v4327_v46  ;;  %v3728_v7 = vld [vmem:[#allocation4 + $0x74] sm:$0xf0]  ;;  %v3287_v11 = vld [vmem:[#allocation4 + $0x168] sm:$0xf]  ;;  %v4342_v12 = vor.u32 %v3762_v47, %v3305_v50 }
  0x52   :  { %878 = vmatpush.bf16.msra.mxu3 %v4259_v8  ;;  %5481 = vst [vmem:[#allocation29_spill] sm:$0xff] %v4330_v52  ;;  %v3760_v13 = vld [vmem:[#allocation4 + $0x174] sm:$0xf0]  ;;  %v3726_v14 = vld [vmem:[#allocation4 + $0x6c] sm:$0xf] }
  0x53   :  { %5482 = vst [vmem:[#allocation30_spill] sm:$0xff] %v4333_v53  ;;  %v3161_v22 = vld [vmem:[#allocation4 + $0x78] sm:$0xf0]  ;;  %v3758_v19 = vld [vmem:[#allocation4 + $0x16c] sm:$0xf]  ;;  %v4349_v25 = vor.u32 %v3760_v13, %v3287_v11 }
  0x54   :  { %840 = vmatpush.bf16.msra.mxu0 %v4262_v18  ;;  %5483 = vst [vmem:[#allocation31_spill] sm:$0xff] %v4337_v58  ;;  %v3289_v20 = vld [vmem:[#allocation4 + $0x178] sm:$0xf0]  ;;  %v4351_v29 = vor.u32 %v3726_v14, %v3161_v22  ;;  %v3143_v35 = vld [vmem:[#allocation4 + $0x48] sm:$0xf] }
  0x55   :  { %853 = vmatpush.bf16.msra.mxu1 %v4268_v23  ;;  %866 = vmatpush.bf16.msra.mxu2 %v4270_v24  ;;  %5484 = vst [vmem:[#allocation32_spill] sm:$0xff] %v4339_v63  ;;  %v3724_v36 = vld [vmem:[#allocation4 + $0x54] sm:$0xf0]  ;;  %v3271_v47 = vld [vmem:[#allocation4 + $0x148] sm:$0xf]  ;;  %v4354_v50 = vor.u32 %v3758_v19, %v3289_v20 }
  0x56   :  { %879 = vmatpush.bf16.msra.mxu3 %v4273_v30  ;;  %5485 = vst [vmem:[#allocation33_spill] sm:$0xff] %v4342_v12  ;;  %v3127_v13 = vld [vmem:[#allocation4 + $0x28] sm:$0xf]  ;;  %v3720_v14 = vld [vmem:[#allocation4 + $0x34] sm:$0xf0] }
  0x57   :  { %3361 = vmatmul.msk.bf16.vlgmr.msra.gmra.mxu0 %vm4291_vm3, %v4287_v45  ;;  %5487 = vst [vmem:[#allocation35_spill] sm:$0xff] %v4349_v25  ;;  %v3255_v19 = vld [vmem:[#allocation4 + $0x128] sm:$0xf] }
  0x58   :  { %885 = vmatpush.bf16.msrb.mxu0 %v4275_v31  ;;  %3366 = vmatmul.msk.bf16.vlgmr.msra.gmra.mxu1 %vm4291_vm3, %v4287_v45  ;;  %5488 = vst [vmem:[#allocation36_spill] sm:$0xff] %v4351_v29 }
  0x59   :  { %898 = vmatpush.bf16.msrb.mxu1 %v4278_v33  ;;  %911 = vmatpush.bf16.msrb.mxu2 %v4280_v34  ;;  %5489 = vst [vmem:[#allocation37_spill] sm:$0xff] %v4354_v50 }
  0x5a   :  { %924 = vmatpush.bf16.msrb.mxu3 %v4283_v39  ;;  %3371 = vmatmul.msk.bf16.vlgmr.msra.gmra.mxu2 %vm4291_vm3, %v4287_v45 }
  0x5b   :  { %3376 = vmatmul.msk.bf16.vlgmr.msra.gmra.mxu3 %vm4291_vm3, %v4287_v45 }
  0x5c   :  { %886 = vmatpush.bf16.msrb.mxu0 %v4297_v57 }
  0x5d   :  { %899 = vmatpush.bf16.msrb.mxu1 %v4301_v61  ;;  %912 = vmatpush.bf16.msrb.mxu2 %v4303_v62 }
  0x5e   :  { %925 = vmatpush.bf16.msrb.mxu3 %v4309_v10 }
  0x60   :  { %887 = vmatpush.bf16.msrb.mxu0 %v4321_v0  ;;  %v4345_v0 = vor.u32 %v3728_v7, %v3159_v6  ;;  %v3754_v6 = vld [vmem:[#allocation4 + $0x14c] sm:$0xf]  ;;  %v3273_v7 = vld [vmem:[#allocation4 + $0x158] sm:$0xf0] }
  0x61   :  { %900 = vmatpush.bf16.msrb.mxu1 %v4325_v37  ;;  %913 = vmatpush.bf16.msrb.mxu2 %v4327_v46  ;;  %v3756_v46 = vld [vmem:[#allocation4 + $0x154] sm:$0xf0]  ;;  %v4366_v20 = vor.u32 %v3754_v6, %v3273_v7  ;;  %v3239_v6 = vld [vmem:[#allocation4 + $0x108] sm:$0xf] }
  0x62   :  { %926 = vmatpush.bf16.msrb.mxu3 %v4330_v52  ;;  %5486 = vst [vmem:[#allocation34_spill] sm:$0xff] %v4345_v0  ;;  %v3722_v52 = vld [vmem:[#allocation4 + $0x4c] sm:$0xf]  ;;  %v4361_v22 = vor.u32 %v3756_v46, %v3271_v47  ;;  %v3716_v47 = vld [vmem:[#allocation4 + $0x14] sm:$0xf0] }
  0x63   :  { %5493 = vst [vmem:[#allocation41_spill] sm:$0xff] %v4366_v20 }
  0x64   :  { %888 = vmatpush.bf16.msrb.mxu0 %v4333_v53  ;;  %v3145_v53 = vld [vmem:[#allocation4 + $0x58] sm:$0xf0]  ;;  %5491 = vst [vmem:[#allocation39_spill] sm:$0xff] %v4361_v22 }
  0x65   :  { %901 = vmatpush.bf16.msrb.mxu1 %v4337_v58  ;;  %914 = vmatpush.bf16.msrb.mxu2 %v4339_v63  ;;  %v4357_v58 = vor.u32 %v3724_v36, %v3143_v35  ;;  %v4363_v11 = vor.u32 %v3722_v52, %v3145_v53  ;;  %v3752_v63 = vld [vmem:[#allocation4 + $0x134] sm:$0xf0]  ;;  %v3750_v35 = vld [vmem:[#allocation4 + $0x12c] sm:$0xf]  ;;  %v3257_v36 = vld [vmem:[#allocation4 + $0x138] sm:$0xf0] }
  0x66   :  { %927 = vmatpush.bf16.msrb.mxu3 %v4342_v12  ;;  %v3718_v12 = vld [vmem:[#allocation4 + $0x2c] sm:$0xf]  ;;  %v4373_v46 = vor.u32 %v3752_v63, %v3255_v19  ;;  %v3111_v53 = vld [vmem:[#allocation4 + $0x8] sm:$0xf]  ;;  %v4378_v7 = vor.u32 %v3750_v35, %v3257_v36  ;;  %v5506_v19 = vld [vmem:[#allocation33_spill] sm:$0xff] }
  0x67   :  { %5490 = vst [vmem:[#allocation38_spill] sm:$0xff] %v4357_v58  ;;  %v5507_v35 = vld [vmem:[#allocation30_spill] sm:$0xff]  ;;  %v5508_v36 = vld [vmem:[#allocation32_spill] sm:$0xff] }
  0x68   :  { %889 = vmatpush.bf16.msrb.mxu0 %v4345_v0  ;;  %5492 = vst [vmem:[#allocation40_spill] sm:$0xff] %v4363_v11  ;;  %v3129_v0 = vld [vmem:[#allocation4 + $0x38] sm:$0xf0] }
  0x69   :  { %902 = vmatpush.bf16.msrb.mxu1 %v4349_v25  ;;  %915 = vmatpush.bf16.msrb.mxu2 %v4351_v29  ;;  %v4369_v25 = vor.u32 %v3720_v14, %v3127_v13  ;;  %5495 = vst [vmem:[#allocation43_spill] sm:$0xff] %v4373_v46  ;;  %v4375_v52 = vor.u32 %v3718_v12, %v3129_v0  ;;  %v3748_v29 = vld [vmem:[#allocation4 + $0x114] sm:$0xf0]  ;;  %v3746_v13 = vld [vmem:[#allocation4 + $0x10c] sm:$0xf] }
  0x6a   :  { %928 = vmatpush.bf16.msrb.mxu3 %v4354_v50  ;;  %5497 = vst [vmem:[#allocation45_spill] sm:$0xff] %v4378_v7  ;;  %v3714_v50 = vld [vmem:[#allocation4 + $0xc] sm:$0xf]  ;;  %v3241_v14 = vld [vmem:[#allocation4 + $0x118] sm:$0xf0]  ;;  %v4385_v0 = vor.u32 %v3748_v29, %v3239_v6 }
  0x6b   :  { %5494 = vst [vmem:[#allocation42_spill] sm:$0xff] %v4369_v25  ;;  %v4390_v12 = vor.u32 %v3746_v13, %v3241_v14  ;;  %v5504_v29 = vld [vmem:[#allocation28_spill] sm:$0xff]  ;;  %v5511_v6 = vld [vmem:[#allocation34_spill] sm:$0xff]  ;;  %v5513_v14 = vld [vmem:[#allocation39_spill] sm:$0xff] }
  0x6c   :  { %890 = vmatpush.bf16.msrb.mxu0 %v4357_v58  ;;  %5496 = vst [vmem:[#allocation44_spill] sm:$0xff] %v4375_v52  ;;  %v3113_v58 = vld [vmem:[#allocation4 + $0x18] sm:$0xf0] }
  0x6d   :  { %903 = vmatpush.bf16.msrb.mxu1 %v4361_v22  ;;  %916 = vmatpush.bf16.msrb.mxu2 %v4363_v11  ;;  %v4381_v22 = vor.u32 %v3716_v47, %v3111_v53  ;;  %5499 = vst [vmem:[#allocation47_spill] sm:$0xff] %v4385_v0  ;;  %v4387_v63 = vor.u32 %v3714_v50, %v3113_v58  ;;  %v5503_v58 = vld [vmem:[#allocation26_spill] sm:$0xff]  ;;  %v5505_v50 = vld [vmem:[#allocation31_spill] sm:$0xff]  ;;  %v5510_v47 = vld [vmem:[#allocation37_spill] sm:$0xff] }
  0x6e   :  { %929 = vmatpush.bf16.msrb.mxu3 %v4366_v20  ;;  %5501 = vst [vmem:[#allocation49_spill] sm:$0xff] %v4390_v12  ;;  %v5509_v53 = vld [vmem:[#allocation35_spill] sm:$0xff]  ;;  %v5512_v13 = vld [vmem:[#allocation36_spill] sm:$0xff] }
  0x6f   :  { %5498 = vst [vmem:[#allocation46_spill] sm:$0xff] %v4381_v22 }
  0x70   :  { %891 = vmatpush.bf16.msrb.mxu0 %v4369_v25  ;;  %5500 = vst [vmem:[#allocation48_spill] sm:$0xff] %v4387_v63 }
  0x71   :  { %904 = vmatpush.bf16.msrb.mxu1 %v4373_v46  ;;  %917 = vmatpush.bf16.msrb.mxu2 %v4375_v52 }
  0x72   :  { %930 = vmatpush.bf16.msrb.mxu3 %v4378_v7 }
  0x74   :  { %892 = vmatpush.bf16.msrb.mxu0 %v4381_v22 }
  0x75   :  { %905 = vmatpush.bf16.msrb.mxu1 %v4385_v0  ;;  %918 = vmatpush.bf16.msrb.mxu2 %v4387_v63 }
  0x76   :  { %931 = vmatpush.bf16.msrb.mxu3 %v4390_v12 }
  0x77   :  { %3381 = vmatmul.msk.bf16.vlgmr.msrb.gmra.mxu0 %vm4291_vm3, %v4287_v45 }
  0x78   :  { %3386 = vmatmul.msk.bf16.vlgmr.msrb.gmra.mxu1 %vm4291_vm3, %v4287_v45  ;;  %3391 = vmatmul.msk.bf16.vlgmr.msrb.gmra.mxu2 %vm4291_vm3, %v4287_v45 }
  0x79   :  { %1049 = vmatpush.bf16.msra.mxu1 %v4175_v43  ;;  %3396 = vmatmul.msk.bf16.vlgmr.msrb.gmra.mxu3 %vm4291_vm3, %v4287_v45  ;;  %v5502_v45 = vld [vmem:[#allocation29_spill] sm:$0xff] }
  0x7a   :  { %1075 = vmatpush.bf16.msra.mxu3 %v4179_v48  ;;  %1036 = vmatpush.bf16.msra.mxu0 %v4173_v42 }
  0x7b   :  { %1062 = vmatpush.bf16.msra.mxu2 %v4177_v44 }
  0x7d   :  { %1050 = vmatpush.bf16.msra.mxu1 %v4186_v55 }
  0x7e   :  { %1076 = vmatpush.bf16.msra.mxu3 %v4191_v60  ;;  %1037 = vmatpush.bf16.msra.mxu0 %v4182_v54 }
  0x7f   :  { %1063 = vmatpush.bf16.msra.mxu2 %v4188_v56 }
  0x81   :  { %1051 = vmatpush.bf16.msra.mxu1 %v4200_v4 }
  0x82   :  { %1077 = vmatpush.bf16.msra.mxu3 %v4205_v9  ;;  %1038 = vmatpush.bf16.msra.mxu0 %v4196_v3 }
  0x83   :  { %1064 = vmatpush.bf16.msra.mxu2 %v4202_v5 }
  0x85   :  { %1052 = vmatpush.bf16.msra.mxu1 %v4218_v16 }
  0x86   :  { %1078 = vmatpush.bf16.msra.mxu3 %v4223_v21  ;;  %1039 = vmatpush.bf16.msra.mxu0 %v4214_v15 }
  0x87   :  { %1065 = vmatpush.bf16.msra.mxu2 %v4220_v17 }
  0x89   :  { %1053 = vmatpush.bf16.msra.mxu1 %v4230_v27 }
  0x8a   :  { %1079 = vmatpush.bf16.msra.mxu3 %v4235_v32  ;;  %1040 = vmatpush.bf16.msra.mxu0 %v4226_v26 }
  0x8b   :  { %1066 = vmatpush.bf16.msra.mxu2 %v4232_v28 }
  0x8d   :  { %1054 = vmatpush.bf16.msra.mxu1 %v4242_v40 }
  0x8e   :  { %1080 = vmatpush.bf16.msra.mxu3 %v4247_v49  ;;  %1041 = vmatpush.bf16.msra.mxu0 %v4238_v38 }
  0x8f   :  { %1067 = vmatpush.bf16.msra.mxu2 %v4244_v41 }
  0x91   :  { %1055 = vmatpush.bf16.msra.mxu1 %v4254_v1 }
  0x92   :  { %1081 = vmatpush.bf16.msra.mxu3 %v4259_v8  ;;  %1042 = vmatpush.bf16.msra.mxu0 %v4250_v59 }
  0x93   :  { %1068 = vmatpush.bf16.msra.mxu2 %v4256_v2 }
  0x95   :  { %1056 = vmatpush.bf16.msra.mxu1 %v4268_v23 }
  0x96   :  { %1082 = vmatpush.bf16.msra.mxu3 %v4273_v30  ;;  %1043 = vmatpush.bf16.msra.mxu0 %v4262_v18 }
  0x97   :  { %1069 = vmatpush.bf16.msra.mxu2 %v4270_v24 }
  0x99   :  { %1101 = vmatpush.bf16.msrb.mxu1 %v4278_v33 }
  0x9a   :  { %1127 = vmatpush.bf16.msrb.mxu3 %v4283_v39  ;;  %1088 = vmatpush.bf16.msrb.mxu0 %v4275_v31 }
  0x9b   :  { %1114 = vmatpush.bf16.msrb.mxu2 %v4280_v34 }
  0x9d   :  { %1102 = vmatpush.bf16.msrb.mxu1 %v4301_v61 }
  0x9e   :  { %1128 = vmatpush.bf16.msrb.mxu3 %v4309_v10  ;;  %1089 = vmatpush.bf16.msrb.mxu0 %v4297_v57 }
  0x9f   :  { %1115 = vmatpush.bf16.msrb.mxu2 %v4303_v62 }
  0xa1   :  { %1103 = vmatpush.bf16.msrb.mxu1 %v4325_v37 }
  0xa2   :  { %1129 = vmatpush.bf16.msrb.mxu3 %v5502_v45  ;;  %1090 = vmatpush.bf16.msrb.mxu0 %v5503_v58 }
  0xa3   :  { %1116 = vmatpush.bf16.msrb.mxu2 %v5504_v29  ;;  %v5514_v29 = vld [vmem:[#allocation38_spill] sm:$0xff] }
  0xa5   :  { %1104 = vmatpush.bf16.msrb.mxu1 %v5505_v50 }
  0xa6   :  { %1130 = vmatpush.bf16.msrb.mxu3 %v5506_v19  ;;  %1091 = vmatpush.bf16.msrb.mxu0 %v5507_v35 }
  0xa7   :  { %1117 = vmatpush.bf16.msrb.mxu2 %v5508_v36 }
  0xa8   :  { %v332_v35 = vpop.f32.mrf.mxu0 }
  0xa9   :  { %1105 = vmatpush.bf16.msrb.mxu1 %v5509_v53  ;;  %v345_v53 = vpop.f32.mrf.mxu1 }
  0xaa   :  { %1131 = vmatpush.bf16.msrb.mxu3 %v5510_v47  ;;  %1092 = vmatpush.bf16.msrb.mxu0 %v5511_v6 }
  0xab   :  { %1118 = vmatpush.bf16.msrb.mxu2 %v5512_v13 }
  0xad   :  { %1106 = vmatpush.bf16.msrb.mxu1 %v5513_v14 }
  0xae   :  { %1132 = vmatpush.bf16.msrb.mxu3 %v4366_v20  ;;  %1093 = vmatpush.bf16.msrb.mxu0 %v5514_v29  ;;  %v4473_v29 = vld [vmem:[%s5515_s21] sm:$0xff]  ;;  %v371_v20 = vpop.f32.mrf.mxu3 }
  0xaf   :  { %1119 = vmatpush.bf16.msrb.mxu2 %v4363_v11  ;;  %v358_v11 = vpop.f32.mrf.mxu2  ;;  %v146_v14 = vperm.slane %v4473_v29, 3  ;;  %v149_v47 = vperm.slane %v4473_v29, 6  ;;  %v150_v36 = vperm.slane %v4473_v29, 7  ;;  %v148_v19 = vperm.slane %v4473_v29, 5 }
  0xb1   :  { %1107 = vmatpush.bf16.msrb.mxu1 %v4373_v46  ;;  %v143_v46 = vperm.slane %v4473_v29, 0 }
  0xb2   :  { %1133 = vmatpush.bf16.msrb.mxu3 %v4378_v7  ;;  %1094 = vmatpush.bf16.msrb.mxu0 %v4369_v25  ;;  %v144_v7 = vperm.slane %v4473_v29, 1  ;;  %v347_v25 = vpop.f32.mrf.mxu1 }
  0xb3   :  { %1120 = vmatpush.bf16.msrb.mxu2 %v4375_v52  ;;  %v334_v52 = vpop.f32.mrf.mxu0 }
  0xb4   :  { %v4483_v13 = vadd.f32 %v345_v53, %v144_v7  ;;  %v4494_v7 = vadd.f32 %v371_v20, %v146_v14 }
  0xb5   :  { %1108 = vmatpush.bf16.msrb.mxu1 %v4385_v0  ;;  %v145_v0 = vperm.slane %v4473_v29, 2 }
  0xb6   :  { %1134 = vmatpush.bf16.msrb.mxu3 %v4390_v12  ;;  %1095 = vmatpush.bf16.msrb.mxu0 %v4381_v22  ;;  %v4480_v12 = vadd.f32 %v332_v35, %v143_v46  ;;  %v147_v22 = vperm.slane %v4473_v29, 4  ;;  %v373_v25 = vpop.f32.mrf.mxu3  ;;  %v1017_v53 = vrot.slane %v4483_v13, 1  ;;  %v1415_v58 = vrot.slane %v4483_v13, 3 }
  0xb7   :  { %1121 = vmatpush.bf16.msrb.mxu2 %v4387_v63  ;;  %v360_v6 = vpop.f32.mrf.mxu2  ;;  %v4489_v63 = vadd.f32 %v358_v11, %v145_v0  ;;  %v1614_v11 = vrot.slane %v4483_v13, 4  ;;  %v1019_v29 = vrot.slane %v4494_v7, 1  ;;  %v1218_v45 = vrot.slane %v4494_v7, 2 }
  0xb8   :  { %v1016_v52 = vrot.slane %v4480_v12, 1  ;;  %v1215_v46 = vrot.slane %v4480_v12, 2  ;;  %v1414_v35 = vrot.slane %v4480_v12, 3  ;;  %v1216_v6 = vrot.slane %v4483_v13, 2 }
  0xb9   :  { %v1613_v50 = vrot.slane %v4480_v12, 4  ;;  %v1018_v10 = vrot.slane %v4489_v63, 1  ;;  %v1217_v61 = vrot.slane %v4489_v63, 2  ;;  %v1416_v0 = vrot.slane %v4489_v63, 3 }
  0xba   :  { %v397_v57 = vpop.f32.mrf.mxu1  ;;  %v1615_v20 = vrot.slane %v4489_v63, 4  ;;  %v1417_v37 = vrot.slane %v4494_v7, 3  ;;  %v1616_v33 = vrot.slane %v4494_v7, 4  ;;  %v1814_v23 = vrot.slane %v4489_v63, 5 }
  0xbb   :  { %v384_v25 = vpop.f32.mrf.mxu0  ;;  %v4512_v34 = vadd.f32 %v397_v57, %v148_v19  ;;  %v1815_v1 = vrot.slane %v4494_v7, 5 }
  0xbc   :  { %v4507_v62 = vadd.f32 %v384_v25, %v147_v22 }
  0xbd   :  { %v1025_v39 = vrot.slane %v4512_v34, 5  ;;  %v1224_v57 = vrot.slane %v4512_v34, 4  ;;  %v1423_v19 = vrot.slane %v4512_v34, 3 }
  0xbe   :  { %v1024_v14 = vrot.slane %v4507_v62, 5  ;;  %v1223_v22 = vrot.slane %v4507_v62, 4  ;;  %v1422_v25 = vrot.slane %v4507_v62, 3 }
  0xbf   :  { %v410_v31 = vpop.f32.mrf.mxu2  ;;  %v4533_v2 = vsel %vm430_vm1, %v1017_v53, %v1025_v39  ;;  %v4536_v59 = vsel %vm430_vm1, %v1216_v6, %v1224_v57  ;;  %v1621_v53 = vrot.slane %v4507_v62, 2  ;;  %v1622_v6 = vrot.slane %v4512_v34, 2 }
  0xc0   :  { %v411_v24 = vadd.f32 %v410_v31, %v149_v47  ;;  %v4526_v18 = vsel %vm430_vm1, %v1016_v52, %v1024_v14  ;;  %v4529_v30 = vsel %vm430_vm1, %v1215_v46, %v1223_v22  ;;  %5517 = vst [vmem:[#allocation51_spill] sm:$0xff] %v4536_v59  ;;  %v4539_v8 = vsel %vm430_vm1, %v1414_v35, %v1422_v25  ;;  %v423_v31 = vpop.f32.mrf.mxu3  ;;  %v5582_v59 = vld [vmem:[#allocation43_spill] sm:$0xff] }
  0xc1   :  { %5516 = vst [vmem:[#allocation50_spill] sm:$0xff] %v4529_v30  ;;  %v4543_v46 = vsel %vm430_vm1, %v1415_v58, %v1423_v19  ;;  %v4545_v22 = vadd.f32 %v423_v31, %v150_v36  ;;  %v2013_v31 = vrot.slane %v4489_v63, 6 }
  0xc2   :  { %5518 = vst [vmem:[#allocation52_spill] sm:$0xff] %v4539_v8  ;;  %v439_v47 = vrot.slane %v411_v24, 6  ;;  %v1026_v52 = vrot.slane %v411_v24, 5  ;;  %v1225_v14 = vrot.slane %v411_v24, 4  ;;  %v1424_v39 = vrot.slane %v411_v24, 3  ;;  %v399_v57 = vpop.f32.mrf.mxu1 }
  0xc3   :  { %5519 = vst [vmem:[#allocation53_spill] sm:$0xff] %v4543_v46  ;;  %v386_v30 = vpop.f32.mrf.mxu0  ;;  %v1623_v58 = vrot.slane %v411_v24, 2  ;;  %v1027_v36 = vrot.slane %v4545_v22, 5  ;;  %v1425_v57 = vrot.slane %v4545_v22, 3  ;;  %v5578_v46 = vld [vmem:[#allocation39_spill] sm:$0xff] }
  0xc4   :  { %v4551_v35 = vsel %vm430_vm1, %v4489_v63, %v439_v47  ;;  %v4554_v25 = vsel %vm430_vm1, %v1018_v10, %v1026_v52  ;;  %v4557_v8 = vsel %vm430_vm1, %v1217_v61, %v1225_v14  ;;  %v1226_v30 = vrot.slane %v4545_v22, 4 }
  0xc5   :  { %5520 = vst [vmem:[#allocation54_spill] sm:$0xff] %v4557_v8  ;;  %v4562_v19 = vsel %vm430_vm1, %v1416_v0, %v1424_v39  ;;  %v4567_v47 = vsel %vm430_vm1, %v1613_v50, %v1621_v53  ;;  %v4570_v10 = vsel %vm430_vm1, %v1614_v11, %v1622_v6  ;;  %v4573_v61 = vsel %vm430_vm1, %v1615_v20, %v1623_v58  ;;  %v5581_v8 = vld [vmem:[#allocation40_spill] sm:$0xff] }
  0xc6   :  { %5521 = vst [vmem:[#allocation55_spill] sm:$0xff] %v4562_v19  ;;  %v4576_v14 = vsel %vm430_vm1, %v1019_v29, %v1027_v36  ;;  %v4579_v0 = vsel %vm430_vm1, %v1218_v45, %v1226_v30  ;;  %v1624_v39 = vrot.slane %v4545_v22, 2  ;;  %v2014_v19 = vrot.slane %v4494_v7, 6 }
  0xc7   :  { %5522 = vst [vmem:[#allocation56_spill] sm:$0xff] %v4567_v47  ;;  %v412_v52 = vpop.f32.mrf.mxu2  ;;  %v4584_v50 = vsel %vm430_vm1, %v1417_v37, %v1425_v57  ;;  %v1820_v11 = vrot.slane %v4507_v62, 1  ;;  %v1821_v53 = vrot.slane %v4512_v34, 1  ;;  %v1822_v20 = vrot.slane %v411_v24, 1  ;;  %v5576_v47 = vld [vmem:[#allocation34_spill] sm:$0xff] }
  0xc8   :  { %5523 = vst [vmem:[#allocation57_spill] sm:$0xff] %v4570_v10  ;;  %v4589_v6 = vsel %vm430_vm1, %v1616_v33, %v1624_v39  ;;  %v1823_v29 = vrot.slane %v4545_v22, 1  ;;  %v5528_v45 = vrot.slane %v4480_v12, 6  ;;  %v5530_v37 = vrot.slane %v4483_v13, 6  ;;  %v425_v30 = vpop.f32.mrf.mxu3  ;;  %v5575_v10 = vld [vmem:[#allocation37_spill] sm:$0xff] }
  0xc9   :  { %5524 = vst [vmem:[#allocation58_spill] sm:$0xff] %v4573_v61  ;;  %v5532_v57 = vrot.slane %v4480_v12, 5  ;;  %v5534_v52 = vrot.slane %v4483_v13, 5  ;;  %v4625_v30 = vsel %vm430_vm1, %v2014_v19, %v4545_v22  ;;  %v5574_v61 = vld [vmem:[#allocation35_spill] sm:$0xff] }
  0xca   :  { %5525 = vst [vmem:[#allocation59_spill] sm:$0xff] %v4579_v0  ;;  %v4596_v58 = vsel %vm430_vm1, %v5528_v45, %v4507_v62  ;;  %v4602_v36 = vsel %vm430_vm1, %v5530_v37, %v4512_v34  ;;  %v4615_v45 = vsel %vm430_vm1, %v1814_v23, %v1822_v20  ;;  %v4621_v37 = vsel %vm430_vm1, %v1815_v1, %v1823_v29  ;;  %v5580_v0 = vld [vmem:[#allocation38_spill] sm:$0xff] }
  0xcb   :  { %5526 = vst [vmem:[#allocation60_spill] sm:$0xff] %v4584_v50  ;;  %v4607_v33 = vsel %vm430_vm1, %v5532_v57, %v1820_v11  ;;  %v4612_v39 = vsel %vm430_vm1, %v5534_v52, %v1821_v53  ;;  %v2210_v11 = vrot.slane %v4507_v62, 7  ;;  %v2211_v57 = vrot.slane %v4512_v34, 7  ;;  %v5577_v50 = vld [vmem:[#allocation36_spill] sm:$0xff] }
  0xcc   :  { %5527 = vst [vmem:[#allocation61_spill] sm:$0xff] %v4589_v6  ;;  %v2204_v53 = vrot.slane %v4489_v63, 7  ;;  %v2212_v52 = vrot.slane %v411_v24, 7  ;;  %v2205_v23 = vrot.slane %v4494_v7, 7  ;;  %v2213_v20 = vrot.slane %v4545_v22, 7 }
  0xcd   :  { %5529 = vst [vmem:[#allocation62_spill] sm:$0xff] %v4596_v58  ;;  %v4618_v58 = vsel %vm430_vm1, %v2013_v31, %v411_v24  ;;  %v5540_v31 = vrot.slane %v4480_v12, 7  ;;  %v5542_v29 = vrot.slane %v4483_v13, 7  ;;  %v437_v24 = vrot.slane %v4507_v62, 6 }
  0xce   :  { %5531 = vst [vmem:[#allocation63_spill] sm:$0xff] %v4602_v36  ;;  %v4646_v63 = vsel %vm430_vm1, %v2205_v23, %v2213_v20 }
  0xcf   :  { %5533 = vst [vmem:[#allocation64_spill] sm:$0xff] %v4607_v33  ;;  %v4635_v1 = vsel %vm430_vm1, %v5540_v31, %v2210_v11  ;;  %v4640_v19 = vsel %vm430_vm1, %v5542_v29, %v2211_v57  ;;  %v445_v11 = vsel %vm430_vm1, %v4480_v12, %v437_v24 }
  0xd0   :  { %5535 = vst [vmem:[#allocation65_spill] sm:$0xff] %v4612_v39 }
  0xd1   :  { %5536 = vst [vmem:[#allocation66_spill] sm:$0xff] %v4615_v45  ;;  %v438_v45 = vrot.slane %v4512_v34, 6 }
  0xd2   :  { %5537 = vst [vmem:[#allocation67_spill] sm:$0xff] %v4618_v58 }
  0xd3   :  { %5538 = vst [vmem:[#allocation68_spill] sm:$0xff] %v4621_v37  ;;  %v446_v23 = vsel %vm430_vm1, %v4483_v13, %v438_v45 }
  0xd4   :  { %5539 = vst [vmem:[#allocation69_spill] sm:$0xff] %v4625_v30  ;;  %v4643_v30 = vsel %vm430_vm1, %v2204_v53, %v2212_v52  ;;  %v842_v58 = vpop.f32.mrf.mxu0 }
  0xd5   :  { %5541 = vst [vmem:[#allocation70_spill] sm:$0xff] %v4635_v1  ;;  %v855_v36 = vpop.f32.mrf.mxu1 }
  0xd6   :  { %5543 = vst [vmem:[#allocation71_spill] sm:$0xff] %v4640_v19  ;;  %v856_v37 = vadd.f32 %v855_v36, %v842_v58 }
  0xd7   :  { %5544 = vst [vmem:[#allocation72_spill] sm:$0xff] %v4643_v30 }
  0xd8   :  { %5545 = vst [vmem:[#allocation73_spill] sm:$0xff] %v4646_v63  ;;  %v937_v31 = vadd.f32 %v856_v37, %v445_v11 }
  0xda   :  { %v3397_v1 = vmul.f32 -1.442695, %v937_v31 }
  0xdc   :  { %3825 = vpow2.f32 %v3397_v1  ;;  %v844_v53 = vpop.f32.mrf.mxu0 }
  0xdd   :  { %v868_v57 = vpop.f32.mrf.mxu2  ;;  %v857_v30 = vpop.f32.mrf.mxu1 }
  0xde   :  { %v881_v29 = vpop.f32.mrf.mxu3 }
  0xdf   :  { %v882_v52 = vadd.f32 %v881_v29, %v868_v57 }
  0xe1   :  { %v938_v62 = vadd.f32 %v882_v52, %v446_v23 }
  0xe2   :  { %v3826_v63 = vpop.eup %3825 }
  0xe3   :  { %v3398_v20 = vmul.f32 -1.442695, %v938_v62  ;;  %v944_v58 = vadd.f32 1.0, %v3826_v63  ;;  %v440_v63 = vrot.slane %v4545_v22, 6 }
  0xe5   :  { %3827 = vpow2.f32 %v3398_v20  ;;  %v870_v36 = vpop.f32.mrf.mxu2  ;;  %v956_v20 = vand.u32 2147483648, %v944_v58  ;;  %vm950_vm6 = vweird.f32 %v944_v58 }
  0xe6   :  { %v883_v12 = vpop.f32.mrf.mxu3  ;;  %3829 = vrcp.f32 %v944_v58 }
  0xeb   :  { %v3828_v37 = vpop.eup %3827 }
  0xec   :  { %v963_v24 = vadd.f32 1.0, %v3828_v37  ;;  %v3830_v34 = vpop.eup %3829  ;;  %v954_v37 = vand.u32 2147483647, %v944_v58 }
  0xed   :  { %v946_v11 = vmul.f32 %v3830_v34, %v944_v58  ;;  %vm951_vm4 = vweird.f32 %v3830_v34  ;;  %v448_v58 = vsel %vm430_vm1, %v4494_v7, %v440_v63 }
  0xee   :  { %3831 = vrcp.f32 %v963_v24  ;;  %v975_v23 = vand.u32 2147483648, %v963_v24  ;;  %v973_v12 = vand.u32 2147483647, %v963_v24  ;;  %vm969_vm7 = vweird.f32 %v963_v24  ;;  %vm4656_vm8 = vmor %vm950_vm6, %vm951_vm4 }
  0xef   :  { %v947_v1 = vsub.f32 1.0, %v946_v11  ;;  %vm955_vm11 = vcmp.eq.f32.partialorder %v954_v37, 8.507059e+37 }
  0xf0   :  { %v976_v22 = vor.u32 1.1754944e-38, %v975_v23  ;;  %vm974_vm10 = vcmp.eq.f32.partialorder %v973_v12, 8.507059e+37 }
  0xf1   :  { %v948_v29 = vmul.f32 %v3830_v34, %v947_v1 }
  0xf3   :  { %v949_v62 = vadd.f32 %v3830_v34, %v948_v29 }
  0xf4   :  { %v894_v31 = vpop.f32.mrf.mxu0  ;;  %v3832_v57 = vpop.eup %3831 }
  0xf5   :  { %v907_v30 = vpop.f32.mrf.mxu1  ;;  %v965_v53 = vmul.f32 %v3832_v57, %v963_v24  ;;  %vm970_vm5 = vweird.f32 %v3832_v57  ;;  %v953_v29 = vsel %vm4656_vm8, %v3830_v34, %v949_v62 }
  0xf6   :  { %v908_v13 = vadd.f32 %v907_v30, %v894_v31  ;;  %vm971_vm9 = vmor %vm969_vm7, %vm970_vm5 }
  0xf7   :  { %v966_v45 = vsub.f32 1.0, %v965_v53 }
  0xf8   :  { %v939_v52 = vadd.f32 %v908_v13, %v4551_v35 }
  0xf9   :  { %v967_v36 = vmul.f32 %v3832_v57, %v966_v45  ;;  %v957_v45 = vor.u32 1.1754944e-38, %v956_v20 }
  0xfa   :  { %3833 = vtanh.f32 %v939_v52 }
  0xfb   :  { %v920_v11 = vpop.f32.mrf.mxu2  ;;  %v968_v31 = vadd.f32 %v3832_v57, %v967_v36  ;;  %v958_v36 = vsel %vm955_vm11, %v957_v45, %v953_v29 }
  0xfc   :  { %v933_v35 = vpop.f32.mrf.mxu3  ;;  %v896_v30 = vpop.f32.mrf.mxu0 }
  0xfd   :  { %v934_v53 = vadd.f32 %v933_v35, %v920_v11  ;;  %v909_v13 = vpop.f32.mrf.mxu1  ;;  %v972_v52 = vsel %vm971_vm9, %v3832_v57, %v968_v31 }
  0xfe   :  { %v977_v24 = vsel %vm974_vm10, %v976_v22, %v972_v52  ;;  %v5550_v52 = vld [vmem:[#allocation10_spill] sm:$0xff] }
  0xff   :  { %v940_v19 = vadd.f32 %v934_v53, %v448_v58  ;;  %v999_v33 = vmul.f32 0.0, %v977_v24  ;;  %v5549_v53 = vld [vmem:[#allocation14_spill] sm:$0xff]  ;;  %v5551_v58 = vld [vmem:[#allocation12_spill] sm:$0xff]  ;;  %v5552_v24 = vld [vmem:[#allocation9_spill] sm:$0xff] }
 0x100   :  { %v3834_v39 = vpop.eup %3833 }
 0x101   :  { %v1000_v30 = vmul.f32 %v3834_v39, %v958_v36  ;;  %v3399_v23 = vmul.f32 -1.442695, %v940_v19  ;;  %v5553_v36 = vld [vmem:[#allocation11_spill] sm:$0xff] }
 0x103   :  { %v4664_v6 = vadd.f32 %v1000_v30, %v999_v33  ;;  %3835 = vpow2.f32 %v3399_v23  ;;  %v922_v34 = vpop.f32.mrf.mxu2  ;;  %v5554_v30 = vld [vmem:[#allocation15_spill] sm:$0xff]  ;;  %v5555_v23 = vld [vmem:[#allocation17_spill] sm:$0xff] }
 0x104   :  { %v935_v62 = vpop.f32.mrf.mxu3  ;;  %v5556_v34 = vld [vmem:[#allocation13_spill] sm:$0xff] }
 0x105   :  { %v5557_v62 = vld [vmem:[#allocation16_spill] sm:$0xff] }
 0x109   :  { %v3836_v11 = vpop.eup %3835 }
 0x10a   :  { %v983_v20 = vadd.f32 1.0, %v3836_v11  ;;  %v5558_v11 = vld [vmem:[#allocation19_spill] sm:$0xff] }
 0x10c   :  { %3837 = vrcp.f32 %v983_v20  ;;  %v995_v7 = vand.u32 2147483648, %v983_v20  ;;  %v993_v37 = vand.u32 2147483647, %v983_v20  ;;  %vm989_vm13 = vweird.f32 %v983_v20 }
 0x10d   :  { %3839 = vtanh.f32 %v4664_v6 }
 0x10e   :  { %v996_v33 = vor.u32 1.1754944e-38, %v995_v7  ;;  %vm994_vm15 = vcmp.eq.f32.partialorder %v993_v37, 8.507059e+37  ;;  %v5563_v7 = vld [vmem:[#allocation25_spill] sm:$0xff]  ;;  %v5565_v37 = vld [vmem:[#allocation24_spill] sm:$0xff] }
 0x112   :  { %v3838_v57 = vpop.eup %3837 }
 0x113   :  { %v985_v12 = vmul.f32 %v3838_v57, %v983_v20  ;;  %vm990_vm12 = vweird.f32 %v3838_v57  ;;  %v3840_v19 = vpop.eup %3839  ;;  %v5559_v20 = vld [vmem:[#allocation21_spill] sm:$0xff] }
 0x114   :  { %vm991_vm14 = vmor %vm989_vm13, %vm990_vm12 }
 0x115   :  { %v986_v1 = vsub.f32 1.0, %v985_v12  ;;  %v5561_v12 = vld [vmem:[#allocation20_spill] sm:$0xff] }
 0x117   :  { %v987_v63 = vmul.f32 %v3838_v57, %v986_v1  ;;  %v5562_v1 = vld [vmem:[#allocation23_spill] sm:$0xff] }
 0x119   :  { %v988_v31 = vadd.f32 %v3838_v57, %v987_v63  ;;  %v5564_v63 = vld [vmem:[#allocation22_spill] sm:$0xff] }
 0x11b   :  { %v992_v39 = vsel %vm991_vm14, %v3838_v57, %v988_v31  ;;  %v5560_v57 = vld [vmem:[#allocation18_spill] sm:$0xff]  ;;  %v5566_v31 = vld [vmem:[#allocation27_spill] sm:$0xff] }
 0x11c   :  { %v997_v35 = vsel %vm994_vm15, %v996_v33, %v992_v39  ;;  %v5567_v33 = vld [vmem:[#allocation29_spill] sm:$0xff]  ;;  %v5568_v39 = vld [vmem:[#allocation26_spill] sm:$0xff] }
 0x11d   :  { %v4667_v22 = vmul.f32 %v3840_v19, %v997_v35  ;;  %v5569_v19 = vld [vmem:[#allocation28_spill] sm:$0xff]  ;;  %v5570_v35 = vld [vmem:[#allocation31_spill] sm:$0xff] }
 0x11f   :  { %5548 = vst [vmem:[#allocation74_spill] sm:$0xff] %v4667_v22  ;;  %v3404_v29 = vpack.c.bf16 %v4667_v22, %v4667_v22  ;;  %v1008_v13 = vsel %vm430_vm1, %v4667_v22, %v5549_v53  ;;  %v5579_v22 = vld [vmem:[#allocation41_spill] sm:$0xff] }
 0x120   :  { %v1010_v45 = vpack.c.bf16 %v1008_v13, %v1008_v13  ;;  %v5572_v13 = vld [vmem:[#allocation30_spill] sm:$0xff] }
 0x121   :  { %3405 = vmatmul.msk.bf16.vlgmr.msra.gmra.mxu1 %vm4291_vm3, %v3404_v29  ;;  %3410 = vmatmul.msk.bf16.vlgmr.msra.gmra.mxu3 %vm4291_vm3, %v3404_v29 }
 0x122   :  { %1044 = vmatmul.bf16.vlgmr.msra.gmra.mxu0 %v1010_v45  ;;  %1070 = vmatmul.bf16.vlgmr.msra.gmra.mxu2 %v1010_v45 }
 0x123   :  { %1248 = vmatpush.bf16.msra.mxu1 %v4175_v43  ;;  %1274 = vmatpush.bf16.msra.mxu3 %v4179_v48 }
 0x124   :  { %1235 = vmatpush.bf16.msra.mxu0 %v4173_v42  ;;  %1261 = vmatpush.bf16.msra.mxu2 %v4177_v44 }
 0x127   :  { %1249 = vmatpush.bf16.msra.mxu1 %v4186_v55  ;;  %1275 = vmatpush.bf16.msra.mxu3 %v4191_v60 }
 0x128   :  { %1236 = vmatpush.bf16.msra.mxu0 %v4182_v54  ;;  %1262 = vmatpush.bf16.msra.mxu2 %v4188_v56 }
 0x12b   :  { %1250 = vmatpush.bf16.msra.mxu1 %v4200_v4  ;;  %1276 = vmatpush.bf16.msra.mxu3 %v4205_v9 }
 0x12c   :  { %1237 = vmatpush.bf16.msra.mxu0 %v4196_v3  ;;  %1263 = vmatpush.bf16.msra.mxu2 %v4202_v5 }
 0x12f   :  { %1251 = vmatpush.bf16.msra.mxu1 %v4218_v16  ;;  %1277 = vmatpush.bf16.msra.mxu3 %v4223_v21 }
 0x130   :  { %1238 = vmatpush.bf16.msra.mxu0 %v4214_v15  ;;  %1264 = vmatpush.bf16.msra.mxu2 %v4220_v17 }
 0x131   :  { %3415 = vmatmul.msk.bf16.vlgmr.msrb.gmra.mxu1 %vm4291_vm3, %v3404_v29  ;;  %3420 = vmatmul.msk.bf16.vlgmr.msrb.gmra.mxu3 %vm4291_vm3, %v3404_v29  ;;  %v5571_v29 = vld [vmem:[#allocation33_spill] sm:$0xff] }
 0x132   :  { %1096 = vmatmul.bf16.vlgmr.msrb.gmra.mxu0 %v1010_v45  ;;  %1122 = vmatmul.bf16.vlgmr.msrb.gmra.mxu2 %v1010_v45  ;;  %v5573_v45 = vld [vmem:[#allocation32_spill] sm:$0xff] }
 0x133   :  { %1252 = vmatpush.bf16.msra.mxu1 %v4230_v27  ;;  %1278 = vmatpush.bf16.msra.mxu3 %v4235_v32 }
 0x134   :  { %1239 = vmatpush.bf16.msra.mxu0 %v4226_v26  ;;  %1265 = vmatpush.bf16.msra.mxu2 %v4232_v28 }
 0x137   :  { %1253 = vmatpush.bf16.msra.mxu1 %v4242_v40  ;;  %1279 = vmatpush.bf16.msra.mxu3 %v4247_v49 }
 0x138   :  { %1240 = vmatpush.bf16.msra.mxu0 %v4238_v38  ;;  %1266 = vmatpush.bf16.msra.mxu2 %v4244_v41 }
 0x13b   :  { %1254 = vmatpush.bf16.msra.mxu1 %v5550_v52  ;;  %1280 = vmatpush.bf16.msra.mxu3 %v5551_v58 }
 0x13c   :  { %1241 = vmatpush.bf16.msra.mxu0 %v5552_v24  ;;  %1267 = vmatpush.bf16.msra.mxu2 %v5553_v36 }
 0x13f   :  { %1255 = vmatpush.bf16.msra.mxu1 %v5554_v30  ;;  %1281 = vmatpush.bf16.msra.mxu3 %v5555_v23 }
 0x140   :  { %1242 = vmatpush.bf16.msra.mxu0 %v5556_v34  ;;  %1268 = vmatpush.bf16.msra.mxu2 %v5557_v62 }
 0x143   :  { %1300 = vmatpush.bf16.msrb.mxu1 %v5558_v11  ;;  %1326 = vmatpush.bf16.msrb.mxu3 %v5559_v20 }
 0x144   :  { %1287 = vmatpush.bf16.msrb.mxu0 %v5560_v57  ;;  %1313 = vmatpush.bf16.msrb.mxu2 %v5561_v12 }
 0x147   :  { %1301 = vmatpush.bf16.msrb.mxu1 %v5562_v1  ;;  %1327 = vmatpush.bf16.msrb.mxu3 %v5563_v7 }
 0x148   :  { %1288 = vmatpush.bf16.msrb.mxu0 %v5564_v63  ;;  %1314 = vmatpush.bf16.msrb.mxu2 %v5565_v37 }
 0x14b   :  { %1302 = vmatpush.bf16.msrb.mxu1 %v5566_v31  ;;  %1328 = vmatpush.bf16.msrb.mxu3 %v5567_v33 }
 0x14c   :  { %1289 = vmatpush.bf16.msrb.mxu0 %v5568_v39  ;;  %1315 = vmatpush.bf16.msrb.mxu2 %v5569_v19 }
 0x14f   :  { %1303 = vmatpush.bf16.msrb.mxu1 %v5570_v35  ;;  %1329 = vmatpush.bf16.msrb.mxu3 %v5571_v29 }
 0x150   :  { %1290 = vmatpush.bf16.msrb.mxu0 %v5572_v13  ;;  %1316 = vmatpush.bf16.msrb.mxu2 %v5573_v45  ;;  %v5583_v13 = vld [vmem:[#allocation45_spill] sm:$0xff]  ;;  %v5584_v45 = vld [vmem:[#allocation42_spill] sm:$0xff] }
 0x153   :  { %1304 = vmatpush.bf16.msrb.mxu1 %v5574_v61  ;;  %1330 = vmatpush.bf16.msrb.mxu3 %v5575_v10  ;;  %v5585_v61 = vld [vmem:[#allocation44_spill] sm:$0xff]  ;;  %v5586_v10 = vld [vmem:[#allocation47_spill] sm:$0xff] }
 0x154   :  { %1291 = vmatpush.bf16.msrb.mxu0 %v5576_v47  ;;  %1317 = vmatpush.bf16.msrb.mxu2 %v5577_v50  ;;  %v5587_v47 = vld [vmem:[#allocation49_spill] sm:$0xff]  ;;  %v5588_v50 = vld [vmem:[#allocation46_spill] sm:$0xff] }
 0x157   :  { %1305 = vmatpush.bf16.msrb.mxu1 %v5578_v46  ;;  %1331 = vmatpush.bf16.msrb.mxu3 %v5579_v22  ;;  %v5589_v46 = vld [vmem:[#allocation48_spill] sm:$0xff] }
 0x158   :  { %1292 = vmatpush.bf16.msrb.mxu0 %v5580_v0  ;;  %1318 = vmatpush.bf16.msrb.mxu2 %v5581_v8 }
 0x15b   :  { %1306 = vmatpush.bf16.msrb.mxu1 %v5582_v59  ;;  %1332 = vmatpush.bf16.msrb.mxu3 %v5583_v13 }
 0x15c   :  { %1293 = vmatpush.bf16.msrb.mxu0 %v5584_v45  ;;  %1319 = vmatpush.bf16.msrb.mxu2 %v5585_v61 }
 0x15f   :  { %1307 = vmatpush.bf16.msrb.mxu1 %v5586_v10  ;;  %1333 = vmatpush.bf16.msrb.mxu3 %v5587_v47 }
 0x160   :  { %1294 = vmatpush.bf16.msrb.mxu0 %v5588_v50  ;;  %1320 = vmatpush.bf16.msrb.mxu2 %v5589_v46 }
 0x19e   :  { %v1058_v22 = vpop.f32.mrf.mxu1 }
 0x19f   :  { %v1045_v0 = vpop.f32.mrf.mxu0 }
 0x1a0   :  { %v1059_v29 = vadd.f32 %v1058_v22, %v1045_v0 }
 0x1a2   :  { %v1140_v8 = vadd.f32 %v1059_v29, %v4526_v18 }
 0x1a4   :  { %v3421_v59 = vmul.f32 -1.442695, %v1140_v8  ;;  %v1084_v35 = vpop.f32.mrf.mxu3 }
 0x1a5   :  { %v1071_v13 = vpop.f32.mrf.mxu2 }
 0x1a6   :  { %3841 = vpow2.f32 %v3421_v59  ;;  %v1085_v45 = vadd.f32 %v1084_v35, %v1071_v13  ;;  %v1060_v19 = vpop.f32.mrf.mxu1 }
 0x1a7   :  { %v1047_v61 = vpop.f32.mrf.mxu0 }
 0x1a8   :  { %v1141_v10 = vadd.f32 %v1085_v45, %v4533_v2 }
 0x1aa   :  { %v3422_v39 = vmul.f32 -1.442695, %v1141_v10 }
 0x1ac   :  { %v3842_v47 = vpop.eup %3841  ;;  %3843 = vpow2.f32 %v3422_v39  ;;  %v1086_v50 = vpop.f32.mrf.mxu3 }
 0x1ad   :  { %v1147_v33 = vadd.f32 1.0, %v3842_v47  ;;  %v1073_v46 = vpop.f32.mrf.mxu2 }
 0x1ae   :  { %v1110_v31 = vpop.f32.mrf.mxu1 }
 0x1af   :  { %3845 = vrcp.f32 %v1147_v33  ;;  %v1097_v0 = vpop.f32.mrf.mxu0  ;;  %v1159_v46 = vand.u32 2147483648, %v1147_v33  ;;  %vm1153_vm4 = vweird.f32 %v1147_v33 }
 0x1b0   :  { %v1111_v22 = vadd.f32 %v1110_v31, %v1097_v0  ;;  %v1157_v31 = vand.u32 2147483647, %v1147_v33 }
 0x1b2   :  { %v3844_v18 = vpop.eup %3843  ;;  %v1142_v59 = vadd.f32 %v1111_v22, %v4554_v25  ;;  %v1160_v22 = vor.u32 1.1754944e-38, %v1159_v46  ;;  %vm1158_vm6 = vcmp.eq.f32.partialorder %v1157_v31, 8.507059e+37 }
 0x1b3   :  { %v1166_v8 = vadd.f32 1.0, %v3844_v18 }
 0x1b4   :  { %v1136_v29 = vpop.f32.mrf.mxu3 }
 0x1b5   :  { %v3846_v37 = vpop.eup %3845  ;;  %3847 = vrcp.f32 %v1166_v8  ;;  %v1123_v61 = vpop.f32.mrf.mxu2  ;;  %vm1172_vm8 = vweird.f32 %v1166_v8 }
 0x1b6   :  { %v1149_v19 = vmul.f32 %v3846_v37, %v1147_v33  ;;  %v1137_v2 = vadd.f32 %v1136_v29, %v1123_v61  ;;  %v1112_v10 = vpop.f32.mrf.mxu1  ;;  %3849 = vtanh.f32 %v1142_v59  ;;  %vm1154_vm2 = vweird.f32 %v3846_v37 }
 0x1b7   :  { %v1099_v35 = vpop.f32.mrf.mxu0  ;;  %vm1155_vm5 = vmor %vm1153_vm4, %vm1154_vm2 }
 0x1b8   :  { %v1150_v39 = vsub.f32 1.0, %v1149_v19  ;;  %v1143_v47 = vadd.f32 %v1137_v2, %v4576_v14  ;;  %v1178_v14 = vand.u32 2147483648, %v1166_v8  ;;  %v1176_v35 = vand.u32 2147483647, %v1166_v8 }
 0x1ba   :  { %v1151_v50 = vmul.f32 %v3846_v37, %v1150_v39  ;;  %v3423_v13 = vmul.f32 -1.442695, %v1143_v47  ;;  %v1179_v33 = vor.u32 1.1754944e-38, %v1178_v14  ;;  %vm1177_vm10 = vcmp.eq.f32.partialorder %v1176_v35, 8.507059e+37  ;;  %v5591_v35 = vld [vmem:[#allocation22_spill] sm:$0xff] }
 0x1bb   :  { %v3848_v45 = vpop.eup %3847 }
 0x1bc   :  { %v1168_v0 = vmul.f32 %v3848_v45, %v1166_v8  ;;  %v1152_v18 = vadd.f32 %v3846_v37, %v1151_v50  ;;  %3851 = vpow2.f32 %v3423_v13  ;;  %v1138_v25 = vpop.f32.mrf.mxu3  ;;  %v3850_v19 = vpop.eup %3849  ;;  %vm1173_vm7 = vweird.f32 %v3848_v45 }
 0x1bd   :  { %v1125_v29 = vpop.f32.mrf.mxu2  ;;  %vm1174_vm9 = vmor %vm1172_vm8, %vm1173_vm7 }
 0x1be   :  { %v1169_v61 = vsub.f32 1.0, %v1168_v0  ;;  %v1156_v10 = vsel %vm1155_vm5, %v3846_v37, %v1152_v18 }
 0x1bf   :  { %v1161_v2 = vsel %vm1158_vm6, %v1160_v22, %v1156_v10 }
 0x1c0   :  { %v1170_v59 = vmul.f32 %v3848_v45, %v1169_v61  ;;  %v1203_v39 = vmul.f32 %v3850_v19, %v1161_v2 }
 0x1c2   :  { %v3852_v47 = vpop.eup %3851  ;;  %v1171_v63 = vadd.f32 %v3848_v45, %v1170_v59 }
 0x1c3   :  { %v1186_v50 = vadd.f32 1.0, %v3852_v47  ;;  %v5593_v47 = vld [vmem:[#allocation27_spill] sm:$0xff] }
 0x1c4   :  { %v1175_v13 = vsel %vm1174_vm9, %v3848_v45, %v1171_v63 }
 0x1c5   :  { %v1180_v46 = vsel %vm1177_vm10, %v1179_v33, %v1175_v13  ;;  %3853 = vrcp.f32 %v1186_v50  ;;  %v1198_v22 = vand.u32 2147483648, %v1186_v50  ;;  %v1196_v8 = vand.u32 2147483647, %v1186_v50  ;;  %v5594_v33 = vld [vmem:[#allocation29_spill] sm:$0xff]  ;;  %v5596_v13 = vld [vmem:[#allocation28_spill] sm:$0xff] }
 0x1c6   :  { %v1202_v37 = vmul.f32 %v1180_v46, %v4664_v6  ;;  %vm1192_vm12 = vweird.f32 %v1186_v50  ;;  %v5597_v46 = vld [vmem:[#allocation31_spill] sm:$0xff] }
 0x1c7   :  { %v1199_v63 = vor.u32 1.1754944e-38, %v1198_v22  ;;  %vm1197_vm14 = vcmp.eq.f32.partialorder %v1196_v8, 8.507059e+37  ;;  %v5602_v22 = vld [vmem:[#allocation37_spill] sm:$0xff]  ;;  %v5604_v8 = vld [vmem:[#allocation36_spill] sm:$0xff] }
 0x1c8   :  { %v4751_v31 = vadd.f32 %v1203_v39, %v1202_v37  ;;  %v5592_v39 = vld [vmem:[#allocation24_spill] sm:$0xff]  ;;  %v5598_v37 = vld [vmem:[#allocation33_spill] sm:$0xff] }
 0x1ca   :  { %3855 = vtanh.f32 %v4751_v31 }
 0x1cb   :  { %v3854_v0 = vpop.eup %3853 }
 0x1cc   :  { %v1188_v18 = vmul.f32 %v3854_v0, %v1186_v50  ;;  %vm1193_vm11 = vweird.f32 %v3854_v0  ;;  %v5595_v50 = vld [vmem:[#allocation26_spill] sm:$0xff] }
 0x1cd   :  { %vm1194_vm13 = vmor %vm1192_vm12, %vm1193_vm11 }
 0x1ce   :  { %v1189_v25 = vsub.f32 1.0, %v1188_v18  ;;  %v5600_v18 = vld [vmem:[#allocation32_spill] sm:$0xff] }
 0x1d0   :  { %v1190_v29 = vmul.f32 %v3854_v0, %v1189_v25  ;;  %v3856_v10 = vpop.eup %3855  ;;  %v5601_v25 = vld [vmem:[#allocation35_spill] sm:$0xff] }
 0x1d2   :  { %v1191_v61 = vadd.f32 %v3854_v0, %v1190_v29  ;;  %v5603_v29 = vld [vmem:[#allocation34_spill] sm:$0xff] }
 0x1d4   :  { %v1195_v45 = vsel %vm1194_vm13, %v3854_v0, %v1191_v61  ;;  %v5599_v0 = vld [vmem:[#allocation30_spill] sm:$0xff]  ;;  %v5605_v61 = vld [vmem:[#allocation39_spill] sm:$0xff] }
 0x1d5   :  { %v1200_v19 = vsel %vm1197_vm14, %v1199_v63, %v1195_v45  ;;  %v5606_v63 = vld [vmem:[#allocation41_spill] sm:$0xff]  ;;  %v5607_v45 = vld [vmem:[#allocation38_spill] sm:$0xff]  ;;  %vm2409_vm14 = vcmask 1041408  }
 0x1d6   :  { %v4754_v6 = vmul.f32 %v3856_v10, %v1200_v19  ;;  %v5608_v10 = vld [vmem:[#allocation40_spill] sm:$0xff]  ;;  %v5609_v19 = vld [vmem:[#allocation43_spill] sm:$0xff] }
 0x1d8   :  { %5590 = vst [vmem:[#allocation14_spill] sm:$0xff] %v4754_v6  ;;  %v3428_v14 = vpack.c.bf16 %v4754_v6, %v4754_v6  ;;  %v1211_v2 = vsel %vm430_vm1, %v4754_v6, %v5549_v53 }
 0x1d9   :  { %v1213_v59 = vpack.c.bf16 %v1211_v2, %v1211_v2  ;;  %v5611_v2 = vld [vmem:[#allocation42_spill] sm:$0xff] }
 0x1da   :  { %3429 = vmatmul.msk.bf16.vlgmr.msra.gmra.mxu1 %vm4291_vm3, %v3428_v14  ;;  %3434 = vmatmul.msk.bf16.vlgmr.msra.gmra.mxu3 %vm4291_vm3, %v3428_v14 }
 0x1db   :  { %1243 = vmatmul.bf16.vlgmr.msra.gmra.mxu0 %v1213_v59  ;;  %1269 = vmatmul.bf16.vlgmr.msra.gmra.mxu2 %v1213_v59 }
 0x1dc   :  { %1447 = vmatpush.bf16.msra.mxu1 %v4175_v43  ;;  %1473 = vmatpush.bf16.msra.mxu3 %v4179_v48 }
 0x1dd   :  { %1434 = vmatpush.bf16.msra.mxu0 %v4173_v42  ;;  %1460 = vmatpush.bf16.msra.mxu2 %v4177_v44 }
 0x1e0   :  { %1448 = vmatpush.bf16.msra.mxu1 %v4186_v55  ;;  %1474 = vmatpush.bf16.msra.mxu3 %v4191_v60 }
 0x1e1   :  { %1435 = vmatpush.bf16.msra.mxu0 %v4182_v54  ;;  %1461 = vmatpush.bf16.msra.mxu2 %v4188_v56 }
 0x1e4   :  { %1449 = vmatpush.bf16.msra.mxu1 %v4200_v4  ;;  %1475 = vmatpush.bf16.msra.mxu3 %v4205_v9 }
 0x1e5   :  { %1436 = vmatpush.bf16.msra.mxu0 %v4196_v3  ;;  %1462 = vmatpush.bf16.msra.mxu2 %v4202_v5 }
 0x1e8   :  { %1450 = vmatpush.bf16.msra.mxu1 %v4218_v16  ;;  %1476 = vmatpush.bf16.msra.mxu3 %v4223_v21 }
 0x1e9   :  { %1437 = vmatpush.bf16.msra.mxu0 %v4214_v15  ;;  %1463 = vmatpush.bf16.msra.mxu2 %v4220_v17 }
 0x1ea   :  { %3439 = vmatmul.msk.bf16.vlgmr.msrb.gmra.mxu1 %vm4291_vm3, %v3428_v14  ;;  %3444 = vmatmul.msk.bf16.vlgmr.msrb.gmra.mxu3 %vm4291_vm3, %v3428_v14  ;;  %v5610_v14 = vld [vmem:[#allocation45_spill] sm:$0xff] }
 0x1eb   :  { %1295 = vmatmul.bf16.vlgmr.msrb.gmra.mxu0 %v1213_v59  ;;  %1321 = vmatmul.bf16.vlgmr.msrb.gmra.mxu2 %v1213_v59  ;;  %v5612_v59 = vld [vmem:[#allocation44_spill] sm:$0xff] }
 0x1ec   :  { %1451 = vmatpush.bf16.msra.mxu1 %v4230_v27  ;;  %1477 = vmatpush.bf16.msra.mxu3 %v4235_v32 }
 0x1ed   :  { %1438 = vmatpush.bf16.msra.mxu0 %v4226_v26  ;;  %1464 = vmatpush.bf16.msra.mxu2 %v4232_v28 }
 0x1f0   :  { %1452 = vmatpush.bf16.msra.mxu1 %v4242_v40  ;;  %1478 = vmatpush.bf16.msra.mxu3 %v4247_v49 }
 0x1f1   :  { %1439 = vmatpush.bf16.msra.mxu0 %v4238_v38  ;;  %1465 = vmatpush.bf16.msra.mxu2 %v4244_v41 }
 0x1f4   :  { %1453 = vmatpush.bf16.msra.mxu1 %v5550_v52  ;;  %1479 = vmatpush.bf16.msra.mxu3 %v5551_v58 }
 0x1f5   :  { %1440 = vmatpush.bf16.msra.mxu0 %v5552_v24  ;;  %1466 = vmatpush.bf16.msra.mxu2 %v5553_v36 }
 0x1f8   :  { %1454 = vmatpush.bf16.msra.mxu1 %v5554_v30  ;;  %1480 = vmatpush.bf16.msra.mxu3 %v5555_v23 }
 0x1f9   :  { %1441 = vmatpush.bf16.msra.mxu0 %v5556_v34  ;;  %1467 = vmatpush.bf16.msra.mxu2 %v5557_v62 }
 0x1fc   :  { %1499 = vmatpush.bf16.msrb.mxu1 %v5558_v11  ;;  %1525 = vmatpush.bf16.msrb.mxu3 %v5559_v20 }
 0x1fd   :  { %1486 = vmatpush.bf16.msrb.mxu0 %v5560_v57  ;;  %1512 = vmatpush.bf16.msrb.mxu2 %v5561_v12 }
 0x200   :  { %1500 = vmatpush.bf16.msrb.mxu1 %v5562_v1  ;;  %1526 = vmatpush.bf16.msrb.mxu3 %v5563_v7 }
 0x201   :  { %1487 = vmatpush.bf16.msrb.mxu0 %v5591_v35  ;;  %1513 = vmatpush.bf16.msrb.mxu2 %v5592_v39 }
 0x204   :  { %1501 = vmatpush.bf16.msrb.mxu1 %v5593_v47  ;;  %1527 = vmatpush.bf16.msrb.mxu3 %v5594_v33 }
 0x205   :  { %1488 = vmatpush.bf16.msrb.mxu0 %v5595_v50  ;;  %1514 = vmatpush.bf16.msrb.mxu2 %v5596_v13 }
 0x208   :  { %1502 = vmatpush.bf16.msrb.mxu1 %v5597_v46  ;;  %1528 = vmatpush.bf16.msrb.mxu3 %v5598_v37  ;;  %v5618_v46 = vld [vmem:[#allocation51_spill] sm:$0xff] }
 0x209   :  { %1489 = vmatpush.bf16.msrb.mxu0 %v5599_v0  ;;  %1515 = vmatpush.bf16.msrb.mxu2 %v5600_v18 }
 0x20c   :  { %1503 = vmatpush.bf16.msrb.mxu1 %v5601_v25  ;;  %1529 = vmatpush.bf16.msrb.mxu3 %v5602_v22  ;;  %v5613_v22 = vld [vmem:[#allocation47_spill] sm:$0xff] }
 0x20d   :  { %1490 = vmatpush.bf16.msrb.mxu0 %v5603_v29  ;;  %1516 = vmatpush.bf16.msrb.mxu2 %v5604_v8  ;;  %v5614_v29 = vld [vmem:[#allocation49_spill] sm:$0xff]  ;;  %v5615_v8 = vld [vmem:[#allocation46_spill] sm:$0xff] }
 0x210   :  { %1504 = vmatpush.bf16.msrb.mxu1 %v5605_v61  ;;  %1530 = vmatpush.bf16.msrb.mxu3 %v5606_v63  ;;  %v5616_v61 = vld [vmem:[#allocation48_spill] sm:$0xff] }
 0x211   :  { %1491 = vmatpush.bf16.msrb.mxu0 %v5607_v45  ;;  %1517 = vmatpush.bf16.msrb.mxu2 %v5608_v10  ;;  %v5617_v10 = vld [vmem:[#allocation50_spill] sm:$0xff] }
 0x214   :  { %1505 = vmatpush.bf16.msrb.mxu1 %v5609_v19  ;;  %1531 = vmatpush.bf16.msrb.mxu3 %v5610_v14 }
 0x215   :  { %1492 = vmatpush.bf16.msrb.mxu0 %v5611_v2  ;;  %1518 = vmatpush.bf16.msrb.mxu2 %v5612_v59 }
 0x218   :  { %1506 = vmatpush.bf16.msrb.mxu1 %v5613_v22  ;;  %1532 = vmatpush.bf16.msrb.mxu3 %v5614_v29 }
 0x219   :  { %1493 = vmatpush.bf16.msrb.mxu0 %v5615_v8  ;;  %1519 = vmatpush.bf16.msrb.mxu2 %v5616_v61 }
 0x257   :  { %v1257_v63 = vpop.f32.mrf.mxu1 }
 0x258   :  { %v1244_v45 = vpop.f32.mrf.mxu0 }
 0x259   :  { %v1258_v25 = vadd.f32 %v1257_v63, %v1244_v45 }
 0x25b   :  { %v1339_v18 = vadd.f32 %v1258_v25, %v5617_v10 }
 0x25d   :  { %v3445_v19 = vmul.f32 -1.442695, %v1339_v18  ;;  %v1283_v0 = vpop.f32.mrf.mxu3 }
 0x25e   :  { %v1270_v14 = vpop.f32.mrf.mxu2 }
 0x25f   :  { %3857 = vpow2.f32 %v3445_v19  ;;  %v1284_v2 = vadd.f32 %v1283_v0, %v1270_v14  ;;  %v1259_v37 = vpop.f32.mrf.mxu1  ;;  %v5619_v0 = vld [vmem:[#allocation54_spill] sm:$0xff] }
 0x260   :  { %v1246_v59 = vpop.f32.mrf.mxu0 }
 0x261   :  { %v1340_v22 = vadd.f32 %v1284_v2, %v5618_v46 }
 0x263   :  { %v3446_v13 = vmul.f32 -1.442695, %v1340_v22 }
 0x265   :  { %v3858_v29 = vpop.eup %3857  ;;  %3859 = vpow2.f32 %v3446_v13  ;;  %v1285_v8 = vpop.f32.mrf.mxu3 }
 0x266   :  { %v1346_v50 = vadd.f32 1.0, %v3858_v29  ;;  %v1272_v61 = vpop.f32.mrf.mxu2  ;;  %v5620_v8 = vld [vmem:[#allocation59_spill] sm:$0xff] }
 0x267   :  { %v1309_v33 = vpop.f32.mrf.mxu1 }
 0x268   :  { %3861 = vrcp.f32 %v1346_v50  ;;  %v1296_v63 = vpop.f32.mrf.mxu0  ;;  %v1358_v61 = vand.u32 2147483648, %v1346_v50  ;;  %vm1352_vm2 = vweird.f32 %v1346_v50 }
 0x269   :  { %v1310_v45 = vadd.f32 %v1309_v33, %v1296_v63  ;;  %v1356_v33 = vand.u32 2147483647, %v1346_v50 }
 0x26b   :  { %v3860_v25 = vpop.eup %3859  ;;  %v1341_v37 = vadd.f32 %v1310_v45, %v5619_v0  ;;  %v1359_v0 = vor.u32 1.1754944e-38, %v1358_v61  ;;  %vm1357_vm5 = vcmp.eq.f32.partialorder %v1356_v33, 8.507059e+37 }
 0x26c   :  { %v1365_v18 = vadd.f32 1.0, %v3860_v25 }
 0x26d   :  { %v1335_v10 = vpop.f32.mrf.mxu3 }
 0x26e   :  { %v3862_v47 = vpop.eup %3861  ;;  %3863 = vrcp.f32 %v1365_v18  ;;  %v1322_v19 = vpop.f32.mrf.mxu2  ;;  %vm1371_vm7 = vweird.f32 %v1365_v18 }
 0x26f   :  { %v1348_v14 = vmul.f32 %v3862_v47, %v1346_v50  ;;  %v1336_v46 = vadd.f32 %v1335_v10, %v1322_v19  ;;  %v1311_v22 = vpop.f32.mrf.mxu1  ;;  %3865 = vtanh.f32 %v1341_v37  ;;  %vm1353_vm15 = vweird.f32 %v3862_v47 }
 0x270   :  { %v1298_v2 = vpop.f32.mrf.mxu0  ;;  %vm1354_vm4 = vmor %vm1352_vm2, %vm1353_vm15 }
 0x271   :  { %v1349_v13 = vsub.f32 1.0, %v1348_v14  ;;  %v1342_v29 = vadd.f32 %v1336_v46, %v5620_v8  ;;  %v1377_v46 = vand.u32 2147483648, %v1365_v18 }
 0x273   :  { %v1350_v59 = vmul.f32 %v3862_v47, %v1349_v13  ;;  %v3447_v63 = vmul.f32 -1.442695, %v1342_v29  ;;  %v1375_v13 = vand.u32 2147483647, %v1365_v18  ;;  %v1378_v50 = vor.u32 1.1754944e-38, %v1377_v46 }
 0x274   :  { %v3864_v25 = vpop.eup %3863 }
 0x275   :  { %v1367_v39 = vmul.f32 %v3864_v25, %v1365_v18  ;;  %v1351_v35 = vadd.f32 %v3862_v47, %v1350_v59  ;;  %3867 = vpow2.f32 %v3447_v63  ;;  %v1337_v45 = vpop.f32.mrf.mxu3  ;;  %v3866_v14 = vpop.eup %3865  ;;  %vm1372_vm6 = vweird.f32 %v3864_v25 }
 0x276   :  { %v1324_v10 = vpop.f32.mrf.mxu2  ;;  %vm1373_vm8 = vmor %vm1371_vm7, %vm1372_vm6  ;;  %vm1376_vm9 = vcmp.eq.f32.partialorder %v1375_v13, 8.507059e+37 }
 0x277   :  { %v1368_v19 = vsub.f32 1.0, %v1367_v39  ;;  %v1355_v22 = vsel %vm1354_vm4, %v3862_v47, %v1351_v35 }
 0x278   :  { %v1360_v2 = vsel %vm1357_vm5, %v1359_v0, %v1355_v22 }
 0x279   :  { %v1369_v37 = vmul.f32 %v3864_v25, %v1368_v19  ;;  %v1402_v8 = vmul.f32 %v3866_v14, %v1360_v2 }
 0x27b   :  { %v3868_v29 = vpop.eup %3867  ;;  %v1370_v7 = vadd.f32 %v3864_v25, %v1369_v37 }
 0x27c   :  { %v1385_v59 = vadd.f32 1.0, %v3868_v29  ;;  %v5622_v29 = vld [vmem:[#allocation74_spill] sm:$0xff] }
 0x27d   :  { %v1374_v63 = vsel %vm1373_vm8, %v3864_v25, %v1370_v7 }
 0x27e   :  { %v1379_v61 = vsel %vm1376_vm9, %v1378_v50, %v1374_v63  ;;  %3869 = vrcp.f32 %v1385_v59  ;;  %v1397_v0 = vand.u32 2147483648, %v1385_v59  ;;  %v1395_v18 = vand.u32 2147483647, %v1385_v59  ;;  %v5623_v63 = vld [vmem:[#allocation25_spill] sm:$0xff] }
 0x27f   :  { %v1401_v35 = vmul.f32 %v1379_v61, %v4751_v31  ;;  %vm1391_vm11 = vweird.f32 %v1385_v59  ;;  %v2393_v31 = vrot.slane %v4754_v6, 7  ;;  %v5624_v61 = vld [vmem:[#allocation22_spill] sm:$0xff] }
 0x280   :  { %v1398_v7 = vor.u32 1.1754944e-38, %v1397_v0  ;;  %vm1396_vm13 = vcmp.eq.f32.partialorder %v1395_v18, 8.507059e+37  ;;  %v5629_v0 = vld [vmem:[#allocation28_spill] sm:$0xff]  ;;  %v5631_v18 = vld [vmem:[#allocation33_spill] sm:$0xff]  ;;  %v5644_v6 = vld [vmem:[#allocation42_spill] sm:$0xff] }
 0x281   :  { %v4838_v39 = vadd.f32 %v1402_v8, %v1401_v35  ;;  %v2408_v50 = vsel %vm430_vm1, %v5622_v29, %v2393_v31  ;;  %v5625_v35 = vld [vmem:[#allocation24_spill] sm:$0xff]  ;;  %v5636_v31 = vld [vmem:[#allocation34_spill] sm:$0xff]  ;;  %v5643_v29 = vld [vmem:[#allocation45_spill] sm:$0xff] }
 0x283   :  { %3871 = vtanh.f32 %v4838_v39 }
 0x284   :  { %v3870_v47 = vpop.eup %3869 }
 0x285   :  { %v1387_v33 = vmul.f32 %v3870_v47, %v1385_v59  ;;  %vm1392_vm10 = vweird.f32 %v3870_v47 }
 0x286   :  { %vm1393_vm12 = vmor %vm1391_vm11, %vm1392_vm10 }
 0x287   :  { %v1388_v45 = vsub.f32 1.0, %v1387_v33  ;;  %v5627_v33 = vld [vmem:[#allocation29_spill] sm:$0xff] }
 0x289   :  { %v1389_v10 = vmul.f32 %v3870_v47, %v1388_v45  ;;  %v3872_v22 = vpop.eup %3871  ;;  %v5628_v45 = vld [vmem:[#allocation26_spill] sm:$0xff] }
 0x28b   :  { %v1390_v19 = vadd.f32 %v3870_v47, %v1389_v10  ;;  %v5630_v10 = vld [vmem:[#allocation31_spill] sm:$0xff] }
 0x28d   :  { %v1394_v25 = vsel %vm1393_vm12, %v3870_v47, %v1390_v19  ;;  %v5626_v47 = vld [vmem:[#allocation27_spill] sm:$0xff]  ;;  %v5632_v19 = vld [vmem:[#allocation30_spill] sm:$0xff] }
 0x28e   :  { %v1399_v14 = vsel %vm1396_vm13, %v1398_v7, %v1394_v25  ;;  %v5633_v7 = vld [vmem:[#allocation32_spill] sm:$0xff]  ;;  %v5634_v25 = vld [vmem:[#allocation35_spill] sm:$0xff] }
 0x28f   :  { %v4842_v46 = vmul.f32 %v3872_v22, %v1399_v14  ;;  %v5635_v22 = vld [vmem:[#allocation37_spill] sm:$0xff]  ;;  %v5637_v14 = vld [vmem:[#allocation36_spill] sm:$0xff] }
 0x291   :  { %5621 = vst [vmem:[#allocation10_spill] sm:$0xff] %v4842_v46  ;;  %v3452_v2 = vpack.c.bf16 %v4842_v46, %v4842_v46  ;;  %v2395_v37 = vrot.slane %v4842_v46, 6  ;;  %v1410_v13 = vsel %vm430_vm1, %v4842_v46, %v5549_v53  ;;  %v5645_v46 = vld [vmem:[#allocation44_spill] sm:$0xff] }
 0x292   :  { %v1412_v8 = vpack.c.bf16 %v1410_v13, %v1410_v13  ;;  %v5640_v13 = vld [vmem:[#allocation38_spill] sm:$0xff] }
 0x293   :  { %3453 = vmatmul.msk.bf16.vlgmr.msra.gmra.mxu1 %vm4291_vm3, %v3452_v2  ;;  %3458 = vmatmul.msk.bf16.vlgmr.msra.gmra.mxu3 %vm4291_vm3, %v3452_v2  ;;  %v4857_v59 = vsel %vm2409_vm14, %v2408_v50, %v2395_v37  ;;  %v5639_v37 = vld [vmem:[#allocation41_spill] sm:$0xff]  ;;  %v5642_v50 = vld [vmem:[#allocation43_spill] sm:$0xff] }
 0x294   :  { %1442 = vmatmul.bf16.vlgmr.msra.gmra.mxu0 %v1412_v8  ;;  %1468 = vmatmul.bf16.vlgmr.msra.gmra.mxu2 %v1412_v8 }
 0x295   :  { %1646 = vmatpush.bf16.msra.mxu1 %v4175_v43  ;;  %1672 = vmatpush.bf16.msra.mxu3 %v4179_v48 }
 0x296   :  { %1633 = vmatpush.bf16.msra.mxu0 %v4173_v42  ;;  %1659 = vmatpush.bf16.msra.mxu2 %v4177_v44 }
 0x299   :  { %1647 = vmatpush.bf16.msra.mxu1 %v4186_v55  ;;  %1673 = vmatpush.bf16.msra.mxu3 %v4191_v60 }
 0x29a   :  { %1634 = vmatpush.bf16.msra.mxu0 %v4182_v54  ;;  %1660 = vmatpush.bf16.msra.mxu2 %v4188_v56 }
 0x29d   :  { %1648 = vmatpush.bf16.msra.mxu1 %v4200_v4  ;;  %1674 = vmatpush.bf16.msra.mxu3 %v4205_v9 }
 0x29e   :  { %1635 = vmatpush.bf16.msra.mxu0 %v4196_v3  ;;  %1661 = vmatpush.bf16.msra.mxu2 %v4202_v5 }
 0x2a1   :  { %1649 = vmatpush.bf16.msra.mxu1 %v4218_v16  ;;  %1675 = vmatpush.bf16.msra.mxu3 %v4223_v21 }
 0x2a2   :  { %1636 = vmatpush.bf16.msra.mxu0 %v4214_v15  ;;  %1662 = vmatpush.bf16.msra.mxu2 %v4220_v17 }
 0x2a3   :  { %3463 = vmatmul.msk.bf16.vlgmr.msrb.gmra.mxu1 %vm4291_vm3, %v3452_v2  ;;  %3468 = vmatmul.msk.bf16.vlgmr.msrb.gmra.mxu3 %vm4291_vm3, %v3452_v2  ;;  %v5638_v2 = vld [vmem:[#allocation39_spill] sm:$0xff] }
 0x2a4   :  { %1494 = vmatmul.bf16.vlgmr.msrb.gmra.mxu0 %v1412_v8  ;;  %1520 = vmatmul.bf16.vlgmr.msrb.gmra.mxu2 %v1412_v8  ;;  %v5641_v8 = vld [vmem:[#allocation40_spill] sm:$0xff] }
 0x2a5   :  { %1650 = vmatpush.bf16.msra.mxu1 %v4230_v27  ;;  %1676 = vmatpush.bf16.msra.mxu3 %v4235_v32 }
 0x2a6   :  { %1637 = vmatpush.bf16.msra.mxu0 %v4226_v26  ;;  %1663 = vmatpush.bf16.msra.mxu2 %v4232_v28 }
 0x2a9   :  { %1651 = vmatpush.bf16.msra.mxu1 %v4242_v40  ;;  %1677 = vmatpush.bf16.msra.mxu3 %v4247_v49 }
 0x2aa   :  { %1638 = vmatpush.bf16.msra.mxu0 %v4238_v38  ;;  %1664 = vmatpush.bf16.msra.mxu2 %v4244_v41 }
 0x2ad   :  { %1652 = vmatpush.bf16.msra.mxu1 %v5550_v52  ;;  %1678 = vmatpush.bf16.msra.mxu3 %v5551_v58 }
 0x2ae   :  { %1639 = vmatpush.bf16.msra.mxu0 %v5552_v24  ;;  %1665 = vmatpush.bf16.msra.mxu2 %v5553_v36 }
 0x2b1   :  { %1653 = vmatpush.bf16.msra.mxu1 %v5554_v30  ;;  %1679 = vmatpush.bf16.msra.mxu3 %v5555_v23 }
 0x2b2   :  { %1640 = vmatpush.bf16.msra.mxu0 %v5556_v34  ;;  %1666 = vmatpush.bf16.msra.mxu2 %v5557_v62 }
 0x2b5   :  { %1698 = vmatpush.bf16.msrb.mxu1 %v5558_v11  ;;  %1724 = vmatpush.bf16.msrb.mxu3 %v5559_v20 }
 0x2b6   :  { %1685 = vmatpush.bf16.msrb.mxu0 %v5560_v57  ;;  %1711 = vmatpush.bf16.msrb.mxu2 %v5561_v12 }
 0x2b9   :  { %1699 = vmatpush.bf16.msrb.mxu1 %v5562_v1  ;;  %1725 = vmatpush.bf16.msrb.mxu3 %v5623_v63 }
 0x2ba   :  { %1686 = vmatpush.bf16.msrb.mxu0 %v5624_v61  ;;  %1712 = vmatpush.bf16.msrb.mxu2 %v5625_v35 }
 0x2bd   :  { %1700 = vmatpush.bf16.msrb.mxu1 %v5626_v47  ;;  %1726 = vmatpush.bf16.msrb.mxu3 %v5627_v33 }
 0x2be   :  { %1687 = vmatpush.bf16.msrb.mxu0 %v5628_v45  ;;  %1713 = vmatpush.bf16.msrb.mxu2 %v5629_v0 }
 0x2c1   :  { %1701 = vmatpush.bf16.msrb.mxu1 %v5630_v10  ;;  %1727 = vmatpush.bf16.msrb.mxu3 %v5631_v18  ;;  %v5651_v10 = vld [vmem:[#allocation53_spill] sm:$0xff] }
 0x2c2   :  { %1688 = vmatpush.bf16.msrb.mxu0 %v5632_v19  ;;  %1714 = vmatpush.bf16.msrb.mxu2 %v5633_v7 }
 0x2c5   :  { %1702 = vmatpush.bf16.msrb.mxu1 %v5634_v25  ;;  %1728 = vmatpush.bf16.msrb.mxu3 %v5635_v22  ;;  %v5646_v22 = vld [vmem:[#allocation47_spill] sm:$0xff] }
 0x2c6   :  { %1689 = vmatpush.bf16.msrb.mxu0 %v5636_v31  ;;  %1715 = vmatpush.bf16.msrb.mxu2 %v5637_v14  ;;  %v5647_v31 = vld [vmem:[#allocation49_spill] sm:$0xff]  ;;  %v5648_v14 = vld [vmem:[#allocation46_spill] sm:$0xff] }
 0x2c9   :  { %1703 = vmatpush.bf16.msrb.mxu1 %v5638_v2  ;;  %1729 = vmatpush.bf16.msrb.mxu3 %v5639_v37  ;;  %v5649_v2 = vld [vmem:[#allocation48_spill] sm:$0xff] }
 0x2ca   :  { %1690 = vmatpush.bf16.msrb.mxu0 %v5640_v13  ;;  %1716 = vmatpush.bf16.msrb.mxu2 %v5641_v8  ;;  %v5650_v8 = vld [vmem:[#allocation52_spill] sm:$0xff] }
 0x2cd   :  { %1704 = vmatpush.bf16.msrb.mxu1 %v5642_v50  ;;  %1730 = vmatpush.bf16.msrb.mxu3 %v5643_v29 }
 0x2ce   :  { %1691 = vmatpush.bf16.msrb.mxu0 %v5644_v6  ;;  %1717 = vmatpush.bf16.msrb.mxu2 %v5645_v46 }
 0x2d1   :  { %1705 = vmatpush.bf16.msrb.mxu1 %v5646_v22  ;;  %1731 = vmatpush.bf16.msrb.mxu3 %v5647_v31 }
 0x2d2   :  { %1692 = vmatpush.bf16.msrb.mxu0 %v5648_v14  ;;  %1718 = vmatpush.bf16.msrb.mxu2 %v5649_v2 }
 0x310   :  { %v1456_v37 = vpop.f32.mrf.mxu1 }
 0x311   :  { %v1443_v13 = vpop.f32.mrf.mxu0 }
 0x312   :  { %v1457_v25 = vadd.f32 %v1456_v37, %v1443_v13 }
 0x314   :  { %v1538_v7 = vadd.f32 %v1457_v25, %v5650_v8 }
 0x316   :  { %v3469_v50 = vmul.f32 -1.442695, %v1538_v7  ;;  %v1482_v19 = vpop.f32.mrf.mxu3 }
 0x317   :  { %v1469_v29 = vpop.f32.mrf.mxu2 }
 0x318   :  { %3873 = vpow2.f32 %v3469_v50  ;;  %v1483_v6 = vadd.f32 %v1482_v19, %v1469_v29  ;;  %v1458_v18 = vpop.f32.mrf.mxu1  ;;  %v5652_v29 = vld [vmem:[#allocation55_spill] sm:$0xff] }
 0x319   :  { %v1445_v46 = vpop.f32.mrf.mxu0 }
 0x31a   :  { %v1539_v22 = vadd.f32 %v1483_v6, %v5651_v10 }
 0x31c   :  { %v3470_v0 = vmul.f32 -1.442695, %v1539_v22 }
 0x31e   :  { %v3874_v31 = vpop.eup %3873  ;;  %3875 = vpow2.f32 %v3470_v0  ;;  %v1484_v14 = vpop.f32.mrf.mxu3 }
 0x31f   :  { %v1545_v45 = vadd.f32 1.0, %v3874_v31  ;;  %v1471_v2 = vpop.f32.mrf.mxu2  ;;  %v5653_v14 = vld [vmem:[#allocation60_spill] sm:$0xff] }
 0x320   :  { %v1508_v33 = vpop.f32.mrf.mxu1 }
 0x321   :  { %3877 = vrcp.f32 %v1545_v45  ;;  %v1495_v37 = vpop.f32.mrf.mxu0  ;;  %v1557_v2 = vand.u32 2147483648, %v1545_v45  ;;  %vm1551_vm2 = vweird.f32 %v1545_v45 }
 0x322   :  { %v1509_v13 = vadd.f32 %v1508_v33, %v1495_v37  ;;  %v1555_v33 = vand.u32 2147483647, %v1545_v45 }
 0x324   :  { %v3876_v25 = vpop.eup %3875  ;;  %v1540_v18 = vadd.f32 %v1509_v13, %v5652_v29  ;;  %v1558_v29 = vor.u32 1.1754944e-38, %v1557_v2  ;;  %vm1556_vm5 = vcmp.eq.f32.partialorder %v1555_v33, 8.507059e+37 }
 0x325   :  { %v1564_v7 = vadd.f32 1.0, %v3876_v25 }
 0x326   :  { %v1534_v8 = vpop.f32.mrf.mxu3 }
 0x327   :  { %v3878_v47 = vpop.eup %3877  ;;  %3879 = vrcp.f32 %v1564_v7  ;;  %v1521_v46 = vpop.f32.mrf.mxu2  ;;  %vm1570_vm7 = vweird.f32 %v1564_v7 }
 0x328   :  { %v1547_v19 = vmul.f32 %v3878_v47, %v1545_v45  ;;  %v1535_v6 = vadd.f32 %v1534_v8, %v1521_v46  ;;  %v1510_v10 = vpop.f32.mrf.mxu1  ;;  %3881 = vtanh.f32 %v1540_v18  ;;  %vm1552_vm15 = vweird.f32 %v3878_v47 }
 0x329   :  { %v1497_v22 = vpop.f32.mrf.mxu0  ;;  %vm1553_vm4 = vmor %vm1551_vm2, %vm1552_vm15  ;;  %vm2411_vm15 = vcmask 1042432  }
 0x32a   :  { %v1548_v0 = vsub.f32 1.0, %v1547_v19  ;;  %v1541_v31 = vadd.f32 %v1535_v6, %v5653_v14  ;;  %v1576_v6 = vand.u32 2147483648, %v1564_v7 }
 0x32c   :  { %v1549_v50 = vmul.f32 %v3878_v47, %v1548_v0  ;;  %v3471_v37 = vmul.f32 -1.442695, %v1541_v31  ;;  %v1574_v0 = vand.u32 2147483647, %v1564_v7  ;;  %v1577_v45 = vor.u32 1.1754944e-38, %v1576_v6 }
 0x32d   :  { %v3880_v25 = vpop.eup %3879 }
 0x32e   :  { %v1566_v35 = vmul.f32 %v3880_v25, %v1564_v7  ;;  %v1550_v61 = vadd.f32 %v3878_v47, %v1549_v50  ;;  %3883 = vpow2.f32 %v3471_v37  ;;  %v1536_v13 = vpop.f32.mrf.mxu3  ;;  %v3882_v19 = vpop.eup %3881  ;;  %vm1571_vm6 = vweird.f32 %v3880_v25 }
 0x32f   :  { %v1523_v8 = vpop.f32.mrf.mxu2  ;;  %vm1572_vm8 = vmor %vm1570_vm7, %vm1571_vm6  ;;  %vm1575_vm9 = vcmp.eq.f32.partialorder %v1574_v0, 8.507059e+37 }
 0x330   :  { %v1567_v46 = vsub.f32 1.0, %v1566_v35  ;;  %v1554_v10 = vsel %vm1553_vm4, %v3878_v47, %v1550_v61 }
 0x331   :  { %v1559_v22 = vsel %vm1556_vm5, %v1558_v29, %v1554_v10 }
 0x332   :  { %v1568_v18 = vmul.f32 %v3880_v25, %v1567_v46  ;;  %v1601_v14 = vmul.f32 %v3882_v19, %v1559_v22 }
 0x334   :  { %v3884_v31 = vpop.eup %3883  ;;  %v1569_v63 = vadd.f32 %v3880_v25, %v1568_v18 }
 0x335   :  { %v1584_v50 = vadd.f32 1.0, %v3884_v31  ;;  %v5656_v31 = vld [vmem:[#allocation22_spill] sm:$0xff] }
 0x336   :  { %v1573_v37 = vsel %vm1572_vm8, %v3880_v25, %v1569_v63 }
 0x337   :  { %v1578_v2 = vsel %vm1575_vm9, %v1577_v45, %v1573_v37  ;;  %3885 = vrcp.f32 %v1584_v50  ;;  %v1596_v29 = vand.u32 2147483648, %v1584_v50  ;;  %v1594_v7 = vand.u32 2147483647, %v1584_v50  ;;  %v5657_v45 = vld [vmem:[#allocation24_spill] sm:$0xff]  ;;  %v5659_v37 = vld [vmem:[#allocation29_spill] sm:$0xff] }
 0x338   :  { %v1600_v61 = vmul.f32 %v1578_v2, %v4838_v39  ;;  %vm1590_vm11 = vweird.f32 %v1584_v50  ;;  %v5660_v2 = vld [vmem:[#allocation26_spill] sm:$0xff] }
 0x339   :  { %v1597_v63 = vor.u32 1.1754944e-38, %v1596_v29  ;;  %vm1595_vm13 = vcmp.eq.f32.partialorder %v1594_v7, 8.507059e+37  ;;  %v5665_v29 = vld [vmem:[#allocation32_spill] sm:$0xff]  ;;  %v5667_v7 = vld [vmem:[#allocation37_spill] sm:$0xff] }
 0x33a   :  { %v4932_v35 = vadd.f32 %v1601_v14, %v1600_v61  ;;  %v5661_v61 = vld [vmem:[#allocation28_spill] sm:$0xff] }
 0x33c   :  { %3887 = vtanh.f32 %v4932_v35 }
 0x33d   :  { %v3886_v47 = vpop.eup %3885 }
 0x33e   :  { %v1586_v33 = vmul.f32 %v3886_v47, %v1584_v50  ;;  %vm1591_vm10 = vweird.f32 %v3886_v47  ;;  %v5658_v50 = vld [vmem:[#allocation27_spill] sm:$0xff] }
 0x33f   :  { %vm1592_vm12 = vmor %vm1590_vm11, %vm1591_vm10 }
 0x340   :  { %v1587_v13 = vsub.f32 1.0, %v1586_v33  ;;  %v5663_v33 = vld [vmem:[#allocation33_spill] sm:$0xff] }
 0x342   :  { %v1588_v8 = vmul.f32 %v3886_v47, %v1587_v13  ;;  %v3888_v10 = vpop.eup %3887  ;;  %v5664_v13 = vld [vmem:[#allocation30_spill] sm:$0xff] }
 0x344   :  { %v1589_v46 = vadd.f32 %v3886_v47, %v1588_v8  ;;  %v5666_v8 = vld [vmem:[#allocation35_spill] sm:$0xff] }
 0x346   :  { %v1593_v25 = vsel %vm1592_vm12, %v3886_v47, %v1589_v46  ;;  %v5662_v47 = vld [vmem:[#allocation31_spill] sm:$0xff]  ;;  %v5668_v46 = vld [vmem:[#allocation34_spill] sm:$0xff] }
 0x347   :  { %v1598_v19 = vsel %vm1595_vm13, %v1597_v63, %v1593_v25  ;;  %v5669_v63 = vld [vmem:[#allocation36_spill] sm:$0xff]  ;;  %v5670_v25 = vld [vmem:[#allocation39_spill] sm:$0xff] }
 0x348   :  { %v4935_v39 = vmul.f32 %v3888_v10, %v1598_v19  ;;  %v5671_v10 = vld [vmem:[#allocation41_spill] sm:$0xff]  ;;  %v5672_v19 = vld [vmem:[#allocation38_spill] sm:$0xff] }
 0x34a   :  { %5654 = vst [vmem:[#allocation12_spill] sm:$0xff] %v4935_v39  ;;  %v3476_v6 = vpack.c.bf16 %v4935_v39, %v4935_v39  ;;  %v5450_v22 = vrot.slane %v4935_v39, 5  ;;  %v1609_v18 = vsel %vm430_vm1, %v4935_v39, %v5549_v53  ;;  %v5677_v39 = vld [vmem:[#allocation44_spill] sm:$0xff] }
 0x34b   :  { %v1611_v0 = vpack.c.bf16 %v1609_v18, %v1609_v18  ;;  %v5674_v18 = vld [vmem:[#allocation43_spill] sm:$0xff] }
 0x34c   :  { %3477 = vmatmul.msk.bf16.vlgmr.msra.gmra.mxu1 %vm4291_vm3, %v3476_v6  ;;  %v4949_v14 = vsel %vm2411_vm15, %v4857_v59, %v5450_v22  ;;  %3482 = vmatmul.msk.bf16.vlgmr.msra.gmra.mxu3 %vm4291_vm3, %v3476_v6  ;;  %v5655_v59 = vld [vmem:[#allocation25_spill] sm:$0xff]  ;;  %v5676_v22 = vld [vmem:[#allocation42_spill] sm:$0xff] }
 0x34d   :  { %1641 = vmatmul.bf16.vlgmr.msra.gmra.mxu0 %v1611_v0  ;;  %1667 = vmatmul.bf16.vlgmr.msra.gmra.mxu2 %v1611_v0 }
 0x34e   :  { %1845 = vmatpush.bf16.msra.mxu1 %v4175_v43  ;;  %1871 = vmatpush.bf16.msra.mxu3 %v4179_v48 }
 0x34f   :  { %1832 = vmatpush.bf16.msra.mxu0 %v4173_v42  ;;  %1858 = vmatpush.bf16.msra.mxu2 %v4177_v44 }
 0x352   :  { %1846 = vmatpush.bf16.msra.mxu1 %v4186_v55  ;;  %1872 = vmatpush.bf16.msra.mxu3 %v4191_v60 }
 0x353   :  { %1833 = vmatpush.bf16.msra.mxu0 %v4182_v54  ;;  %1859 = vmatpush.bf16.msra.mxu2 %v4188_v56 }
 0x356   :  { %1847 = vmatpush.bf16.msra.mxu1 %v4200_v4  ;;  %1873 = vmatpush.bf16.msra.mxu3 %v4205_v9 }
 0x357   :  { %1834 = vmatpush.bf16.msra.mxu0 %v4196_v3  ;;  %1860 = vmatpush.bf16.msra.mxu2 %v4202_v5 }
 0x35a   :  { %1848 = vmatpush.bf16.msra.mxu1 %v4218_v16  ;;  %1874 = vmatpush.bf16.msra.mxu3 %v4223_v21 }
 0x35b   :  { %1835 = vmatpush.bf16.msra.mxu0 %v4214_v15  ;;  %1861 = vmatpush.bf16.msra.mxu2 %v4220_v17 }
 0x35c   :  { %3487 = vmatmul.msk.bf16.vlgmr.msrb.gmra.mxu1 %vm4291_vm3, %v3476_v6  ;;  %3492 = vmatmul.msk.bf16.vlgmr.msrb.gmra.mxu3 %vm4291_vm3, %v3476_v6  ;;  %v5673_v6 = vld [vmem:[#allocation40_spill] sm:$0xff] }
 0x35d   :  { %1693 = vmatmul.bf16.vlgmr.msrb.gmra.mxu0 %v1611_v0  ;;  %1719 = vmatmul.bf16.vlgmr.msrb.gmra.mxu2 %v1611_v0  ;;  %v5675_v0 = vld [vmem:[#allocation45_spill] sm:$0xff] }
 0x35e   :  { %1849 = vmatpush.bf16.msra.mxu1 %v4230_v27  ;;  %1875 = vmatpush.bf16.msra.mxu3 %v4235_v32 }
 0x35f   :  { %1836 = vmatpush.bf16.msra.mxu0 %v4226_v26  ;;  %1862 = vmatpush.bf16.msra.mxu2 %v4232_v28 }
 0x362   :  { %1850 = vmatpush.bf16.msra.mxu1 %v4242_v40  ;;  %1876 = vmatpush.bf16.msra.mxu3 %v4247_v49 }
 0x363   :  { %1837 = vmatpush.bf16.msra.mxu0 %v4238_v38  ;;  %1863 = vmatpush.bf16.msra.mxu2 %v4244_v41 }
 0x366   :  { %1851 = vmatpush.bf16.msra.mxu1 %v5550_v52  ;;  %1877 = vmatpush.bf16.msra.mxu3 %v5551_v58 }
 0x367   :  { %1838 = vmatpush.bf16.msra.mxu0 %v5552_v24  ;;  %1864 = vmatpush.bf16.msra.mxu2 %v5553_v36 }
 0x36a   :  { %1852 = vmatpush.bf16.msra.mxu1 %v5554_v30  ;;  %1878 = vmatpush.bf16.msra.mxu3 %v5555_v23 }
 0x36b   :  { %1839 = vmatpush.bf16.msra.mxu0 %v5556_v34  ;;  %1865 = vmatpush.bf16.msra.mxu2 %v5557_v62 }
 0x36e   :  { %1897 = vmatpush.bf16.msrb.mxu1 %v5558_v11  ;;  %1923 = vmatpush.bf16.msrb.mxu3 %v5559_v20 }
 0x36f   :  { %1884 = vmatpush.bf16.msrb.mxu0 %v5560_v57  ;;  %1910 = vmatpush.bf16.msrb.mxu2 %v5561_v12 }
 0x372   :  { %1898 = vmatpush.bf16.msrb.mxu1 %v5562_v1  ;;  %1924 = vmatpush.bf16.msrb.mxu3 %v5655_v59 }
 0x373   :  { %1885 = vmatpush.bf16.msrb.mxu0 %v5656_v31  ;;  %1911 = vmatpush.bf16.msrb.mxu2 %v5657_v45 }
 0x376   :  { %1899 = vmatpush.bf16.msrb.mxu1 %v5658_v50  ;;  %1925 = vmatpush.bf16.msrb.mxu3 %v5659_v37 }
 0x377   :  { %1886 = vmatpush.bf16.msrb.mxu0 %v5660_v2  ;;  %1912 = vmatpush.bf16.msrb.mxu2 %v5661_v61 }
 0x37a   :  { %1900 = vmatpush.bf16.msrb.mxu1 %v5662_v47  ;;  %1926 = vmatpush.bf16.msrb.mxu3 %v5663_v33  ;;  %v5683_v47 = vld [vmem:[#allocation57_spill] sm:$0xff] }
 0x37b   :  { %1887 = vmatpush.bf16.msrb.mxu0 %v5664_v13  ;;  %1913 = vmatpush.bf16.msrb.mxu2 %v5665_v29 }
 0x37e   :  { %1901 = vmatpush.bf16.msrb.mxu1 %v5666_v8  ;;  %1927 = vmatpush.bf16.msrb.mxu3 %v5667_v7  ;;  %v5678_v7 = vld [vmem:[#allocation47_spill] sm:$0xff] }
 0x37f   :  { %1888 = vmatpush.bf16.msrb.mxu0 %v5668_v46  ;;  %1914 = vmatpush.bf16.msrb.mxu2 %v5669_v63  ;;  %v5679_v46 = vld [vmem:[#allocation49_spill] sm:$0xff]  ;;  %v5680_v63 = vld [vmem:[#allocation46_spill] sm:$0xff] }
 0x382   :  { %1902 = vmatpush.bf16.msrb.mxu1 %v5670_v25  ;;  %1928 = vmatpush.bf16.msrb.mxu3 %v5671_v10  ;;  %v5681_v25 = vld [vmem:[#allocation48_spill] sm:$0xff] }
 0x383   :  { %1889 = vmatpush.bf16.msrb.mxu0 %v5672_v19  ;;  %1915 = vmatpush.bf16.msrb.mxu2 %v5673_v6  ;;  %v5682_v6 = vld [vmem:[#allocation56_spill] sm:$0xff] }
 0x386   :  { %1903 = vmatpush.bf16.msrb.mxu1 %v5674_v18  ;;  %1929 = vmatpush.bf16.msrb.mxu3 %v5675_v0 }
 0x387   :  { %1890 = vmatpush.bf16.msrb.mxu0 %v5676_v22  ;;  %1916 = vmatpush.bf16.msrb.mxu2 %v5677_v39 }
 0x38a   :  { %1904 = vmatpush.bf16.msrb.mxu1 %v5678_v7  ;;  %1930 = vmatpush.bf16.msrb.mxu3 %v5679_v46 }
 0x38b   :  { %1891 = vmatpush.bf16.msrb.mxu0 %v5680_v63  ;;  %1917 = vmatpush.bf16.msrb.mxu2 %v5681_v25 }
 0x3c9   :  { %v1655_v10 = vpop.f32.mrf.mxu1 }
 0x3ca   :  { %v1642_v19 = vpop.f32.mrf.mxu0 }
 0x3cb   :  { %v1656_v8 = vadd.f32 %v1655_v10, %v1642_v19 }
 0x3cd   :  { %v1737_v29 = vadd.f32 %v1656_v8, %v5682_v6 }
 0x3cf   :  { %v3493_v18 = vmul.f32 -1.442695, %v1737_v29  ;;  %v1681_v13 = vpop.f32.mrf.mxu3 }
 0x3d0   :  { %v1668_v0 = vpop.f32.mrf.mxu2 }
 0x3d1   :  { %3889 = vpow2.f32 %v3493_v18  ;;  %v1682_v22 = vadd.f32 %v1681_v13, %v1668_v0  ;;  %v1657_v33 = vpop.f32.mrf.mxu1  ;;  %v5684_v13 = vld [vmem:[#allocation58_spill] sm:$0xff] }
 0x3d2   :  { %v1644_v39 = vpop.f32.mrf.mxu0 }
 0x3d3   :  { %v1738_v7 = vadd.f32 %v1682_v22, %v5683_v47 }
 0x3d5   :  { %v3494_v61 = vmul.f32 -1.442695, %v1738_v7 }
 0x3d7   :  { %v3890_v46 = vpop.eup %3889  ;;  %3891 = vpow2.f32 %v3494_v61  ;;  %v1683_v63 = vpop.f32.mrf.mxu3 }
 0x3d8   :  { %v1744_v2 = vadd.f32 1.0, %v3890_v46  ;;  %v1670_v25 = vpop.f32.mrf.mxu2  ;;  %v5685_v63 = vld [vmem:[#allocation61_spill] sm:$0xff] }
 0x3d9   :  { %v1707_v37 = vpop.f32.mrf.mxu1 }
 0x3da   :  { %3893 = vrcp.f32 %v1744_v2  ;;  %v1694_v10 = vpop.f32.mrf.mxu0  ;;  %v1756_v25 = vand.u32 2147483648, %v1744_v2  ;;  %vm1750_vm4 = vweird.f32 %v1744_v2 }
 0x3db   :  { %v1708_v19 = vadd.f32 %v1707_v37, %v1694_v10  ;;  %v1754_v37 = vand.u32 2147483647, %v1744_v2 }
 0x3dd   :  { %v3892_v8 = vpop.eup %3891  ;;  %v1739_v33 = vadd.f32 %v1708_v19, %v5684_v13  ;;  %v1757_v13 = vor.u32 1.1754944e-38, %v1756_v25  ;;  %vm1755_vm6 = vcmp.eq.f32.partialorder %v1754_v37, 8.507059e+37 }
 0x3de   :  { %v1763_v29 = vadd.f32 1.0, %v3892_v8 }
 0x3df   :  { %v1733_v6 = vpop.f32.mrf.mxu3 }
 0x3e0   :  { %v3894_v50 = vpop.eup %3893  ;;  %3895 = vrcp.f32 %v1763_v29  ;;  %v1720_v39 = vpop.f32.mrf.mxu2  ;;  %vm1769_vm8 = vweird.f32 %v1763_v29 }
 0x3e1   :  { %v1746_v18 = vmul.f32 %v3894_v50, %v1744_v2  ;;  %v1734_v22 = vadd.f32 %v1733_v6, %v1720_v39  ;;  %v1709_v47 = vpop.f32.mrf.mxu1  ;;  %3897 = vtanh.f32 %v1739_v33  ;;  %vm1751_vm2 = vweird.f32 %v3894_v50 }
 0x3e2   :  { %v1696_v7 = vpop.f32.mrf.mxu0  ;;  %vm1752_vm5 = vmor %vm1750_vm4, %vm1751_vm2  ;;  %vm2413_vm4 = vcmask 1043456  }
 0x3e3   :  { %v1747_v61 = vsub.f32 1.0, %v1746_v18  ;;  %v1740_v46 = vadd.f32 %v1734_v22, %v5685_v63  ;;  %v1775_v22 = vand.u32 2147483648, %v1763_v29 }
 0x3e5   :  { %v1748_v0 = vmul.f32 %v3894_v50, %v1747_v61  ;;  %v3495_v10 = vmul.f32 -1.442695, %v1740_v46  ;;  %v1773_v61 = vand.u32 2147483647, %v1763_v29  ;;  %v1776_v2 = vor.u32 1.1754944e-38, %v1775_v22 }
 0x3e6   :  { %v3896_v8 = vpop.eup %3895 }
 0x3e7   :  { %v1765_v45 = vmul.f32 %v3896_v8, %v1763_v29  ;;  %v1749_v31 = vadd.f32 %v3894_v50, %v1748_v0  ;;  %3899 = vpow2.f32 %v3495_v10  ;;  %v1735_v19 = vpop.f32.mrf.mxu3  ;;  %v3898_v18 = vpop.eup %3897  ;;  %vm1770_vm7 = vweird.f32 %v3896_v8 }
 0x3e8   :  { %v1722_v6 = vpop.f32.mrf.mxu2  ;;  %vm1771_vm9 = vmor %vm1769_vm8, %vm1770_vm7  ;;  %vm1774_vm10 = vcmp.eq.f32.partialorder %v1773_v61, 8.507059e+37 }
 0x3e9   :  { %v1766_v39 = vsub.f32 1.0, %v1765_v45  ;;  %v1753_v47 = vsel %vm1752_vm5, %v3894_v50, %v1749_v31 }
 0x3ea   :  { %v1758_v7 = vsel %vm1755_vm6, %v1757_v13, %v1753_v47 }
 0x3eb   :  { %v1767_v33 = vmul.f32 %v3896_v8, %v1766_v39  ;;  %v1800_v63 = vmul.f32 %v3898_v18, %v1758_v7 }
 0x3ed   :  { %v3900_v46 = vpop.eup %3899  ;;  %v1768_v59 = vadd.f32 %v3896_v8, %v1767_v33 }
 0x3ee   :  { %v1783_v0 = vadd.f32 1.0, %v3900_v46  ;;  %v5688_v46 = vld [vmem:[#allocation22_spill] sm:$0xff] }
 0x3ef   :  { %v1772_v10 = vsel %vm1771_vm9, %v3896_v8, %v1768_v59 }
 0x3f0   :  { %v1777_v25 = vsel %vm1774_vm10, %v1776_v2, %v1772_v10  ;;  %3901 = vrcp.f32 %v1783_v0  ;;  %v1795_v13 = vand.u32 2147483648, %v1783_v0  ;;  %v1793_v29 = vand.u32 2147483647, %v1783_v0  ;;  %v5689_v2 = vld [vmem:[#allocation24_spill] sm:$0xff]  ;;  %v5691_v10 = vld [vmem:[#allocation29_spill] sm:$0xff] }
 0x3f1   :  { %v1799_v31 = vmul.f32 %v1777_v25, %v4932_v35  ;;  %vm1789_vm12 = vweird.f32 %v1783_v0  ;;  %v5692_v25 = vld [vmem:[#allocation26_spill] sm:$0xff] }
 0x3f2   :  { %v1796_v59 = vor.u32 1.1754944e-38, %v1795_v13  ;;  %vm1794_vm2 = vcmp.eq.f32.partialorder %v1793_v29, 8.507059e+37  ;;  %v5697_v13 = vld [vmem:[#allocation32_spill] sm:$0xff]  ;;  %v5699_v29 = vld [vmem:[#allocation37_spill] sm:$0xff] }
 0x3f3   :  { %v5026_v45 = vadd.f32 %v1800_v63, %v1799_v31  ;;  %v5693_v31 = vld [vmem:[#allocation28_spill] sm:$0xff] }
 0x3f5   :  { %3903 = vtanh.f32 %v5026_v45 }
 0x3f6   :  { %v3902_v50 = vpop.eup %3901 }
 0x3f7   :  { %v1785_v37 = vmul.f32 %v3902_v50, %v1783_v0  ;;  %vm1790_vm11 = vweird.f32 %v3902_v50  ;;  %v5690_v0 = vld [vmem:[#allocation27_spill] sm:$0xff] }
 0x3f8   :  { %vm1791_vm13 = vmor %vm1789_vm12, %vm1790_vm11 }
 0x3f9   :  { %v1786_v19 = vsub.f32 1.0, %v1785_v37  ;;  %v5695_v37 = vld [vmem:[#allocation33_spill] sm:$0xff] }
 0x3fb   :  { %v1787_v6 = vmul.f32 %v3902_v50, %v1786_v19  ;;  %v3904_v47 = vpop.eup %3903  ;;  %v5696_v19 = vld [vmem:[#allocation30_spill] sm:$0xff] }
 0x3fd   :  { %v1788_v39 = vadd.f32 %v3902_v50, %v1787_v6  ;;  %v5698_v6 = vld [vmem:[#allocation35_spill] sm:$0xff] }
 0x3ff   :  { %v1792_v8 = vsel %vm1791_vm13, %v3902_v50, %v1788_v39  ;;  %v5694_v50 = vld [vmem:[#allocation31_spill] sm:$0xff]  ;;  %v5700_v39 = vld [vmem:[#allocation34_spill] sm:$0xff] }
 0x400   :  { %v1797_v18 = vsel %vm1794_vm2, %v1796_v59, %v1792_v8  ;;  %v5701_v59 = vld [vmem:[#allocation36_spill] sm:$0xff]  ;;  %v5702_v8 = vld [vmem:[#allocation39_spill] sm:$0xff] }
 0x401   :  { %v5029_v35 = vmul.f32 %v3904_v47, %v1797_v18  ;;  %v5703_v47 = vld [vmem:[#allocation41_spill] sm:$0xff]  ;;  %v5704_v18 = vld [vmem:[#allocation38_spill] sm:$0xff] }
 0x403   :  { %5686 = vst [vmem:[#allocation9_spill] sm:$0xff] %v5029_v35  ;;  %v2399_v22 = vrot.slane %v5029_v35, 4  ;;  %v3500_v7 = vpack.c.bf16 %v5029_v35, %v5029_v35  ;;  %v1808_v33 = vsel %vm430_vm1, %v5029_v35, %v5549_v53  ;;  %v5709_v35 = vld [vmem:[#allocation44_spill] sm:$0xff] }
 0x404   :  { %v1810_v61 = vpack.c.bf16 %v1808_v33, %v1808_v33  ;;  %v5707_v33 = vld [vmem:[#allocation45_spill] sm:$0xff] }
 0x405   :  { %3501 = vmatmul.msk.bf16.vlgmr.msra.gmra.mxu1 %vm4291_vm3, %v3500_v7  ;;  %3506 = vmatmul.msk.bf16.vlgmr.msra.gmra.mxu3 %vm4291_vm3, %v3500_v7  ;;  %v5043_v63 = vsel %vm2413_vm4, %v4949_v14, %v2399_v22  ;;  %v5687_v14 = vld [vmem:[#allocation25_spill] sm:$0xff]  ;;  %v5705_v22 = vld [vmem:[#allocation40_spill] sm:$0xff] }
 0x406   :  { %1840 = vmatmul.bf16.vlgmr.msra.gmra.mxu0 %v1810_v61  ;;  %1866 = vmatmul.bf16.vlgmr.msra.gmra.mxu2 %v1810_v61 }
 0x407   :  { %2036 = vmatpush.bf16.msra.mxu1 %v4175_v43  ;;  %2062 = vmatpush.bf16.msra.mxu3 %v4179_v48 }
 0x408   :  { %2023 = vmatpush.bf16.msra.mxu0 %v4173_v42  ;;  %2049 = vmatpush.bf16.msra.mxu2 %v4177_v44 }
 0x40b   :  { %2037 = vmatpush.bf16.msra.mxu1 %v4186_v55  ;;  %2063 = vmatpush.bf16.msra.mxu3 %v4191_v60 }
 0x40c   :  { %2024 = vmatpush.bf16.msra.mxu0 %v4182_v54  ;;  %2050 = vmatpush.bf16.msra.mxu2 %v4188_v56 }
 0x40f   :  { %2038 = vmatpush.bf16.msra.mxu1 %v4200_v4  ;;  %2064 = vmatpush.bf16.msra.mxu3 %v4205_v9 }
 0x410   :  { %2025 = vmatpush.bf16.msra.mxu0 %v4196_v3  ;;  %2051 = vmatpush.bf16.msra.mxu2 %v4202_v5 }
 0x413   :  { %2039 = vmatpush.bf16.msra.mxu1 %v4218_v16  ;;  %2065 = vmatpush.bf16.msra.mxu3 %v4223_v21 }
 0x414   :  { %2026 = vmatpush.bf16.msra.mxu0 %v4214_v15  ;;  %2052 = vmatpush.bf16.msra.mxu2 %v4220_v17 }
 0x415   :  { %3511 = vmatmul.msk.bf16.vlgmr.msrb.gmra.mxu1 %vm4291_vm3, %v3500_v7  ;;  %3516 = vmatmul.msk.bf16.vlgmr.msrb.gmra.mxu3 %vm4291_vm3, %v3500_v7  ;;  %v5706_v7 = vld [vmem:[#allocation43_spill] sm:$0xff] }
 0x416   :  { %1892 = vmatmul.bf16.vlgmr.msrb.gmra.mxu0 %v1810_v61  ;;  %1918 = vmatmul.bf16.vlgmr.msrb.gmra.mxu2 %v1810_v61  ;;  %v5708_v61 = vld [vmem:[#allocation42_spill] sm:$0xff] }
 0x417   :  { %2040 = vmatpush.bf16.msra.mxu1 %v4230_v27  ;;  %2066 = vmatpush.bf16.msra.mxu3 %v4235_v32 }
 0x418   :  { %2027 = vmatpush.bf16.msra.mxu0 %v4226_v26  ;;  %2053 = vmatpush.bf16.msra.mxu2 %v4232_v28 }
 0x41b   :  { %2041 = vmatpush.bf16.msra.mxu1 %v4242_v40  ;;  %2067 = vmatpush.bf16.msra.mxu3 %v4247_v49 }
 0x41c   :  { %2028 = vmatpush.bf16.msra.mxu0 %v4238_v38  ;;  %2054 = vmatpush.bf16.msra.mxu2 %v4244_v41 }
 0x41f   :  { %2042 = vmatpush.bf16.msra.mxu1 %v5550_v52  ;;  %2068 = vmatpush.bf16.msra.mxu3 %v5551_v58 }
 0x420   :  { %2029 = vmatpush.bf16.msra.mxu0 %v5552_v24  ;;  %2055 = vmatpush.bf16.msra.mxu2 %v5553_v36 }
 0x423   :  { %2043 = vmatpush.bf16.msra.mxu1 %v5554_v30  ;;  %2069 = vmatpush.bf16.msra.mxu3 %v5555_v23 }
 0x424   :  { %2030 = vmatpush.bf16.msra.mxu0 %v5556_v34  ;;  %2056 = vmatpush.bf16.msra.mxu2 %v5557_v62 }
 0x427   :  { %2088 = vmatpush.bf16.msrb.mxu1 %v5558_v11  ;;  %2114 = vmatpush.bf16.msrb.mxu3 %v5559_v20 }
 0x428   :  { %2075 = vmatpush.bf16.msrb.mxu0 %v5560_v57  ;;  %2101 = vmatpush.bf16.msrb.mxu2 %v5561_v12 }
 0x42b   :  { %2089 = vmatpush.bf16.msrb.mxu1 %v5562_v1  ;;  %2115 = vmatpush.bf16.msrb.mxu3 %v5687_v14 }
 0x42c   :  { %2076 = vmatpush.bf16.msrb.mxu0 %v5688_v46  ;;  %2102 = vmatpush.bf16.msrb.mxu2 %v5689_v2 }
 0x42f   :  { %2090 = vmatpush.bf16.msrb.mxu1 %v5690_v0  ;;  %2116 = vmatpush.bf16.msrb.mxu3 %v5691_v10 }
 0x430   :  { %2077 = vmatpush.bf16.msrb.mxu0 %v5692_v25  ;;  %2103 = vmatpush.bf16.msrb.mxu2 %v5693_v31 }
 0x433   :  { %2091 = vmatpush.bf16.msrb.mxu1 %v5694_v50  ;;  %2117 = vmatpush.bf16.msrb.mxu3 %v5695_v37  ;;  %v5715_v50 = vld [vmem:[#allocation65_spill] sm:$0xff] }
 0x434   :  { %2078 = vmatpush.bf16.msrb.mxu0 %v5696_v19  ;;  %2104 = vmatpush.bf16.msrb.mxu2 %v5697_v13 }
 0x437   :  { %2092 = vmatpush.bf16.msrb.mxu1 %v5698_v6  ;;  %2118 = vmatpush.bf16.msrb.mxu3 %v5699_v29  ;;  %v5710_v29 = vld [vmem:[#allocation47_spill] sm:$0xff] }
 0x438   :  { %2079 = vmatpush.bf16.msrb.mxu0 %v5700_v39  ;;  %2105 = vmatpush.bf16.msrb.mxu2 %v5701_v59  ;;  %v5711_v39 = vld [vmem:[#allocation49_spill] sm:$0xff]  ;;  %v5712_v59 = vld [vmem:[#allocation46_spill] sm:$0xff] }
 0x43b   :  { %2093 = vmatpush.bf16.msrb.mxu1 %v5702_v8  ;;  %2119 = vmatpush.bf16.msrb.mxu3 %v5703_v47  ;;  %v5713_v8 = vld [vmem:[#allocation48_spill] sm:$0xff] }
 0x43c   :  { %2080 = vmatpush.bf16.msrb.mxu0 %v5704_v18  ;;  %2106 = vmatpush.bf16.msrb.mxu2 %v5705_v22  ;;  %v5714_v22 = vld [vmem:[#allocation64_spill] sm:$0xff] }
 0x43f   :  { %2094 = vmatpush.bf16.msrb.mxu1 %v5706_v7  ;;  %2120 = vmatpush.bf16.msrb.mxu3 %v5707_v33 }
 0x440   :  { %2081 = vmatpush.bf16.msrb.mxu0 %v5708_v61  ;;  %2107 = vmatpush.bf16.msrb.mxu2 %v5709_v35 }
 0x443   :  { %2095 = vmatpush.bf16.msrb.mxu1 %v5710_v29  ;;  %2121 = vmatpush.bf16.msrb.mxu3 %v5711_v39 }
 0x444   :  { %2082 = vmatpush.bf16.msrb.mxu0 %v5712_v59  ;;  %2108 = vmatpush.bf16.msrb.mxu2 %v5713_v8 }
 0x482   :  { %v1854_v47 = vpop.f32.mrf.mxu1 }
 0x483   :  { %v1841_v18 = vpop.f32.mrf.mxu0 }
 0x484   :  { %v1855_v6 = vadd.f32 %v1854_v47, %v1841_v18 }
 0x486   :  { %v1936_v13 = vadd.f32 %v1855_v6, %v5714_v22 }
 0x488   :  { %v3517_v7 = vmul.f32 -1.442695, %v1936_v13  ;;  %v1880_v19 = vpop.f32.mrf.mxu3 }
 0x489   :  { %v1867_v33 = vpop.f32.mrf.mxu2 }
 0x48a   :  { %3905 = vpow2.f32 %v3517_v7  ;;  %v1881_v61 = vadd.f32 %v1880_v19, %v1867_v33  ;;  %v1856_v37 = vpop.f32.mrf.mxu1  ;;  %v5716_v19 = vld [vmem:[#allocation66_spill] sm:$0xff] }
 0x48b   :  { %v1843_v35 = vpop.f32.mrf.mxu0 }
 0x48c   :  { %v1937_v29 = vadd.f32 %v1881_v61, %v5715_v50 }
 0x48e   :  { %v3518_v31 = vmul.f32 -1.442695, %v1937_v29 }
 0x490   :  { %v3906_v39 = vpop.eup %3905  ;;  %3907 = vpow2.f32 %v3518_v31  ;;  %v1882_v59 = vpop.f32.mrf.mxu3 }
 0x491   :  { %v1943_v25 = vadd.f32 1.0, %v3906_v39  ;;  %v1869_v8 = vpop.f32.mrf.mxu2  ;;  %v5717_v59 = vld [vmem:[#allocation68_spill] sm:$0xff] }
 0x492   :  { %v1906_v10 = vpop.f32.mrf.mxu1 }
 0x493   :  { %3909 = vrcp.f32 %v1943_v25  ;;  %v1893_v47 = vpop.f32.mrf.mxu0  ;;  %v1955_v8 = vand.u32 2147483648, %v1943_v25  ;;  %vm1949_vm6 = vweird.f32 %v1943_v25 }
 0x494   :  { %v1907_v18 = vadd.f32 %v1906_v10, %v1893_v47  ;;  %v1953_v10 = vand.u32 2147483647, %v1943_v25 }
 0x496   :  { %v3908_v6 = vpop.eup %3907  ;;  %v1938_v37 = vadd.f32 %v1907_v18, %v5716_v19  ;;  %v1956_v19 = vor.u32 1.1754944e-38, %v1955_v8  ;;  %vm1954_vm8 = vcmp.eq.f32.partialorder %v1953_v10, 8.507059e+37 }
 0x497   :  { %v1962_v13 = vadd.f32 1.0, %v3908_v6 }
 0x498   :  { %v1932_v22 = vpop.f32.mrf.mxu3 }
 0x499   :  { %v3910_v0 = vpop.eup %3909  ;;  %3911 = vrcp.f32 %v1962_v13  ;;  %v1919_v35 = vpop.f32.mrf.mxu2  ;;  %vm1968_vm10 = vweird.f32 %v1962_v13 }
 0x49a   :  { %v1945_v7 = vmul.f32 %v3910_v0, %v1943_v25  ;;  %v1933_v50 = vadd.f32 %v1932_v22, %v1919_v35  ;;  %v1908_v29 = vpop.f32.mrf.mxu1  ;;  %3913 = vtanh.f32 %v1938_v37  ;;  %vm1950_vm5 = vweird.f32 %v3910_v0 }
 0x49b   :  { %v1895_v33 = vpop.f32.mrf.mxu0  ;;  %vm1951_vm7 = vmor %vm1949_vm6, %vm1950_vm5 }
 0x49c   :  { %v1946_v31 = vsub.f32 1.0, %v1945_v7  ;;  %v1939_v39 = vadd.f32 %v1933_v50, %v5717_v59  ;;  %v1974_v50 = vand.u32 2147483648, %v1962_v13 }
 0x49e   :  { %v1947_v61 = vmul.f32 %v3910_v0, %v1946_v31  ;;  %v3519_v47 = vmul.f32 -1.442695, %v1939_v39  ;;  %v1972_v31 = vand.u32 2147483647, %v1962_v13  ;;  %v1975_v25 = vor.u32 1.1754944e-38, %v1974_v50 }
 0x49f   :  { %v3912_v6 = vpop.eup %3911 }
 0x4a0   :  { %v1964_v2 = vmul.f32 %v3912_v6, %v1962_v13  ;;  %v1948_v46 = vadd.f32 %v3910_v0, %v1947_v61  ;;  %3915 = vpow2.f32 %v3519_v47  ;;  %v1934_v18 = vpop.f32.mrf.mxu3  ;;  %v3914_v7 = vpop.eup %3913  ;;  %vm1969_vm9 = vweird.f32 %v3912_v6 }
 0x4a1   :  { %v1921_v22 = vpop.f32.mrf.mxu2  ;;  %vm1970_vm11 = vmor %vm1968_vm10, %vm1969_vm9  ;;  %vm1973_vm12 = vcmp.eq.f32.partialorder %v1972_v31, 8.507059e+37 }
 0x4a2   :  { %v1965_v35 = vsub.f32 1.0, %v1964_v2  ;;  %v1952_v29 = vsel %vm1951_vm7, %v3910_v0, %v1948_v46  ;;  %vm2415_vm7 = vcmask 1044480  }
 0x4a3   :  { %v1957_v33 = vsel %vm1954_vm8, %v1956_v19, %v1952_v29 }
 0x4a4   :  { %v1966_v37 = vmul.f32 %v3912_v6, %v1965_v35  ;;  %v1999_v59 = vmul.f32 %v3914_v7, %v1957_v33 }
 0x4a6   :  { %v3916_v39 = vpop.eup %3915  ;;  %v1967_v14 = vadd.f32 %v3912_v6, %v1966_v37 }
 0x4a7   :  { %v1982_v61 = vadd.f32 1.0, %v3916_v39  ;;  %v5746_v39 = vld [vmem:[#allocation63_spill] sm:$0xff] }
 0x4a8   :  { %v1971_v47 = vsel %vm1970_vm11, %v3912_v6, %v1967_v14 }
 0x4a9   :  { %v1976_v8 = vsel %vm1973_vm12, %v1975_v25, %v1971_v47  ;;  %3917 = vrcp.f32 %v1982_v61  ;;  %v1994_v19 = vand.u32 2147483648, %v1982_v61  ;;  %v1992_v13 = vand.u32 2147483647, %v1982_v61 }
 0x4aa   :  { %v1998_v46 = vmul.f32 %v1976_v8, %v5026_v45  ;;  %vm1988_vm2 = vweird.f32 %v1982_v61 }
 0x4ab   :  { %v1995_v14 = vor.u32 1.1754944e-38, %v1994_v19  ;;  %vm1993_vm6 = vcmp.eq.f32.partialorder %v1992_v13, 8.507059e+37 }
 0x4ac   :  { %v5118_v2 = vadd.f32 %v1999_v59, %v1998_v46 }
 0x4ae   :  { %3919 = vtanh.f32 %v5118_v2 }
 0x4af   :  { %v3918_v0 = vpop.eup %3917 }
 0x4b0   :  { %v1984_v10 = vmul.f32 %v3918_v0, %v1982_v61  ;;  %vm1989_vm13 = vweird.f32 %v3918_v0 }
 0x4b1   :  { %vm1990_vm5 = vmor %vm1988_vm2, %vm1989_vm13 }
 0x4b2   :  { %v1985_v18 = vsub.f32 1.0, %v1984_v10 }
 0x4b4   :  { %v1986_v22 = vmul.f32 %v3918_v0, %v1985_v18  ;;  %v3920_v29 = vpop.eup %3919 }
 0x4b6   :  { %v1987_v35 = vadd.f32 %v3918_v0, %v1986_v22 }
 0x4b8   :  { %v1991_v6 = vsel %vm1990_vm5, %v3918_v0, %v1987_v35 }
 0x4b9   :  { %v1996_v7 = vsel %vm1993_vm6, %v1995_v14, %v1991_v6  ;;  %v5747_v6 = vld [vmem:[#allocation67_spill] sm:$0xff] }
 0x4ba   :  { %v5121_v45 = vmul.f32 %v3920_v29, %v1996_v7 }
 0x4bc   :  { %v2401_v50 = vrot.slane %v5121_v45, 3  ;;  %v3524_v33 = vpack.c.bf16 %v5121_v45, %v5121_v45  ;;  %v2007_v37 = vsel %vm430_vm1, %v5121_v45, %v5549_v53 }
 0x4bd   :  { %v2009_v31 = vpack.c.bf16 %v2007_v37, %v2007_v37 }
 0x4be   :  { %3525 = vmatmul.msk.bf16.vlgmr.msra.gmra.mxu1 %vm4291_vm3, %v3524_v33  ;;  %3530 = vmatmul.msk.bf16.vlgmr.msra.gmra.mxu3 %vm4291_vm3, %v3524_v33  ;;  %v5135_v59 = vsel %vm2415_vm7, %v5043_v63, %v2401_v50 }
 0x4bf   :  { %2031 = vmatmul.bf16.vlgmr.msra.gmra.mxu0 %v2009_v31  ;;  %2057 = vmatmul.bf16.vlgmr.msra.gmra.mxu2 %v2009_v31 }
 0x4c0   :  { %2235 = vmatpush.bf16.msra.mxu1 %v4175_v43  ;;  %2261 = vmatpush.bf16.msra.mxu3 %v4179_v48  ;;  %v5719_v43 = vld [vmem:[#allocation22_spill] sm:$0xff]  ;;  %v5721_v48 = vld [vmem:[#allocation27_spill] sm:$0xff] }
 0x4c1   :  { %2222 = vmatpush.bf16.msra.mxu0 %v4173_v42  ;;  %2248 = vmatpush.bf16.msra.mxu2 %v4177_v44  ;;  %v5718_v42 = vld [vmem:[#allocation25_spill] sm:$0xff]  ;;  %v5720_v44 = vld [vmem:[#allocation24_spill] sm:$0xff] }
 0x4c4   :  { %2236 = vmatpush.bf16.msra.mxu1 %v4186_v55  ;;  %2262 = vmatpush.bf16.msra.mxu3 %v4191_v60  ;;  %v5723_v55 = vld [vmem:[#allocation26_spill] sm:$0xff]  ;;  %v5725_v60 = vld [vmem:[#allocation31_spill] sm:$0xff] }
 0x4c5   :  { %2223 = vmatpush.bf16.msra.mxu0 %v4182_v54  ;;  %2249 = vmatpush.bf16.msra.mxu2 %v4188_v56  ;;  %v5722_v54 = vld [vmem:[#allocation29_spill] sm:$0xff]  ;;  %v5724_v56 = vld [vmem:[#allocation28_spill] sm:$0xff] }
 0x4c8   :  { %2237 = vmatpush.bf16.msra.mxu1 %v4200_v4  ;;  %2263 = vmatpush.bf16.msra.mxu3 %v4205_v9  ;;  %v5727_v4 = vld [vmem:[#allocation30_spill] sm:$0xff]  ;;  %v5729_v9 = vld [vmem:[#allocation35_spill] sm:$0xff] }
 0x4c9   :  { %2224 = vmatpush.bf16.msra.mxu0 %v4196_v3  ;;  %2250 = vmatpush.bf16.msra.mxu2 %v4202_v5  ;;  %v5726_v3 = vld [vmem:[#allocation33_spill] sm:$0xff]  ;;  %v5728_v5 = vld [vmem:[#allocation32_spill] sm:$0xff] }
 0x4cc   :  { %2238 = vmatpush.bf16.msra.mxu1 %v4218_v16  ;;  %2264 = vmatpush.bf16.msra.mxu3 %v4223_v21  ;;  %v5731_v16 = vld [vmem:[#allocation34_spill] sm:$0xff]  ;;  %v5733_v21 = vld [vmem:[#allocation39_spill] sm:$0xff] }
 0x4cd   :  { %2225 = vmatpush.bf16.msra.mxu0 %v4214_v15  ;;  %2251 = vmatpush.bf16.msra.mxu2 %v4220_v17  ;;  %v5730_v15 = vld [vmem:[#allocation37_spill] sm:$0xff]  ;;  %v5732_v17 = vld [vmem:[#allocation36_spill] sm:$0xff] }
 0x4ce   :  { %3535 = vmatmul.msk.bf16.vlgmr.msrb.gmra.mxu1 %vm4291_vm3, %v3524_v33  ;;  %3540 = vmatmul.msk.bf16.vlgmr.msrb.gmra.mxu3 %vm4291_vm3, %v3524_v33 }
 0x4cf   :  { %2083 = vmatmul.bf16.vlgmr.msrb.gmra.mxu0 %v2009_v31  ;;  %2109 = vmatmul.bf16.vlgmr.msrb.gmra.mxu2 %v2009_v31 }
 0x4d0   :  { %2239 = vmatpush.bf16.msra.mxu1 %v4230_v27  ;;  %2265 = vmatpush.bf16.msra.mxu3 %v4235_v32  ;;  %v5735_v27 = vld [vmem:[#allocation38_spill] sm:$0xff]  ;;  %v5737_v32 = vld [vmem:[#allocation43_spill] sm:$0xff] }
 0x4d1   :  { %2226 = vmatpush.bf16.msra.mxu0 %v4226_v26  ;;  %2252 = vmatpush.bf16.msra.mxu2 %v4232_v28  ;;  %v5734_v26 = vld [vmem:[#allocation41_spill] sm:$0xff]  ;;  %v5736_v28 = vld [vmem:[#allocation40_spill] sm:$0xff] }
 0x4d4   :  { %2240 = vmatpush.bf16.msra.mxu1 %v4242_v40  ;;  %2266 = vmatpush.bf16.msra.mxu3 %v4247_v49  ;;  %v5739_v40 = vld [vmem:[#allocation42_spill] sm:$0xff]  ;;  %v5741_v49 = vld [vmem:[#allocation47_spill] sm:$0xff] }
 0x4d5   :  { %2227 = vmatpush.bf16.msra.mxu0 %v4238_v38  ;;  %2253 = vmatpush.bf16.msra.mxu2 %v4244_v41  ;;  %v5738_v38 = vld [vmem:[#allocation45_spill] sm:$0xff]  ;;  %v5740_v41 = vld [vmem:[#allocation44_spill] sm:$0xff] }
 0x4d8   :  { %2241 = vmatpush.bf16.msra.mxu1 %v5550_v52  ;;  %2267 = vmatpush.bf16.msra.mxu3 %v5551_v58  ;;  %v5742_v52 = vld [vmem:[#allocation49_spill] sm:$0xff]  ;;  %v5743_v58 = vld [vmem:[#allocation46_spill] sm:$0xff] }
 0x4d9   :  { %2228 = vmatpush.bf16.msra.mxu0 %v5552_v24  ;;  %2254 = vmatpush.bf16.msra.mxu2 %v5553_v36  ;;  %v5744_v24 = vld [vmem:[#allocation48_spill] sm:$0xff] }
 0x4dc   :  { %2242 = vmatpush.bf16.msra.mxu1 %v5554_v30  ;;  %2268 = vmatpush.bf16.msra.mxu3 %v5555_v23 }
 0x4dd   :  { %2229 = vmatpush.bf16.msra.mxu0 %v5556_v34  ;;  %2255 = vmatpush.bf16.msra.mxu2 %v5557_v62  ;;  %v5745_v34 = vld [vmem:[#allocation62_spill] sm:$0xff] }
 0x4e0   :  { %2287 = vmatpush.bf16.msrb.mxu1 %v5558_v11  ;;  %2313 = vmatpush.bf16.msrb.mxu3 %v5559_v20 }
 0x4e1   :  { %2274 = vmatpush.bf16.msrb.mxu0 %v5560_v57  ;;  %2300 = vmatpush.bf16.msrb.mxu2 %v5561_v12 }
 0x4e4   :  { %2288 = vmatpush.bf16.msrb.mxu1 %v5562_v1  ;;  %2314 = vmatpush.bf16.msrb.mxu3 %v5718_v42 }
 0x4e5   :  { %2275 = vmatpush.bf16.msrb.mxu0 %v5719_v43  ;;  %2301 = vmatpush.bf16.msrb.mxu2 %v5720_v44  ;;  %v5748_v43 = vld [vmem:[#allocation69_spill] sm:$0xff] }
 0x4e8   :  { %2289 = vmatpush.bf16.msrb.mxu1 %v5721_v48  ;;  %2315 = vmatpush.bf16.msrb.mxu3 %v5722_v54 }
 0x4e9   :  { %2276 = vmatpush.bf16.msrb.mxu0 %v5723_v55  ;;  %2302 = vmatpush.bf16.msrb.mxu2 %v5724_v56 }
 0x4ec   :  { %2290 = vmatpush.bf16.msrb.mxu1 %v5725_v60  ;;  %2316 = vmatpush.bf16.msrb.mxu3 %v5726_v3 }
 0x4ed   :  { %2277 = vmatpush.bf16.msrb.mxu0 %v5727_v4  ;;  %2303 = vmatpush.bf16.msrb.mxu2 %v5728_v5 }
 0x4f0   :  { %2291 = vmatpush.bf16.msrb.mxu1 %v5729_v9  ;;  %2317 = vmatpush.bf16.msrb.mxu3 %v5730_v15 }
 0x4f1   :  { %2278 = vmatpush.bf16.msrb.mxu0 %v5731_v16  ;;  %2304 = vmatpush.bf16.msrb.mxu2 %v5732_v17 }
 0x4f4   :  { %2292 = vmatpush.bf16.msrb.mxu1 %v5733_v21  ;;  %2318 = vmatpush.bf16.msrb.mxu3 %v5734_v26 }
 0x4f5   :  { %2279 = vmatpush.bf16.msrb.mxu0 %v5735_v27  ;;  %2305 = vmatpush.bf16.msrb.mxu2 %v5736_v28 }
 0x4f8   :  { %2293 = vmatpush.bf16.msrb.mxu1 %v5737_v32  ;;  %2319 = vmatpush.bf16.msrb.mxu3 %v5738_v38 }
 0x4f9   :  { %2280 = vmatpush.bf16.msrb.mxu0 %v5739_v40  ;;  %2306 = vmatpush.bf16.msrb.mxu2 %v5740_v41 }
 0x4fc   :  { %2294 = vmatpush.bf16.msrb.mxu1 %v5741_v49  ;;  %2320 = vmatpush.bf16.msrb.mxu3 %v5742_v52 }
 0x4fd   :  { %2281 = vmatpush.bf16.msrb.mxu0 %v5743_v58  ;;  %2307 = vmatpush.bf16.msrb.mxu2 %v5744_v24 }
 0x53b   :  { %v2045_v36 = vpop.f32.mrf.mxu1 }
 0x53c   :  { %v2032_v30 = vpop.f32.mrf.mxu0 }
 0x53d   :  { %v2046_v23 = vadd.f32 %v2045_v36, %v2032_v30 }
 0x53f   :  { %v2127_v62 = vadd.f32 %v2046_v23, %v5745_v34 }
 0x541   :  { %v3541_v11 = vmul.f32 -1.442695, %v2127_v62  ;;  %v2071_v20 = vpop.f32.mrf.mxu3 }
 0x542   :  { %v2058_v57 = vpop.f32.mrf.mxu2 }
 0x543   :  { %3921 = vpow2.f32 %v3541_v11  ;;  %v2072_v12 = vadd.f32 %v2071_v20, %v2058_v57  ;;  %v2047_v1 = vpop.f32.mrf.mxu1 }
 0x544   :  { %v2034_v63 = vpop.f32.mrf.mxu0 }
 0x545   :  { %v2128_v25 = vadd.f32 %v2072_v12, %v5746_v39 }
 0x547   :  { %v3542_v61 = vmul.f32 -1.442695, %v2128_v25 }
 0x549   :  { %v3922_v47 = vpop.eup %3921  ;;  %3923 = vpow2.f32 %v3542_v61  ;;  %v2073_v8 = vpop.f32.mrf.mxu3 }
 0x54a   :  { %v2134_v46 = vadd.f32 1.0, %v3922_v47  ;;  %v2060_v0 = vpop.f32.mrf.mxu2 }
 0x54b   :  { %v2097_v10 = vpop.f32.mrf.mxu1 }
 0x54c   :  { %3925 = vrcp.f32 %v2134_v46  ;;  %v2084_v18 = vpop.f32.mrf.mxu0  ;;  %v2146_v48 = vand.u32 2147483648, %v2134_v46  ;;  %v2144_v55 = vand.u32 2147483647, %v2134_v46  ;;  %vm2140_vm9 = vweird.f32 %v2134_v46 }
 0x54d   :  { %v2098_v19 = vadd.f32 %v2097_v10, %v2084_v18  ;;  %v5749_v10 = vld [vmem:[#allocation70_spill] sm:$0xff] }
 0x54e   :  { %v2147_v9 = vor.u32 1.1754944e-38, %v2146_v48  ;;  %vm2145_vm11 = vcmp.eq.f32.partialorder %v2144_v55, 8.507059e+37 }
 0x54f   :  { %v3924_v22 = vpop.eup %3923  ;;  %v2129_v29 = vadd.f32 %v2098_v19, %v5747_v6 }
 0x550   :  { %v2153_v13 = vadd.f32 1.0, %v3924_v22 }
 0x551   :  { %v2123_v35 = vpop.f32.mrf.mxu3 }
 0x552   :  { %v3926_v14 = vpop.eup %3925  ;;  %3927 = vrcp.f32 %v2153_v13  ;;  %v2110_v7 = vpop.f32.mrf.mxu2  ;;  %v2165_v26 = vand.u32 2147483648, %v2153_v13  ;;  %v2163_v32 = vand.u32 2147483647, %v2153_v13  ;;  %vm2159_vm13 = vweird.f32 %v2153_v13 }
 0x553   :  { %v2136_v50 = vmul.f32 %v3926_v14, %v2134_v46  ;;  %v2124_v33 = vadd.f32 %v2123_v35, %v2110_v7  ;;  %v2099_v37 = vpop.f32.mrf.mxu1  ;;  %3929 = vtanh.f32 %v2129_v29  ;;  %vm2141_vm8 = vweird.f32 %v3926_v14  ;;  %v5750_v29 = vld [vmem:[#allocation71_spill] sm:$0xff] }
 0x554   :  { %v2086_v31 = vpop.f32.mrf.mxu0  ;;  %vm2142_vm10 = vmor %vm2140_vm9, %vm2141_vm8  ;;  %v2166_v49 = vor.u32 1.1754944e-38, %v2165_v26  ;;  %vm2164_vm5 = vcmp.eq.f32.partialorder %v2163_v32, 8.507059e+37 }
 0x555   :  { %v2137_v42 = vsub.f32 1.0, %v2136_v50  ;;  %v2130_v44 = vadd.f32 %v2124_v33, %v5748_v43 }
 0x557   :  { %v2138_v54 = vmul.f32 %v3926_v14, %v2137_v42  ;;  %v3543_v56 = vmul.f32 -1.442695, %v2130_v44 }
 0x558   :  { %v3928_v60 = vpop.eup %3927 }
 0x559   :  { %v2155_v3 = vmul.f32 %v3928_v60, %v2153_v13  ;;  %v2139_v4 = vadd.f32 %v3926_v14, %v2138_v54  ;;  %3931 = vpow2.f32 %v3543_v56  ;;  %v2125_v5 = vpop.f32.mrf.mxu3  ;;  %v3930_v21 = vpop.eup %3929  ;;  %vm2160_vm12 = vweird.f32 %v3928_v60 }
 0x55a   :  { %v2112_v15 = vpop.f32.mrf.mxu2  ;;  %vm2161_vm2 = vmor %vm2159_vm13, %vm2160_vm12 }
 0x55b   :  { %v2156_v16 = vsub.f32 1.0, %v2155_v3  ;;  %v2143_v17 = vsel %vm2142_vm10, %v3926_v14, %v2139_v4 }
 0x55c   :  { %v2148_v27 = vsel %vm2145_vm11, %v2147_v9, %v2143_v17 }
 0x55d   :  { %v2157_v28 = vmul.f32 %v3928_v60, %v2156_v16  ;;  %v2190_v38 = vmul.f32 %v3930_v21, %v2148_v27  ;;  %v5752_v21 = vld [vmem:[#allocation73_spill] sm:$0xff] }
 0x55f   :  { %v3932_v40 = vpop.eup %3931  ;;  %v2158_v41 = vadd.f32 %v3928_v60, %v2157_v28 }
 0x560   :  { %v2173_v52 = vadd.f32 1.0, %v3932_v40 }
 0x561   :  { %v2162_v58 = vsel %vm2161_vm2, %v3928_v60, %v2158_v41  ;;  %v5751_v60 = vld [vmem:[#allocation72_spill] sm:$0xff] }
 0x562   :  { %v2167_v24 = vsel %vm2164_vm5, %v2166_v49, %v2162_v58  ;;  %3933 = vrcp.f32 %v2173_v52  ;;  %v2185_v11 = vand.u32 2147483648, %v2173_v52  ;;  %v2183_v57 = vand.u32 2147483647, %v2173_v52  ;;  %v3784_v41 = vld [vmem:[#allocation6 + $0x38] sm:$0xff] }
 0x563   :  { %v2189_v36 = vmul.f32 %v2167_v24, %v5118_v2  ;;  %vm2179_vm8 = vweird.f32 %v2173_v52  ;;  %v3792_v49 = vld [vmem:[#allocation6 + $0x78] sm:$0xff] }
 0x564   :  { %v2186_v1 = vor.u32 1.1754944e-38, %v2185_v11  ;;  %vm2184_vm10 = vcmp.eq.f32.partialorder %v2183_v57, 8.507059e+37 }
 0x565   :  { %v5210_v30 = vadd.f32 %v2190_v38, %v2189_v36 }
 0x567   :  { %3935 = vtanh.f32 %v5210_v30 }
 0x568   :  { %v3934_v23 = vpop.eup %3933 }
 0x569   :  { %v2175_v34 = vmul.f32 %v3934_v23, %v2173_v52  ;;  %vm2180_vm6 = vweird.f32 %v3934_v23 }
 0x56a   :  { %vm2181_vm9 = vmor %vm2179_vm8, %vm2180_vm6 }
 0x56b   :  { %v2176_v62 = vsub.f32 1.0, %v2175_v34  ;;  %v3783_v34 = vld [vmem:[#allocation6 + $0x30] sm:$0xff] }
 0x56d   :  { %v2177_v20 = vmul.f32 %v3934_v23, %v2176_v62  ;;  %v3936_v39 = vpop.eup %3935  ;;  %v3791_v62 = vld [vmem:[#allocation6 + $0x70] sm:$0xff] }
 0x56f   :  { %v2178_v12 = vadd.f32 %v3934_v23, %v2177_v20 }
 0x571   :  { %v2182_v63 = vsel %vm2181_vm9, %v3934_v23, %v2178_v12 }
 0x572   :  { %v2187_v25 = vsel %vm2184_vm10, %v2186_v1, %v2182_v63 }
 0x573   :  { %v5213_v2 = vmul.f32 %v3936_v39, %v2187_v25 }
 0x575   :  { %v3548_v61 = vpack.c.bf16 %v5213_v2, %v5213_v2  ;;  %v2198_v47 = vsel %vm430_vm1, %v5213_v2, %v5549_v53 }
 0x576   :  { %v2200_v8 = vpack.c.bf16 %v2198_v47, %v2198_v47  ;;  %v3790_v47 = vld [vmem:[#allocation6 + $0x68] sm:$0xff] }
 0x577   :  { %3549 = vmatmul.msk.bf16.vlgmr.msra.gmra.mxu1 %vm4291_vm3, %v3548_v61  ;;  %3554 = vmatmul.msk.bf16.vlgmr.msra.gmra.mxu3 %vm4291_vm3, %v3548_v61 }
 0x578   :  { %2230 = vmatmul.bf16.vlgmr.msra.gmra.mxu0 %v2200_v8  ;;  %2256 = vmatmul.bf16.vlgmr.msra.gmra.mxu2 %v2200_v8 }
 0x579   :  { %2651 = vmatpush.bf16.msra.mxu0 %v3784_v41  ;;  %2664 = vmatpush.bf16.msra.mxu1 %v3792_v49  ;;  %v5754_v49 = vld [vmem:[#allocation10_spill] sm:$0xff] }
 0x57d   :  { %2652 = vmatpush.bf16.msra.mxu0 %v3783_v34  ;;  %2665 = vmatpush.bf16.msra.mxu1 %v3791_v62  ;;  %v5756_v34 = vld [vmem:[#allocation12_spill] sm:$0xff] }
 0x581   :  { %2666 = vmatpush.bf16.msra.mxu1 %v3790_v47 }
 0x587   :  { %3559 = vmatmul.msk.bf16.vlgmr.msrb.gmra.mxu1 %vm4291_vm3, %v3548_v61  ;;  %3564 = vmatmul.msk.bf16.vlgmr.msrb.gmra.mxu3 %vm4291_vm3, %v3548_v61  ;;  %v3782_v61 = vld [vmem:[#allocation6 + $0x28] sm:$0xff] }
 0x588   :  { %2282 = vmatmul.bf16.vlgmr.msrb.gmra.mxu0 %v2200_v8  ;;  %2308 = vmatmul.bf16.vlgmr.msrb.gmra.mxu2 %v2200_v8 }
 0x589   :  { %2653 = vmatpush.bf16.msra.mxu0 %v3782_v61 }
 0x5f4   :  { %v2244_v46 = vpop.f32.mrf.mxu1 }
 0x5f5   :  { %v2231_v0 = vpop.f32.mrf.mxu0 }
 0x5f6   :  { %v2245_v53 = vadd.f32 %v2244_v46, %v2231_v0 }
 0x5f8   :  { %v2326_v18 = vadd.f32 %v2245_v53, %v5749_v10 }
 0x5fa   :  { %v3565_v19 = vmul.f32 -1.442695, %v2326_v18  ;;  %v2270_v22 = vpop.f32.mrf.mxu3 }
 0x5fb   :  { %v2257_v13 = vpop.f32.mrf.mxu2 }
 0x5fc   :  { %3937 = vpow2.f32 %v3565_v19  ;;  %v2271_v35 = vadd.f32 %v2270_v22, %v2257_v13  ;;  %v2246_v14 = vpop.f32.mrf.mxu1  ;;  %v3781_v19 = vld [vmem:[#allocation6 + $0x20] sm:$0xff] }
 0x5fd   :  { %v2233_v6 = vpop.f32.mrf.mxu0  ;;  %v3789_v22 = vld [vmem:[#allocation6 + $0x60] sm:$0xff]  ;;  %2654 = vmatpush.bf16.msra.mxu0 %v3781_v19  ;;  %v3780_v14 = vld [vmem:[#allocation6 + $0x18] sm:$0xff] }
 0x5fe   :  { %v2327_v7 = vadd.f32 %v2271_v35, %v5750_v29  ;;  %2667 = vmatpush.bf16.msra.mxu1 %v3789_v22  ;;  %v3788_v6 = vld [vmem:[#allocation6 + $0x58] sm:$0xff] }
 0x600   :  { %v3566_v50 = vmul.f32 -1.442695, %v2327_v7  ;;  %v4055_v7 = vmov 8.0  }
 0x601   :  { %2655 = vmatpush.bf16.msra.mxu0 %v3780_v14 }
 0x602   :  { %v3938_v33 = vpop.eup %3937  ;;  %3939 = vpow2.f32 %v3566_v50  ;;  %v2272_v51 = vpop.f32.mrf.mxu3  ;;  %2668 = vmatpush.bf16.msra.mxu1 %v3788_v6 }
 0x603   :  { %v2333_v37 = vadd.f32 1.0, %v3938_v33  ;;  %v2259_v31 = vpop.f32.mrf.mxu2  ;;  %v3779_v33 = vld [vmem:[#allocation6 + $0x10] sm:$0xff] }
 0x604   :  { %v2296_v42 = vpop.f32.mrf.mxu1  ;;  %v3787_v51 = vld [vmem:[#allocation6 + $0x50] sm:$0xff] }
 0x605   :  { %3941 = vrcp.f32 %v2333_v37  ;;  %v2283_v43 = vpop.f32.mrf.mxu0  ;;  %v2345_v27 = vand.u32 2147483648, %v2333_v37  ;;  %v2343_v32 = vand.u32 2147483647, %v2333_v37  ;;  %vm2339_vm11 = vweird.f32 %v2333_v37  ;;  %2656 = vmatpush.bf16.msra.mxu0 %v3779_v33 }
 0x606   :  { %v2297_v44 = vadd.f32 %v2296_v42, %v2283_v43  ;;  %2669 = vmatpush.bf16.msra.mxu1 %v3787_v51 }
 0x607   :  { %v2346_v36 = vor.u32 1.1754944e-38, %v2345_v27  ;;  %vm2344_vm13 = vcmp.eq.f32.partialorder %v2343_v32, 8.507059e+37  ;;  %v5753_v27 = vld [vmem:[#allocation9_spill] sm:$0xff] }
 0x608   :  { %v3940_v48 = vpop.eup %3939  ;;  %v2328_v3 = vadd.f32 %v2297_v44, %v5751_v60  ;;  %v3778_v44 = vld [vmem:[#allocation6 + $0x8] sm:$0xff] }
 0x609   :  { %v2352_v54 = vadd.f32 1.0, %v3940_v48  ;;  %v3786_v48 = vld [vmem:[#allocation6 + $0x48] sm:$0xff]  ;;  %2657 = vmatpush.bf16.msra.mxu0 %v3778_v44 }
 0x60a   :  { %v2322_v55 = vpop.f32.mrf.mxu3  ;;  %2670 = vmatpush.bf16.msra.mxu1 %v3786_v48 }
 0x60b   :  { %v3942_v56 = vpop.eup %3941  ;;  %3943 = vrcp.f32 %v2352_v54  ;;  %v2309_v4 = vpop.f32.mrf.mxu2  ;;  %v2364_v12 = vand.u32 2147483648, %v2352_v54  ;;  %v2362_v39 = vand.u32 2147483647, %v2352_v54  ;;  %vm2358_vm5 = vweird.f32 %v2352_v54 }
 0x60c   :  { %v2335_v5 = vmul.f32 %v3942_v56, %v2333_v37  ;;  %v2323_v9 = vadd.f32 %v2322_v55, %v2309_v4  ;;  %v2298_v15 = vpop.f32.mrf.mxu1  ;;  %3945 = vtanh.f32 %v2328_v3  ;;  %vm2340_vm3 = vweird.f32 %v3942_v56 }
 0x60d   :  { %v2285_v16 = vpop.f32.mrf.mxu0  ;;  %vm2341_vm12 = vmor %vm2339_vm11, %vm2340_vm3  ;;  %v2365_v0 = vor.u32 1.1754944e-38, %v2364_v12  ;;  %vm2363_vm8 = vcmp.eq.f32.partialorder %v2362_v39, 8.507059e+37 }
 0x60e   :  { %v2336_v17 = vsub.f32 1.0, %v2335_v5  ;;  %v2329_v26 = vadd.f32 %v2323_v9, %v5752_v21  ;;  %v3777_v5 = vld [vmem:[#allocation6] sm:$0xff]  ;;  %v2403_v9 = vrot.slane %v5213_v2, 2  ;;  %v2421_v21 = vrot.slane %v5121_v45, 7 }
 0x60f   :  { %2658 = vmatpush.bf16.msra.mxu0 %v3777_v5 }
 0x610   :  { %v2337_v28 = vmul.f32 %v3942_v56, %v2336_v17  ;;  %v3567_v38 = vmul.f32 -1.442695, %v2329_v26 }
 0x611   :  { %v3944_v40 = vpop.eup %3943 }
 0x612   :  { %v2354_v52 = vmul.f32 %v3944_v40, %v2352_v54  ;;  %v2338_v58 = vadd.f32 %v3942_v56, %v2337_v28  ;;  %3947 = vpow2.f32 %v3567_v38  ;;  %v2324_v24 = vpop.f32.mrf.mxu3  ;;  %v3946_v57 = vpop.eup %3945  ;;  %vm2359_vm2 = vweird.f32 %v3944_v40 }
 0x613   :  { %v2311_v23 = vpop.f32.mrf.mxu2  ;;  %vm2360_vm6 = vmor %vm2358_vm5, %vm2359_vm2  ;;  %v2423_v28 = vrot.slane %v5753_v27, 6  ;;  %v2509_v27 = vld [vmem:[%s5349_s5] sm:$0x3] }
 0x614   :  { %v2355_v11 = vsub.f32 1.0, %v2354_v52  ;;  %v2342_v20 = vsel %vm2341_vm12, %v3942_v56, %v2338_v58  ;;  %vm2417_vm12 = vcmask 1045504   ;;  %v2425_v52 = vrot.slane %v5754_v49, 4 }
 0x615   :  { %v2347_v1 = vsel %vm2344_vm13, %v2346_v36, %v2342_v20  ;;  %vm2419_vm13 = vcmask 1046528   ;;  %v2418_v26 = vsel %vm2417_vm12, %v5135_v59, %v2403_v9  ;;  %v5755_v36 = vld [vmem:[#allocation14_spill] sm:$0xff]  ;;  %v5757_v59 = vrot.slane %v5756_v34, 5  ;;  %v2477_v9 = vld [vmem:[%s5348_s4] sm:$0x3] }
 0x616   :  { %v2356_v63 = vmul.f32 %v3944_v40, %v2355_v11  ;;  %v2389_v25 = vmul.f32 %v3946_v57, %v2347_v1  ;;  %v2427_v23 = vrot.slane %v5755_v36, 3  ;;  %v5758_v11 = vld [vmem:[#allocation74_spill] sm:$0xff] }
 0x617   :  { %v2429_v20 = vrot.slane %v5758_v11, 2 }
 0x618   :  { %v3948_v8 = vpop.eup %3947  ;;  %v2357_v46 = vadd.f32 %v3944_v40, %v2356_v63 }
 0x619   :  { %v2372_v53 = vadd.f32 1.0, %v3948_v8 }
 0x61a   :  { %v2361_v10 = vsel %vm2360_vm6, %v3944_v40, %v2357_v46 }
 0x61b   :  { %v2366_v18 = vsel %vm2363_vm8, %v2365_v0, %v2361_v10  ;;  %3949 = vrcp.f32 %v2372_v53  ;;  %v2384_v31 = vand.u32 2147483648, %v2372_v53  ;;  %v2382_v43 = vand.u32 2147483647, %v2372_v53 }
 0x61c   :  { %v2388_v13 = vmul.f32 %v2366_v18, %v5210_v30  ;;  %3951 = vrcp.f32 %v4055_v7  ;;  %vm2378_vm10 = vweird.f32 %v2372_v53 }
 0x61d   :  { %v2385_v55 = vor.u32 1.1754944e-38, %v2384_v31  ;;  %vm2383_vm11 = vcmp.eq.f32.partialorder %v2382_v43, 8.507059e+37  ;;  %v3785_v31 = vld [vmem:[#allocation6 + $0x40] sm:$0xff] }
 0x61e   :  { %v2390_v35 = vadd.f32 %v2389_v25, %v2388_v13  ;;  %2671 = vmatpush.bf16.msra.mxu1 %v3785_v31 }
 0x620   :  { %3953 = vtanh.f32 %v2390_v35 }
 0x621   :  { %v3950_v29 = vpop.eup %3949 }
 0x622   :  { %v2374_v50 = vmul.f32 %v3950_v29, %v2372_v53  ;;  %vm2379_vm9 = vweird.f32 %v3950_v29  ;;  %v3952_v30 = vpop.eup %3951 }
 0x623   :  { %vm2380_vm3 = vmor %vm2378_vm10, %vm2379_vm9  ;;  %v2451_v60 = vmul.f32 8.0, %v3952_v30 }
 0x624   :  { %v2375_v37 = vsub.f32 1.0, %v2374_v50 }
 0x625   :  { %v2452_v17 = vsub.f32 1.0, %v2451_v60 }
 0x626   :  { %v2376_v42 = vmul.f32 %v3950_v29, %v2375_v37  ;;  %v3954_v3 = vpop.eup %3953 }
 0x627   :  { %v2453_v58 = vmul.f32 %v3952_v30, %v2452_v17 }
 0x628   :  { %v2377_v54 = vadd.f32 %v3950_v29, %v2376_v42 }
 0x629   :  { %v2454_v1 = vadd.f32 %v3952_v30, %v2453_v58 }
 0x62a   :  { %v2381_v56 = vsel %vm2380_vm3, %v3950_v29, %v2377_v54 }
 0x62b   :  { %v2386_v4 = vsel %vm2383_vm11, %v2385_v55, %v2381_v56 }
 0x62c   :  { %v2392_v15 = vmul.f32 %v3954_v3, %v2386_v4 }
 0x62e   :  { %v2406_v16 = vrot.slane %v2392_v15, 1 }
 0x630   :  { %v2431_v32 = vsel %vm430_vm1, %v2406_v16, %v5213_v2  ;;  %v2420_v38 = vsel %vm2419_vm13, %v2418_v26, %v2406_v16  ;;  %vm2455_vm1 = vweird.f32 %v3952_v30 }
 0x631   :  { %v2432_v40 = vsel %vm2409_vm14, %v2431_v32, %v2421_v21  ;;  %v2438_v41 = vrot.slane %v2420_v38, 4  ;;  %v5252_v8 = vsel %vm2455_vm1, %v3952_v30, %v2454_v1  ;;  %v2479_v21 = vperm.slane %v2477_v9, 0  ;;  %v3816_v1 = vld [vmem:[%s5351_s7] ss:$0 sm:$0xff] }
 0x632   :  { %v2433_v24 = vsel %vm2411_vm15, %v2432_v40, %v2423_v28 }
 0x633   :  { %v2439_v45 = vadd.f32 %v2438_v41, %v2420_v38  ;;  %v2434_v62 = vsel %vm2413_vm4, %v2433_v24, %v5757_v59  ;;  %v2511_v41 = vperm.slane %v2509_v27, 0  ;;  %v2480_v24 = vperm.slane %v2477_v9, 1 }
 0x634   :  { %v2435_v2 = vsel %vm2415_vm7, %v2434_v62, %v2425_v52  ;;  %v2512_v62 = vperm.slane %v2509_v27, 1 }
 0x635   :  { %v2440_v57 = vrot.slane %v2439_v45, 2  ;;  %v2436_v12 = vsel %vm2417_vm12, %v2435_v2, %v2427_v23  ;;  %vm2892_vm12 = vcmask 15360  }
 0x636   :  { %v2437_v63 = vsel %vm2419_vm13, %v2436_v12, %v2429_v20 }
 0x637   :  { %v2441_v39 = vadd.f32 %v2440_v57, %v2439_v45  ;;  %v2444_v25 = vrot.slane %v2437_v63, 4 }
 0x639   :  { %v2442_v61 = vrot.slane %v2441_v39, 1  ;;  %v2445_v47 = vadd.f32 %v2444_v25, %v2437_v63 }
 0x63b   :  { %v2443_v46 = vadd.f32 %v2442_v61, %v2441_v39  ;;  %v2446_v0 = vrot.slane %v2445_v47, 2 }
 0x63d   :  { %v2457_v53 = vmul.f32 %v5252_v8, %v2443_v46  ;;  %v2447_v10 = vadd.f32 %v2446_v0, %v2445_v47  ;;  %v3800_v46 = vld [vmem:[%s5354_s10 + $0x38] sm:$0xff] }
 0x63e   :  { %2785 = vmatpush.bf16.msra.mxu2 %v3800_v46 }
 0x63f   :  { %v2459_v18 = vsub.f32 %v2420_v38, %v2457_v53  ;;  %v2448_v19 = vrot.slane %v2447_v10, 1 }
 0x641   :  { %v2461_v22 = vmul.f32 %v2459_v18, %v2459_v18  ;;  %v2449_v13 = vadd.f32 %v2448_v19, %v2447_v10  ;;  %v2483_v40 = vmul.f32 %v2479_v21, %v2459_v18  ;;  %v3799_v18 = vld [vmem:[%s5354_s10 + $0x30] sm:$0xff] }
 0x642   :  { %2786 = vmatpush.bf16.msra.mxu2 %v3799_v18 }
 0x643   :  { %v2463_v35 = vrot.slane %v2461_v22, 4  ;;  %v2458_v14 = vmul.f32 %v5252_v8, %v2449_v13  ;;  %v3798_v13 = vld [vmem:[%s5354_s10 + $0x28] sm:$0xff] }
 0x645   :  { %v2464_v6 = vadd.f32 %v2463_v35, %v2461_v22  ;;  %v2460_v29 = vsub.f32 %v2437_v63, %v2458_v14 }
 0x646   :  { %2787 = vmatpush.bf16.msra.mxu2 %v3798_v13  ;;  %v3820_v13 = vld [vmem:[%s5356_s12] ss:$0 sm:$0xff] }
 0x647   :  { %v2465_v7 = vrot.slane %v2464_v6, 2  ;;  %v2462_v50 = vmul.f32 %v2460_v29, %v2460_v29  ;;  %v2484_v59 = vmul.f32 %v2480_v24, %v2460_v29 }
 0x649   :  { %v2466_v33 = vadd.f32 %v2465_v7, %v2464_v6  ;;  %v2469_v51 = vrot.slane %v2462_v50, 4  ;;  %v3797_v6 = vld [vmem:[%s5354_s10 + $0x20] sm:$0xff] }
 0x64a   :  { %2788 = vmatpush.bf16.msra.mxu2 %v3797_v6 }
 0x64b   :  { %v2467_v37 = vrot.slane %v2466_v33, 1  ;;  %v2470_v42 = vadd.f32 %v2469_v51, %v2462_v50  ;;  %v3796_v50 = vld [vmem:[%s5354_s10 + $0x18] sm:$0xff] }
 0x64d   :  { %v2468_v43 = vadd.f32 %v2467_v37, %v2466_v33  ;;  %v2471_v30 = vrot.slane %v2470_v42, 2  ;;  %v3795_v37 = vld [vmem:[%s5354_s10 + $0x10] sm:$0xff] }
 0x64e   :  { %2789 = vmatpush.bf16.msra.mxu2 %v3796_v50 }
 0x64f   :  { %v2475_v44 = vmul.f32 %v2468_v43, %v5252_v8  ;;  %v2472_v48 = vadd.f32 %v2471_v30, %v2470_v42  ;;  %v3794_v43 = vld [vmem:[%s5354_s10 + $0x8] sm:$0xff] }
 0x651   :  { %v2485_v54 = vadd.f32 1e-05, %v2475_v44  ;;  %v2473_v55 = vrot.slane %v2472_v48, 1  ;;  %v3793_v44 = vld [vmem:[%s5354_s10] sm:$0xff] }
 0x652   :  { %2790 = vmatpush.bf16.msra.mxu2 %v3795_v37 }
 0x653   :  { %3955 = vrsqrt.f32 %v2485_v54  ;;  %v2474_v56 = vadd.f32 %v2473_v55, %v2472_v48  ;;  %vm2493_vm15 = vweird.f32 %v2485_v54 }
 0x655   :  { %v2476_v60 = vmul.f32 %v2474_v56, %v5252_v8 }
 0x656   :  { %2791 = vmatpush.bf16.msra.mxu2 %v3794_v43 }
 0x657   :  { %v2486_v3 = vadd.f32 1e-05, %v2476_v60 }
 0x659   :  { %v3956_v4 = vpop.eup %3955  ;;  %3957 = vrsqrt.f32 %v2486_v3  ;;  %vm2503_vm2 = vweird.f32 %v2486_v3 }
 0x65a   :  { %v2488_v5 = vmul.f32 %v3956_v4, %v2485_v54  ;;  %vm2494_vm14 = vweird.f32 %v3956_v4  ;;  %2792 = vmatpush.bf16.msra.mxu2 %v3793_v44 }
 0x65b   :  { %vm2495_vm4 = vmor %vm2493_vm15, %vm2494_vm14 }
 0x65c   :  { %v2489_v15 = vmul.f32 %v3956_v4, %v2488_v5  ;;  %v3817_v5 = vld [vmem:[%s5352_s8] ss:$0 sm:$0xff] }
 0x65e   :  { %v2490_v16 = vmul.f32 0.5, %v2489_v15 }
 0x65f   :  { %v3958_v17 = vpop.eup %3957 }
 0x660   :  { %v2491_v26 = vsub.f32 1.5, %v2490_v16  ;;  %v2498_v28 = vmul.f32 %v3958_v17, %v2486_v3  ;;  %vm2504_vm7 = vweird.f32 %v3958_v17 }
 0x661   :  { %vm2505_vm5 = vmor %vm2503_vm2, %vm2504_vm7 }
 0x662   :  { %v2492_v32 = vmul.f32 %v3956_v4, %v2491_v26  ;;  %v2499_v38 = vmul.f32 %v3958_v17, %v2498_v28 }
 0x664   :  { %v2496_v49 = vsel %vm2495_vm4, %v3956_v4, %v2492_v32  ;;  %v2500_v52 = vmul.f32 0.5, %v2499_v38  ;;  %v3819_v38 = vld [vmem:[%s5355_s11] ss:$0 sm:$0xff] }
 0x665   :  { %v2507_v58 = vmul.f32 %v2496_v49, %v2483_v40 }
 0x666   :  { %v2501_v45 = vsub.f32 1.5, %v2500_v52 }
 0x667   :  { %v2515_v36 = vadd.f32 %v2511_v41, %v2507_v58 }
 0x668   :  { %v2502_v23 = vmul.f32 %v3958_v17, %v2501_v45 }
 0x669   :  { %v2517_v34 = vpack.c.bf16 %v2515_v36, %v2515_v36 }
 0x66a   :  { %v2506_v11 = vsel %vm2505_vm5, %v3958_v17, %v2502_v23  ;;  %v3818_v17 = vld [vmem:[%s5353_s9] ss:$0 sm:$0xff] }
 0x66b   :  { %2659 = vmatmul.bf16.vlgmr.msra.gmra.mxu0 %v2517_v34  ;;  %v2508_v20 = vmul.f32 %v2506_v11, %v2484_v59 }
 0x66d   :  { %v2516_v2 = vadd.f32 %v2512_v62, %v2508_v20 }
 0x66f   :  { %v2518_v57 = vpack.c.bf16 %v2516_v2, %v2516_v2  ;;  %v3804_v2 = vld [vmem:[%s5358_s14 + $0x18] sm:$0xff] }
 0x670   :  { %2883 = vmatpush.bf16.msra.mxu3 %v3804_v2 }
 0x671   :  { %2672 = vmatmul.bf16.vlgmr.msra.gmra.mxu1 %v2518_v57 }
 0x6e8   :  { %v2660_v12 = vpop.f32.mrf.mxu0 }
 0x6e9   :  { %v2661_v63 = vadd.f32 %v3816_v1, %v2660_v12  ;;  %v3803_v1 = vld [vmem:[%s5358_s14 + $0x10] sm:$0xff] }
 0x6ea   :  { %2884 = vmatpush.bf16.msra.mxu3 %v3803_v1 }
 0x6ee   :  { %v2673_v39 = vpop.f32.mrf.mxu1 }
 0x6ef   :  { %v2674_v25 = vadd.f32 %v2673_v39, %v2661_v63 }
 0x6f0   :  { %v2662_v61 = vpop.f32.mrf.mxu0 }
 0x6f1   :  { %v2677_v47 = vrot.slane %v2674_v25, 4 }
 0x6f3   :  { %v2678_v0 = vadd.f32 %v2677_v47, %v2674_v25  ;;  %v3801_v47 = vld [vmem:[%s5358_s14] sm:$0xff] }
 0x6f5   :  { %v2679_v53 = vrot.slane %v2678_v0, 2 }
 0x6f6   :  { %v2675_v10 = vpop.f32.mrf.mxu1 }
 0x6f7   :  { %v2680_v19 = vadd.f32 %v2679_v53, %v2678_v0 }
 0x6f9   :  { %v2681_v22 = vrot.slane %v2680_v19, 1 }
 0x6fb   :  { %v2682_v35 = vadd.f32 %v2681_v22, %v2680_v19 }
 0x6fd   :  { %v2683_v14 = vmul.f32 %v2682_v35, %v5252_v8 }
 0x6ff   :  { %v2684_v29 = vsub.f32 %v2674_v25, %v2683_v14  ;;  %v3802_v25 = vld [vmem:[%s5358_s14 + $0x8] sm:$0xff] }
 0x700   :  { %2885 = vmatpush.bf16.msra.mxu3 %v3802_v25 }
 0x701   :  { %v2685_v7 = vmul.f32 %v2684_v29, %v2684_v29  ;;  %v2697_v16 = vmul.f32 %v3817_v5, %v2684_v29  ;;  %v3821_v29 = vld [vmem:[%s5357_s13] ss:$0 sm:$0xff] }
 0x703   :  { %v2686_v33 = vrot.slane %v2685_v7, 4 }
 0x704   :  { %2886 = vmatpush.bf16.msra.mxu3 %v3801_v47 }
 0x705   :  { %v2687_v51 = vadd.f32 %v2686_v33, %v2685_v7 }
 0x707   :  { %v2688_v31 = vrot.slane %v2687_v51, 2 }
 0x709   :  { %v2689_v42 = vadd.f32 %v2688_v31, %v2687_v51  ;;  %v3822_v31 = vld [vmem:[%s5359_s15] ss:$0 sm:$0xff] }
 0x70b   :  { %v2690_v30 = vrot.slane %v2689_v42, 1 }
 0x70d   :  { %v2691_v48 = vadd.f32 %v2690_v30, %v2689_v42 }
 0x70f   :  { %v2692_v54 = vmul.f32 %v2691_v48, %v5252_v8 }
 0x711   :  { %v2698_v55 = vadd.f32 1e-05, %v2692_v54 }
 0x713   :  { %3959 = vrsqrt.f32 %v2698_v55  ;;  %vm2705_vm8 = vweird.f32 %v2698_v55 }
 0x719   :  { %v3960_v56 = vpop.eup %3959 }
 0x71a   :  { %v2700_v60 = vmul.f32 %v3960_v56, %v2698_v55  ;;  %vm2706_vm6 = vweird.f32 %v3960_v56 }
 0x71b   :  { %vm2707_vm9 = vmor %vm2705_vm8, %vm2706_vm6 }
 0x71c   :  { %v2701_v3 = vmul.f32 %v3960_v56, %v2700_v60 }
 0x71e   :  { %v2702_v4 = vmul.f32 0.5, %v2701_v3 }
 0x720   :  { %v2703_v9 = vsub.f32 1.5, %v2702_v4 }
 0x722   :  { %v2704_v15 = vmul.f32 %v3960_v56, %v2703_v9 }
 0x724   :  { %v2708_v21 = vsel %vm2707_vm9, %v3960_v56, %v2704_v15 }
 0x725   :  { %v2709_v26 = vmul.f32 %v2708_v21, %v2697_v16 }
 0x727   :  { %v2714_v27 = vadd.f32 %v3818_v17, %v2709_v26 }
 0x729   :  { %v2715_v28 = vmax.f32 %v2714_v27, 0.0 }
 0x72b   :  { %v2716_v32 = vpack.c.bf16 %v2715_v28, %v2715_v28 }
 0x72d   :  { %2793 = vmatmul.bf16.vlgmr.msra.gmra.mxu2 %v2716_v32 }
 0x7b0   :  { %v2794_v40 = vpop.f32.mrf.mxu2 }
 0x7b1   :  { %v2795_v41 = vadd.f32 %v3819_v38, %v2794_v40 }
 0x7b3   :  { %v2798_v49 = vsel %vm319_vm0, %v2795_v41, 0.0 }
 0x7b4   :  { %v2799_v52 = vrot.slane %v2798_v49, 4 }
 0x7b6   :  { %v2800_v58 = vadd.f32 %v2799_v52, %v2798_v49 }
 0x7b8   :  { %v2801_v24 = vrot.slane %v2800_v58, 2  ;;  %v2796_v45 = vpop.f32.mrf.mxu2 }
 0x7ba   :  { %v2802_v36 = vadd.f32 %v2801_v24, %v2800_v58  ;;  %v3823_v58 = vld [vmem:[%s5360_s16] ss:$0 sm:$0xff] }
 0x7bc   :  { %v2803_v23 = vrot.slane %v2802_v36, 1 }
 0x7be   :  { %v2804_v34 = vadd.f32 %v2803_v23, %v2802_v36 }
 0x7c0   :  { %v2805_v59 = vmul.f32 %v2804_v34, %v5252_v8 }
 0x7c2   :  { %v2806_v62 = vsub.f32 %v2795_v41, %v2805_v59 }
 0x7c4   :  { %v2807_v11 = vmul.f32 %v2806_v62, %v2806_v62  ;;  %v2820_v6 = vmul.f32 %v3820_v13, %v2806_v62 }
 0x7c6   :  { %v2808_v20 = vsel %vm319_vm0, %v2807_v11, 0.0 }
 0x7c7   :  { %v2809_v57 = vrot.slane %v2808_v20, 4 }
 0x7c9   :  { %v2810_v12 = vadd.f32 %v2809_v57, %v2808_v20 }
 0x7cb   :  { %v2811_v63 = vrot.slane %v2810_v12, 2 }
 0x7cd   :  { %v2812_v39 = vadd.f32 %v2811_v63, %v2810_v12 }
 0x7cf   :  { %v2813_v61 = vrot.slane %v2812_v39, 1 }
 0x7d1   :  { %v2814_v46 = vadd.f32 %v2813_v61, %v2812_v39 }
 0x7d3   :  { %v2815_v0 = vmul.f32 %v2814_v46, %v5252_v8 }
 0x7d5   :  { %v2821_v53 = vadd.f32 1e-05, %v2815_v0 }
 0x7d7   :  { %3961 = vrsqrt.f32 %v2821_v53  ;;  %vm2828_vm3 = vweird.f32 %v2821_v53 }
 0x7dd   :  { %v3962_v10 = vpop.eup %3961 }
 0x7de   :  { %v2823_v18 = vmul.f32 %v3962_v10, %v2821_v53  ;;  %vm2829_vm10 = vweird.f32 %v3962_v10 }
 0x7df   :  { %vm2830_vm11 = vmor %vm2828_vm3, %vm2829_vm10 }
 0x7e0   :  { %v2824_v19 = vmul.f32 %v3962_v10, %v2823_v18 }
 0x7e2   :  { %v2825_v22 = vmul.f32 0.5, %v2824_v19 }
 0x7e4   :  { %v2826_v35 = vsub.f32 1.5, %v2825_v22 }
 0x7e6   :  { %v2827_v14 = vmul.f32 %v3962_v10, %v2826_v35 }
 0x7e8   :  { %v2831_v7 = vsel %vm2830_vm11, %v3962_v10, %v2827_v14 }
 0x7e9   :  { %v2832_v50 = vmul.f32 %v2831_v7, %v2820_v6 }
 0x7eb   :  { %v2837_v33 = vadd.f32 %v3821_v29, %v2832_v50 }
 0x7ed   :  { %v2838_v51 = vmax.f32 %v2837_v33, 0.0 }
 0x7ef   :  { %v2839_v37 = vpack.c.bf16 %v2838_v51, %v2838_v51 }
 0x7f1   :  { %3680 = vmatmul.msk.bf16.vlgmr.msra.gmra.mxu3 %vm319_vm0, %v2839_v37 }
 0x874   :  { %v2888_v42 = vpop.f32.mrf.mxu3 }
 0x875   :  { %v2889_v43 = vadd.f32 %v3822_v31, %v2888_v42 }
 0x877   :  { %v2893_v30 = vsel %vm2892_vm12, %v2889_v43, 0.0 }
 0x878   :  { %v2894_v44 = vrot.slane %v2893_v30, 4 }
 0x87a   :  { %v2895_v48 = vadd.f32 %v2894_v44, %v2893_v30 }
 0x87c   :  { %v2896_v54 = vrot.slane %v2895_v48, 2  ;;  %v2890_v55 = vpop.f32.mrf.mxu3 }
 0x87e   :  { %v2897_v56 = vadd.f32 %v2896_v54, %v2895_v48 }
 0x880   :  { %v2898_v60 = vrot.slane %v2897_v56, 1 }
 0x882   :  { %v2899_v3 = vadd.f32 %v2898_v60, %v2897_v56 }
 0x884   :  { %v2900_v4 = vmul.f32 %v2899_v3, %v5252_v8 }
 0x886   :  { %v2901_v5 = vsub.f32 %v2889_v43, %v2900_v4 }
 0x888   :  { %v2902_v9 = vmul.f32 %v2901_v5, %v2901_v5  ;;  %v2915_v36 = vmul.f32 %v3823_v58, %v2901_v5 }
 0x88a   :  { %v2903_v15 = vsel %vm2892_vm12, %v2902_v9, 0.0 }
 0x88b   :  { %v2904_v16 = vrot.slane %v2903_v15, 4 }
 0x88d   :  { %v2905_v17 = vadd.f32 %v2904_v16, %v2903_v15 }
 0x88f   :  { %v2906_v21 = vrot.slane %v2905_v17, 2 }
 0x891   :  { %v2907_v26 = vadd.f32 %v2906_v21, %v2905_v17 }
 0x893   :  { %v2908_v27 = vrot.slane %v2907_v26, 1 }
 0x895   :  { %v2909_v28 = vadd.f32 %v2908_v27, %v2907_v26 }
 0x897   :  { %v2910_v32 = vmul.f32 %v2909_v28, %v5252_v8  ;;  %v3824_v8 = vld [vmem:[%s5361_s17] ss:$0 sm:$0xff] }
 0x899   :  { %v2916_v38 = vadd.f32 1e-05, %v2910_v32 }
 0x89b   :  { %3963 = vrsqrt.f32 %v2916_v38  ;;  %vm2923_vm13 = vweird.f32 %v2916_v38 }
 0x8a1   :  { %v3964_v40 = vpop.eup %3963 }
 0x8a2   :  { %v2918_v41 = vmul.f32 %v3964_v40, %v2916_v38  ;;  %vm2924_vm0 = vweird.f32 %v3964_v40 }
 0x8a3   :  { %vm2925_vm1 = vmor %vm2923_vm13, %vm2924_vm0 }
 0x8a4   :  { %v2919_v49 = vmul.f32 %v3964_v40, %v2918_v41 }
 0x8a6   :  { %v2920_v52 = vmul.f32 0.5, %v2919_v49 }
 0x8a8   :  { %v2921_v24 = vsub.f32 1.5, %v2920_v52 }
 0x8aa   :  { %v2922_v45 = vmul.f32 %v3964_v40, %v2921_v24 }
 0x8ac   :  { %v2926_v23 = vsel %vm2925_vm1, %v3964_v40, %v2922_v45 }
 0x8ad   :  { %v2927_v34 = vmul.f32 %v2926_v23, %v2915_v36 }
 0x8af   :  { %v2932_v59 = vadd.f32 %v3824_v8, %v2927_v34 }
 0x8b1   :  { %v2933_v62 = vmax.f32 %v2932_v59, 0.0 }
 0x8b3   :  { %v2934_v11 = vsel %vm2892_vm12, %v2933_v62, -inf }
 0x8b4   :  { %2935 = vmax.xlane.f32.xlu0 %v2934_v11 }
 0x927   :  { %v2936_v20 = vpop.xlane.xlu0 %2935 }
 0x928   :  { %v2937_v2 = vsub.f32 %v2933_v62, %v2936_v20 }
 0x92a   :  { %v2938_v57 = vmul.f32 1.442695, %v2937_v2 }
 0x92c   :  { %3965 = vpow2.f32 %v2938_v57 }
 0x932   :  { %v3966_v12 = vpop.eup %3965 }
 0x933   :  { %v2940_v1 = vsel %vm2892_vm12, %v3966_v12, 0.0 }
 0x934   :  { %2941 = vadd.xlane.f32.xlu0 %v2940_v1 }
 0x9a7   :  { %v2942_v63 = vpop.xlane.xlu0 %2941 }
 0x9a8   :  { %3967 = vrcp.f32 %v2942_v63  ;;  %v2954_v47 = vand.u32 2147483648, %v2942_v63  ;;  %v2952_v0 = vand.u32 2147483647, %v2942_v63  ;;  %vm2948_vm15 = vweird.f32 %v2942_v63 }
 0x9aa   :  { %v2955_v10 = vor.u32 1.1754944e-38, %v2954_v47  ;;  %vm2953_vm7 = vcmp.eq.f32.partialorder %v2952_v0, 8.507059e+37 }
 0x9ae   :  { %v3968_v39 = vpop.eup %3967 }
 0x9af   :  { %v2944_v25 = vmul.f32 %v3968_v39, %v2942_v63  ;;  %vm2949_vm14 = vweird.f32 %v3968_v39 }
 0x9b0   :  { %vm2950_vm4 = vmor %vm2948_vm15, %vm2949_vm14 }
 0x9b1   :  { %v2945_v61 = vsub.f32 1.0, %v2944_v25 }
 0x9b3   :  { %v2946_v46 = vmul.f32 %v3968_v39, %v2945_v61 }
 0x9b5   :  { %v2947_v53 = vadd.f32 %v3968_v39, %v2946_v46 }
 0x9b7   :  { %v2951_v18 = vsel %vm2950_vm4, %v3968_v39, %v2947_v53 }
 0x9b8   :  { %v2956_v19 = vsel %vm2953_vm7, %v2955_v10, %v2951_v18 }
 0x9b9   :  { %v2957_v22 = vmul.f32 %v3966_v12, %v2956_v19 }
 0x9bb   :  { %2958 = vst.msk [vmem:[%s5759_s29] sm:$0xff] %vm2892_vm12, %v2957_v22 }
 0x9bc   :  { %2963 = vsyncpa [#allocation3], 1 }
 0x9bd   :  { %2964 = vsyncpa [#allocation5], 1 }

</bundles_post_ra>
